<compile_context>
chip_gen: v7x
topology: tpu7x:2x2x1
jax: 0.10.0
libtpu: 0.0.40
codegen_flags: <defaults>
</compile_context>

<pallas_src>
import numpy as np
import jax
import jax.numpy as jnp
from jax import lax
from jax.experimental import pallas as pl
from jax.experimental.pallas import tpu as pltpu

VOCAB = 50
EMBED = 32
HIDDEN = 32
NUM_LAYERS = 2
OUT_DIM = 1
BATCH = 2
SEQ = 8
BP = 8            # batch padded to one full sublane group (feedback item 1)


# --------------------------- fused forward kernel ---------------------------
def fused_kernel(ids_ref, tab1_ref, bias1_ref, ws1_ref,
                 wih2a_ref, wih2b_ref, bias2_ref, ws2_ref,
                 wattf_ref, wattb_ref, batt_ref,
                 w1a_ref, w1b_ref, b1_ref, w2_ref, b2_ref,
                 out_ref,
                 l1f_scr, l1b_scr, l2f_scr, l2b_scr):
    T, B, H, V = SEQ, BP, HIDDEN, VOCAB
    f32 = jnp.float32

    # ---- embedding lookup fused with layer-1 input projection:
    #      one-hot(ids) @ (emb @ Wih1)  (table folded on host) + bias.
    #      Embedding dropout is identity (eval). ----
    ids = ids_ref[...]                                                 # (T*B, 1) int32
    onehot = (ids == lax.broadcasted_iota(jnp.int32, (T * B, V), 1)).astype(f32)
    gx1 = jnp.dot(onehot, tab1_ref[...], preferred_element_type=f32) + bias1_ref[...]

    def bidir_layer(gx, ws_ref, outf_ref, outb_ref):
        """Both directions of one LSTM layer, fully unrolled over T.

        gx: (T*B, 8H) hoisted input projection with biases folded; columns
        [0:4H] are forward gates, [4H:8H] backward gates.  h/c carry both
        directions stacked along sublanes (rows [0:B] fwd, [B:2B] bwd); the
        recurrent weights Whh_f|Whh_b are stacked along lanes, so each step is
        ONE MXU push + ONE sigmoid + ONE tanh for both directions.
        """
        ws = ws_ref[...]                    # (H, 8H): cols 0:4H Whh_f, 4H:8H Whh_b
        h = jnp.zeros((2 * B, H), f32)
        c = jnp.zeros((2 * B, H), f32)
        for t in range(T):                  # fully unrolled (T = 8)
            tb = T - 1 - t
            ga = jnp.dot(h, ws, preferred_element_type=f32)          # (2B, 8H)
            g = jnp.concatenate(                                     # (2B, 4H), aligned
                [ga[0:B, 0:4 * H] + gx[t * B:(t + 1) * B, 0:4 * H],
                 ga[B:2 * B, 4 * H:8 * H] + gx[tb * B:(tb + 1) * B, 4 * H:8 * H]],
                axis=0)
            s = jax.nn.sigmoid(g)           # one full-width EUP push (i, f, o)
            u = jnp.tanh(g)                 # one full-width EUP push (cell gate)
            c = s[:, H:2 * H] * c + s[:, 0:H] * u[:, 2 * H:3 * H]
            h = s[:, 3 * H:4 * H] * jnp.tanh(c)
            outf_ref[t * B:(t + 1) * B, :] = h[0:B, :]               # aligned stores
            outb_ref[tb * B:(tb + 1) * B, :] = h[B:2 * B, :]

    # ---- layer 1 ----
    bidir_layer(gx1, ws1_ref, l1f_scr, l1b_scr)

    # ---- layer 2 (inter-layer dropout identity in eval mode) ----
    l1f = l1f_scr[...]                                               # (T*B, H)
    l1b = l1b_scr[...]
    gx2 = (jnp.dot(l1f, wih2a_ref[...], preferred_element_type=f32)
           + jnp.dot(l1b, wih2b_ref[...], preferred_element_type=f32)
           + bias2_ref[...])
    bidir_layer(gx2, ws2_ref, l2f_scr, l2b_scr)

    # ---- attention over time: vectorized scores (2 MXU pushes), stable
    #      per-batch softmax over T, weighted context.  All per-t slices are
    #      sublane-aligned (8,*) value slices. ----
    l2f = l2f_scr[...]                                               # (T*B, H)
    l2b = l2b_scr[...]
    sc = (jnp.dot(l2f, wattf_ref[...], preferred_element_type=f32)
          + jnp.dot(l2b, wattb_ref[...], preferred_element_type=f32)
          + batt_ref[...])                                           # (T*B, 1)
    m = sc[0:B, :]
    for t in range(1, T):
        m = jnp.maximum(m, sc[t * B:(t + 1) * B, :])                 # (B, 1)
    e = jnp.exp(sc - jnp.concatenate([m] * T, axis=0))               # single exp
    denom = e[0:B, :]
    for t in range(1, T):
        denom = denom + e[t * B:(t + 1) * B, :]
    inv = pl.reciprocal(denom, approx=True)                          # (B, 1), EUP
    w = e * jnp.concatenate([inv] * T, axis=0)                       # (T*B, 1)
    wf = w * l2f                                                     # (T*B, H)
    wb = w * l2b
    ctx_f = wf[0:B, :]
    ctx_b = wb[0:B, :]
    for t in range(1, T):
        ctx_f = ctx_f + wf[t * B:(t + 1) * B, :]
        ctx_b = ctx_b + wb[t * B:(t + 1) * B, :]

    # ---- MLP head (dropout identity in eval mode) ----
    h1 = jnp.maximum(
        jnp.dot(ctx_f, w1a_ref[...], preferred_element_type=f32)
        + jnp.dot(ctx_b, w1b_ref[...], preferred_element_type=f32)
        + b1_ref[...], 0.0)                                          # (B, H) ReLU
    logits = jnp.dot(h1, w2_ref[...], preferred_element_type=f32) + b2_ref[...]
    out_ref[...] = jax.nn.sigmoid(logits)                            # (B, 1)


# ------------------------------- host wrapper --------------------------------
def pack_params(params):
    """Repack per-layer params into the fused-kernel layout (host-side)."""
    H = HIDDEN
    l1, l2 = params["lstm"]
    wih1 = jnp.concatenate([l1["fwd"][0], l1["bwd"][0]], axis=1)      # (E, 8H)
    # Fold the layer-1 input projection into the embedding table (feedback 2).
    table1 = jnp.dot(params["emb"], wih1, precision=lax.Precision.HIGHEST)  # (V, 8H)
    bias1 = jnp.concatenate([l1["fwd"][2], l1["bwd"][2]], axis=1)     # (1, 8H)
    ws1 = jnp.concatenate([l1["fwd"][1], l1["bwd"][1]], axis=1)       # (H, 8H)
    wih2 = jnp.concatenate([l2["fwd"][0], l2["bwd"][0]], axis=1)      # (2H, 8H)
    bias2 = jnp.concatenate([l2["fwd"][2], l2["bwd"][2]], axis=1)
    ws2 = jnp.concatenate([l2["fwd"][1], l2["bwd"][1]], axis=1)       # (H, 8H)
    return dict(
        table1=table1, bias1=bias1, ws1=ws1,
        wih2a=wih2[:H], wih2b=wih2[H:], bias2=bias2, ws2=ws2,
        wattf=params["watt"][:, :H].T, wattb=params["watt"][:, H:].T,  # (H, 1)
        batt=params["batt"],
        w1a=params["w1"][:H], w1b=params["w1"][H:], b1=params["b1"],
        w2=params["w2"], b2=params["b2"])


def model_forward(x_ids, fp):
    # Pad batch to BP=8 (one sublane group); padded rows are discarded at the end.
    ids_p = jnp.zeros((BP, SEQ), jnp.int32).at[:BATCH, :].set(x_ids.astype(jnp.int32))
    # time-major flattened ids: row index = t*BP + b
    ids_tm = jnp.transpose(ids_p, (1, 0)).reshape(SEQ * BP, 1)
    vmem = pl.BlockSpec(memory_space=pltpu.MemorySpace.VMEM)
    out = pl.pallas_call(
        fused_kernel,
        out_shape=jax.ShapeDtypeStruct((BP, OUT_DIM), jnp.float32),
        in_specs=[vmem] * 16,
        out_specs=vmem,
        scratch_shapes=[pltpu.VMEM((SEQ * BP, HIDDEN), jnp.float32)] * 4,
    )(ids_tm, fp["table1"], fp["bias1"], fp["ws1"],
      fp["wih2a"], fp["wih2b"], fp["bias2"], fp["ws2"],
      fp["wattf"], fp["wattb"], fp["batt"],
      fp["w1a"], fp["w1b"], fp["b1"], fp["w2"], fp["b2"])
    return out[:BATCH]


# ------------------------ pure-JAX reference ---------------------------------
def ref_forward(x_ids, params):
    embedded = jnp.take(params["emb"], x_ids, axis=0)
    h = jnp.transpose(embedded, (1, 0, 2))

    def run_dir(x, wih, whh, b):
        def step(carry, x_t):
            hh, cc = carry
            gates = x_t @ wih + hh @ whh + b
            i = jax.nn.sigmoid(gates[:, :HIDDEN])
            f = jax.nn.sigmoid(gates[:, HIDDEN:2 * HIDDEN])
            g = jnp.tanh(gates[:, 2 * HIDDEN:3 * HIDDEN])
            o = jax.nn.sigmoid(gates[:, 3 * HIDDEN:])
            cc = f * cc + i * g
            hh = o * jnp.tanh(cc)
            return (hh, cc), hh
        B = x.shape[1]
        init = (jnp.zeros((B, HIDDEN), jnp.float32), jnp.zeros((B, HIDDEN), jnp.float32))
        _, ys = lax.scan(step, init, x)
        return ys

    for layer in params["lstm"]:
        fwd = run_dir(h, *layer["fwd"])
        bwd = run_dir(h[::-1], *layer["bwd"])[::-1]
        h = jnp.concatenate([fwd, bwd], axis=-1)
    lo = jnp.transpose(h, (1, 0, 2))
    scores = jnp.sum(lo * params["watt"], axis=-1, keepdims=True) + params["batt"]
    aw = jax.nn.softmax(scores, axis=1)
    context = jnp.sum(aw * lo, axis=1)
    h1 = jnp.maximum(context @ params["w1"] + params["b1"], 0.0)
    return jax.nn.sigmoid(h1 @ params["w2"] + params["b2"])


# ------------------------------ parameters -----------------------------------
def init_params(key):
    k_emb, k_lstm, k_att, k_fc1, k_fc2 = jax.random.split(key, 5)
    emb = jax.random.normal(k_emb, (VOCAB, EMBED), jnp.float32)
    emb = emb.at[1].set(0.0)                              # padding_idx=1

    stdv = 1.0 / np.sqrt(HIDDEN)
    lstm_keys = jax.random.split(k_lstm, NUM_LAYERS * 2 * 4)
    lstm_layers = []
    idx = 0
    in_dim = EMBED
    for _ in range(NUM_LAYERS):
        dirs = {}
        for d in ("fwd", "bwd"):
            wih = jax.random.uniform(lstm_keys[idx], (in_dim, 4 * HIDDEN),
                                     jnp.float32, -stdv, stdv); idx += 1
            whh = jax.random.uniform(lstm_keys[idx], (HIDDEN, 4 * HIDDEN),
                                     jnp.float32, -stdv, stdv); idx += 1
            bih = jax.random.uniform(lstm_keys[idx], (1, 4 * HIDDEN),
                                     jnp.float32, -stdv, stdv); idx += 1
            bhh = jax.random.uniform(lstm_keys[idx], (1, 4 * HIDDEN),
                                     jnp.float32, -stdv, stdv); idx += 1
            dirs[d] = (wih, whh, bih + bhh)
        lstm_layers.append(dirs)
        in_dim = 2 * HIDDEN

    d2 = 2 * HIDDEN
    a_std = 1.0 / np.sqrt(d2)
    k1, k2 = jax.random.split(k_att)
    watt = jax.random.uniform(k1, (1, d2), jnp.float32, -a_std, a_std)
    batt = jax.random.uniform(k2, (1, 1), jnp.float32, -a_std, a_std)
    k1, k2 = jax.random.split(k_fc1)
    w1 = jax.random.uniform(k1, (d2, HIDDEN), jnp.float32, -a_std, a_std)
    b1 = jax.random.uniform(k2, (1, HIDDEN), jnp.float32, -a_std, a_std)
    f_std = 1.0 / np.sqrt(HIDDEN)
    k1, k2 = jax.random.split(k_fc2)
    w2 = jax.random.uniform(k1, (HIDDEN, OUT_DIM), jnp.float32, -f_std, f_std)
    b2 = jax.random.uniform(k2, (1, OUT_DIM), jnp.float32, -f_std, f_std)

    return dict(emb=emb, lstm=lstm_layers, watt=watt, batt=batt,
                w1=w1, b1=b1, w2=w2, b2=b2)


if __name__ == "__main__":
    key = jax.random.PRNGKey(0)
    k_param, k_data = jax.random.split(key)
    params = init_params(k_param)
    fp = pack_params(params)
    x_ids = jax.random.randint(k_data, (BATCH, SEQ), 0, VOCAB, dtype=jnp.int32)

    out = jax.block_until_ready(model_forward(x_ids, fp))
    ref = jax.block_until_ready(ref_forward(x_ids, params))
    np.testing.assert_allclose(np.asarray(out), np.asarray(ref), atol=5e-3, rtol=5e-3)

    assert out.shape == (BATCH, OUT_DIM)
    print("KERNEL_OK")
</pallas_src>

<mosaic_0001>
module attributes {stable_mosaic.version = 11 : i64} {
  func.func @fused_kernel(%arg0: memref<64x1xi32, #tpu.memory_space<vmem>>, %arg1: memref<50x256xf32, #tpu.memory_space<vmem>>, %arg2: memref<1x256xf32, #tpu.memory_space<vmem>>, %arg3: memref<32x256xf32, #tpu.memory_space<vmem>>, %arg4: memref<32x256xf32, #tpu.memory_space<vmem>>, %arg5: memref<32x256xf32, #tpu.memory_space<vmem>>, %arg6: memref<1x256xf32, #tpu.memory_space<vmem>>, %arg7: memref<32x256xf32, #tpu.memory_space<vmem>>, %arg8: memref<32x1xf32, #tpu.memory_space<vmem>>, %arg9: memref<32x1xf32, #tpu.memory_space<vmem>>, %arg10: memref<1x1xf32, #tpu.memory_space<vmem>>, %arg11: memref<32x32xf32, #tpu.memory_space<vmem>>, %arg12: memref<32x32xf32, #tpu.memory_space<vmem>>, %arg13: memref<1x32xf32, #tpu.memory_space<vmem>>, %arg14: memref<32x1xf32, #tpu.memory_space<vmem>>, %arg15: memref<1x1xf32, #tpu.memory_space<vmem>>, %arg16: memref<8x1xf32, #tpu.memory_space<vmem>>, %arg17: memref<64x32xf32, #tpu.memory_space<vmem>>, %arg18: memref<64x32xf32, #tpu.memory_space<vmem>>, %arg19: memref<64x32xf32, #tpu.memory_space<vmem>>, %arg20: memref<64x32xf32, #tpu.memory_space<vmem>>) attributes {dimension_semantics = [], scalar_prefetch = 0 : i64, scratch_operands = 4 : i64, tpu.core_type = #tpu.core_type<tc>} {
    %c0 = arith.constant 0 : index
    %c0_0 = arith.constant 0 : index
    %0 = vector.load %arg0[%c0, %c0_0] : memref<64x1xi32, #tpu.memory_space<vmem>>, vector<64x1xi32>
    %1 = tpu.iota {dimensions = array<i32: 1>} : vector<64x50xi32>
    %2 = vector.broadcast %0 : vector<64x1xi32> to vector<64x50xi32>
    %3 = arith.cmpi eq, %2, %1 : vector<64x50xi32>
    %4 = arith.extui %3 : vector<64x50xi1> to vector<64x50xi32>
    %5 = arith.sitofp %4 : vector<64x50xi32> to vector<64x50xf32>
    %c0_1 = arith.constant 0 : index
    %c0_2 = arith.constant 0 : index
    %6 = vector.load %arg1[%c0_1, %c0_2] : memref<50x256xf32, #tpu.memory_space<vmem>>, vector<50x256xf32>
    %cst = arith.constant dense<0.000000e+00> : vector<64x256xf32>
    %7 = tpu.matmul %5, %6, %cst {dimension_numbers = #tpu.dot_dimension_numbers<[1], [0], [0], [1], [0, 0, 1, 1], [], []>} : vector<64x50xf32>, vector<50x256xf32>, vector<64x256xf32> -> vector<64x256xf32>
    %c0_3 = arith.constant 0 : index
    %c0_4 = arith.constant 0 : index
    %8 = vector.load %arg2[%c0_3, %c0_4] : memref<1x256xf32, #tpu.memory_space<vmem>>, vector<1x256xf32>
    %9 = vector.broadcast %8 : vector<1x256xf32> to vector<64x256xf32>
    %10 = arith.addf %7, %9 : vector<64x256xf32>
    %c0_5 = arith.constant 0 : index
    %c0_6 = arith.constant 0 : index
    %11 = vector.load %arg3[%c0_5, %c0_6] : memref<32x256xf32, #tpu.memory_space<vmem>>, vector<32x256xf32>
    %cst_7 = arith.constant 0.000000e+00 : f32
    %12 = vector.broadcast %cst_7 : f32 to vector<16x32xf32>
    %cst_8 = arith.constant 0.000000e+00 : f32
    %13 = vector.broadcast %cst_8 : f32 to vector<16x32xf32>
    %cst_9 = arith.constant dense<0.000000e+00> : vector<16x256xf32>
    %14 = tpu.matmul %12, %11, %cst_9 {dimension_numbers = #tpu.dot_dimension_numbers<[1], [0], [0], [1], [0, 0, 1, 1], [], []>} : vector<16x32xf32>, vector<32x256xf32>, vector<16x256xf32> -> vector<16x256xf32>
    %15 = vector.extract_strided_slice %14 {offsets = [0, 0], sizes = [8, 128], strides = [1, 1]} : vector<16x256xf32> to vector<8x128xf32>
    %16 = vector.extract_strided_slice %10 {offsets = [0, 0], sizes = [8, 128], strides = [1, 1]} : vector<64x256xf32> to vector<8x128xf32>
    %17 = arith.addf %15, %16 : vector<8x128xf32>
    %18 = vector.extract_strided_slice %14 {offsets = [8, 128], sizes = [8, 128], strides = [1, 1]} : vector<16x256xf32> to vector<8x128xf32>
    %19 = vector.extract_strided_slice %10 {offsets = [56, 128], sizes = [8, 128], strides = [1, 1]} : vector<64x256xf32> to vector<8x128xf32>
    %20 = arith.addf %18, %19 : vector<8x128xf32>
    %21 = tpu.concatenate %17, %20 in 0 : vector<8x128xf32>, vector<8x128xf32> -> vector<16x128xf32>
    %22 = arith.negf %21 : vector<16x128xf32>
    %23 = math.exp %22 : vector<16x128xf32>
    %cst_10 = arith.constant 1.000000e+00 : f32
    %24 = vector.broadcast %cst_10 : f32 to vector<16x128xf32>
    %25 = arith.addf %24, %23 : vector<16x128xf32>
    %26 = arith.divf %24, %25 : vector<16x128xf32>
    %27 = math.tanh %21 : vector<16x128xf32>
    %28 = vector.extract_strided_slice %26 {offsets = [0, 32], sizes = [16, 32], strides = [1, 1]} : vector<16x128xf32> to vector<16x32xf32>
    %29 = arith.mulf %28, %13 : vector<16x32xf32>
    %30 = vector.extract_strided_slice %26 {offsets = [0, 0], sizes = [16, 32], strides = [1, 1]} : vector<16x128xf32> to vector<16x32xf32>
    %31 = vector.extract_strided_slice %27 {offsets = [0, 64], sizes = [16, 32], strides = [1, 1]} : vector<16x128xf32> to vector<16x32xf32>
    %32 = arith.mulf %30, %31 : vector<16x32xf32>
    %33 = arith.addf %29, %32 : vector<16x32xf32>
    %34 = vector.extract_strided_slice %26 {offsets = [0, 96], sizes = [16, 32], strides = [1, 1]} : vector<16x128xf32> to vector<16x32xf32>
    %35 = math.tanh %33 : vector<16x32xf32>
    %36 = arith.mulf %34, %35 : vector<16x32xf32>
    %37 = vector.extract_strided_slice %36 {offsets = [0, 0], sizes = [8, 32], strides = [1, 1]} : vector<16x32xf32> to vector<8x32xf32>
    %c0_11 = arith.constant 0 : index
    %c0_12 = arith.constant 0 : index
    %38 = vector.load %arg17[%c0_11, %c0_12] : memref<64x32xf32, #tpu.memory_space<vmem>>, vector<8x32xf32>
    tpu.vector_store %arg17[%c0_11, %c0_12], %37 {strides = array<i32>} : memref<64x32xf32, #tpu.memory_space<vmem>>, vector<8x32xf32>,
    %39 = vector.extract_strided_slice %36 {offsets = [8, 0], sizes = [8, 32], strides = [1, 1]} : vector<16x32xf32> to vector<8x32xf32>
    %c56 = arith.constant 56 : index
    %c0_13 = arith.constant 0 : index
    %40 = vector.load %arg18[%c56, %c0_13] : memref<64x32xf32, #tpu.memory_space<vmem>>, vector<8x32xf32>
    tpu.vector_store %arg18[%c56, %c0_13], %39 {strides = array<i32>} : memref<64x32xf32, #tpu.memory_space<vmem>>, vector<8x32xf32>,
    %cst_14 = arith.constant dense<0.000000e+00> : vector<16x256xf32>
    %41 = tpu.matmul %36, %11, %cst_14 {dimension_numbers = #tpu.dot_dimension_numbers<[1], [0], [0], [1], [0, 0, 1, 1], [], []>} : vector<16x32xf32>, vector<32x256xf32>, vector<16x256xf32> -> vector<16x256xf32>
    %42 = vector.extract_strided_slice %41 {offsets = [0, 0], sizes = [8, 128], strides = [1, 1]} : vector<16x256xf32> to vector<8x128xf32>
    %43 = vector.extract_strided_slice %10 {offsets = [8, 0], sizes = [8, 128], strides = [1, 1]} : vector<64x256xf32> to vector<8x128xf32>
    %44 = arith.addf %42, %43 : vector<8x128xf32>
    %45 = vector.extract_strided_slice %41 {offsets = [8, 128], sizes = [8, 128], strides = [1, 1]} : vector<16x256xf32> to vector<8x128xf32>
    %46 = vector.extract_strided_slice %10 {offsets = [48, 128], sizes = [8, 128], strides = [1, 1]} : vector<64x256xf32> to vector<8x128xf32>
    %47 = arith.addf %45, %46 : vector<8x128xf32>
    %48 = tpu.concatenate %44, %47 in 0 : vector<8x128xf32>, vector<8x128xf32> -> vector<16x128xf32>
    %49 = arith.negf %48 : vector<16x128xf32>
    %50 = math.exp %49 : vector<16x128xf32>
    %cst_15 = arith.constant 1.000000e+00 : f32
    %51 = vector.broadcast %cst_15 : f32 to vector<16x128xf32>
    %52 = arith.addf %51, %50 : vector<16x128xf32>
    %53 = arith.divf %51, %52 : vector<16x128xf32>
    %54 = math.tanh %48 : vector<16x128xf32>
    %55 = vector.extract_strided_slice %53 {offsets = [0, 32], sizes = [16, 32], strides = [1, 1]} : vector<16x128xf32> to vector<16x32xf32>
    %56 = arith.mulf %55, %33 : vector<16x32xf32>
    %57 = vector.extract_strided_slice %53 {offsets = [0, 0], sizes = [16, 32], strides = [1, 1]} : vector<16x128xf32> to vector<16x32xf32>
    %58 = vector.extract_strided_slice %54 {offsets = [0, 64], sizes = [16, 32], strides = [1, 1]} : vector<16x128xf32> to vector<16x32xf32>
    %59 = arith.mulf %57, %58 : vector<16x32xf32>
    %60 = arith.addf %56, %59 : vector<16x32xf32>
    %61 = vector.extract_strided_slice %53 {offsets = [0, 96], sizes = [16, 32], strides = [1, 1]} : vector<16x128xf32> to vector<16x32xf32>
    %62 = math.tanh %60 : vector<16x32xf32>
    %63 = arith.mulf %61, %62 : vector<16x32xf32>
    %64 = vector.extract_strided_slice %63 {offsets = [0, 0], sizes = [8, 32], strides = [1, 1]} : vector<16x32xf32> to vector<8x32xf32>
    %c8 = arith.constant 8 : index
    %c0_16 = arith.constant 0 : index
    %65 = vector.load %arg17[%c8, %c0_16] : memref<64x32xf32, #tpu.memory_space<vmem>>, vector<8x32xf32>
    tpu.vector_store %arg17[%c8, %c0_16], %64 {strides = array<i32>} : memref<64x32xf32, #tpu.memory_space<vmem>>, vector<8x32xf32>,
    %66 = vector.extract_strided_slice %63 {offsets = [8, 0], sizes = [8, 32], strides = [1, 1]} : vector<16x32xf32> to vector<8x32xf32>
    %c48 = arith.constant 48 : index
    %c0_17 = arith.constant 0 : index
    %67 = vector.load %arg18[%c48, %c0_17] : memref<64x32xf32, #tpu.memory_space<vmem>>, vector<8x32xf32>
    tpu.vector_store %arg18[%c48, %c0_17], %66 {strides = array<i32>} : memref<64x32xf32, #tpu.memory_space<vmem>>, vector<8x32xf32>,
    %cst_18 = arith.constant dense<0.000000e+00> : vector<16x256xf32>
    %68 = tpu.matmul %63, %11, %cst_18 {dimension_numbers = #tpu.dot_dimension_numbers<[1], [0], [0], [1], [0, 0, 1, 1], [], []>} : vector<16x32xf32>, vector<32x256xf32>, vector<16x256xf32> -> vector<16x256xf32>
    %69 = vector.extract_strided_slice %68 {offsets = [0, 0], sizes = [8, 128], strides = [1, 1]} : vector<16x256xf32> to vector<8x128xf32>
    %70 = vector.extract_strided_slice %10 {offsets = [16, 0], sizes = [8, 128], strides = [1, 1]} : vector<64x256xf32> to vector<8x128xf32>
    %71 = arith.addf %69, %70 : vector<8x128xf32>
    %72 = vector.extract_strided_slice %68 {offsets = [8, 128], sizes = [8, 128], strides = [1, 1]} : vector<16x256xf32> to vector<8x128xf32>
    %73 = vector.extract_strided_slice %10 {offsets = [40, 128], sizes = [8, 128], strides = [1, 1]} : vector<64x256xf32> to vector<8x128xf32>
    %74 = arith.addf %72, %73 : vector<8x128xf32>
    %75 = tpu.concatenate %71, %74 in 0 : vector<8x128xf32>, vector<8x128xf32> -> vector<16x128xf32>
    %76 = arith.negf %75 : vector<16x128xf32>
    %77 = math.exp %76 : vector<16x128xf32>
    %cst_19 = arith.constant 1.000000e+00 : f32
    %78 = vector.broadcast %cst_19 : f32 to vector<16x128xf32>
    %79 = arith.addf %78, %77 : vector<16x128xf32>
    %80 = arith.divf %78, %79 : vector<16x128xf32>
    %81 = math.tanh %75 : vector<16x128xf32>
    %82 = vector.extract_strided_slice %80 {offsets = [0, 32], sizes = [16, 32], strides = [1, 1]} : vector<16x128xf32> to vector<16x32xf32>
    %83 = arith.mulf %82, %60 : vector<16x32xf32>
    %84 = vector.extract_strided_slice %80 {offsets = [0, 0], sizes = [16, 32], strides = [1, 1]} : vector<16x128xf32> to vector<16x32xf32>
    %85 = vector.extract_strided_slice %81 {offsets = [0, 64], sizes = [16, 32], strides = [1, 1]} : vector<16x128xf32> to vector<16x32xf32>
    %86 = arith.mulf %84, %85 : vector<16x32xf32>
    %87 = arith.addf %83, %86 : vector<16x32xf32>
    %88 = vector.extract_strided_slice %80 {offsets = [0, 96], sizes = [16, 32], strides = [1, 1]} : vector<16x128xf32> to vector<16x32xf32>
    %89 = math.tanh %87 : vector<16x32xf32>
    %90 = arith.mulf %88, %89 : vector<16x32xf32>
    %91 = vector.extract_strided_slice %90 {offsets = [0, 0], sizes = [8, 32], strides = [1, 1]} : vector<16x32xf32> to vector<8x32xf32>
    %c16 = arith.constant 16 : index
    %c0_20 = arith.constant 0 : index
    %92 = vector.load %arg17[%c16, %c0_20] : memref<64x32xf32, #tpu.memory_space<vmem>>, vector<8x32xf32>
    tpu.vector_store %arg17[%c16, %c0_20], %91 {strides = array<i32>} : memref<64x32xf32, #tpu.memory_space<vmem>>, vector<8x32xf32>,
    %93 = vector.extract_strided_slice %90 {offsets = [8, 0], sizes = [8, 32], strides = [1, 1]} : vector<16x32xf32> to vector<8x32xf32>
    %c40 = arith.constant 40 : index
    %c0_21 = arith.constant 0 : index
    %94 = vector.load %arg18[%c40, %c0_21] : memref<64x32xf32, #tpu.memory_space<vmem>>, vector<8x32xf32>
    tpu.vector_store %arg18[%c40, %c0_21], %93 {strides = array<i32>} : memref<64x32xf32, #tpu.memory_space<vmem>>, vector<8x32xf32>,
    %cst_22 = arith.constant dense<0.000000e+00> : vector<16x256xf32>
    %95 = tpu.matmul %90, %11, %cst_22 {dimension_numbers = #tpu.dot_dimension_numbers<[1], [0], [0], [1], [0, 0, 1, 1], [], []>} : vector<16x32xf32>, vector<32x256xf32>, vector<16x256xf32> -> vector<16x256xf32>
    %96 = vector.extract_strided_slice %95 {offsets = [0, 0], sizes = [8, 128], strides = [1, 1]} : vector<16x256xf32> to vector<8x128xf32>
    %97 = vector.extract_strided_slice %10 {offsets = [24, 0], sizes = [8, 128], strides = [1, 1]} : vector<64x256xf32> to vector<8x128xf32>
    %98 = arith.addf %96, %97 : vector<8x128xf32>
    %99 = vector.extract_strided_slice %95 {offsets = [8, 128], sizes = [8, 128], strides = [1, 1]} : vector<16x256xf32> to vector<8x128xf32>
    %100 = vector.extract_strided_slice %10 {offsets = [32, 128], sizes = [8, 128], strides = [1, 1]} : vector<64x256xf32> to vector<8x128xf32>
    %101 = arith.addf %99, %100 : vector<8x128xf32>
    %102 = tpu.concatenate %98, %101 in 0 : vector<8x128xf32>, vector<8x128xf32> -> vector<16x128xf32>
    %103 = arith.negf %102 : vector<16x128xf32>
    %104 = math.exp %103 : vector<16x128xf32>
    %cst_23 = arith.constant 1.000000e+00 : f32
    %105 = vector.broadcast %cst_23 : f32 to vector<16x128xf32>
    %106 = arith.addf %105, %104 : vector<16x128xf32>
    %107 = arith.divf %105, %106 : vector<16x128xf32>
    %108 = math.tanh %102 : vector<16x128xf32>
    %109 = vector.extract_strided_slice %107 {offsets = [0, 32], sizes = [16, 32], strides = [1, 1]} : vector<16x128xf32> to vector<16x32xf32>
    %110 = arith.mulf %109, %87 : vector<16x32xf32>
    %111 = vector.extract_strided_slice %107 {offsets = [0, 0], sizes = [16, 32], strides = [1, 1]} : vector<16x128xf32> to vector<16x32xf32>
    %112 = vector.extract_strided_slice %108 {offsets = [0, 64], sizes = [16, 32], strides = [1, 1]} : vector<16x128xf32> to vector<16x32xf32>
    %113 = arith.mulf %111, %112 : vector<16x32xf32>
    %114 = arith.addf %110, %113 : vector<16x32xf32>
    %115 = vector.extract_strided_slice %107 {offsets = [0, 96], sizes = [16, 32], strides = [1, 1]} : vector<16x128xf32> to vector<16x32xf32>
    %116 = math.tanh %114 : vector<16x32xf32>
    %117 = arith.mulf %115, %116 : vector<16x32xf32>
    %118 = vector.extract_strided_slice %117 {offsets = [0, 0], sizes = [8, 32], strides = [1, 1]} : vector<16x32xf32> to vector<8x32xf32>
    %c24 = arith.constant 24 : index
    %c0_24 = arith.constant 0 : index
    %119 = vector.load %arg17[%c24, %c0_24] : memref<64x32xf32, #tpu.memory_space<vmem>>, vector<8x32xf32>
    tpu.vector_store %arg17[%c24, %c0_24], %118 {strides = array<i32>} : memref<64x32xf32, #tpu.memory_space<vmem>>, vector<8x32xf32>,
    %120 = vector.extract_strided_slice %117 {offsets = [8, 0], sizes = [8, 32], strides = [1, 1]} : vector<16x32xf32> to vector<8x32xf32>
    %c32 = arith.constant 32 : index
    %c0_25 = arith.constant 0 : index
    %121 = vector.load %arg18[%c32, %c0_25] : memref<64x32xf32, #tpu.memory_space<vmem>>, vector<8x32xf32>
    tpu.vector_store %arg18[%c32, %c0_25], %120 {strides = array<i32>} : memref<64x32xf32, #tpu.memory_space<vmem>>, vector<8x32xf32>,
    %cst_26 = arith.constant dense<0.000000e+00> : vector<16x256xf32>
    %122 = tpu.matmul %117, %11, %cst_26 {dimension_numbers = #tpu.dot_dimension_numbers<[1], [0], [0], [1], [0, 0, 1, 1], [], []>} : vector<16x32xf32>, vector<32x256xf32>, vector<16x256xf32> -> vector<16x256xf32>
    %123 = vector.extract_strided_slice %122 {offsets = [0, 0], sizes = [8, 128], strides = [1, 1]} : vector<16x256xf32> to vector<8x128xf32>
    %124 = vector.extract_strided_slice %10 {offsets = [32, 0], sizes = [8, 128], strides = [1, 1]} : vector<64x256xf32> to vector<8x128xf32>
    %125 = arith.addf %123, %124 : vector<8x128xf32>
    %126 = vector.extract_strided_slice %122 {offsets = [8, 128], sizes = [8, 128], strides = [1, 1]} : vector<16x256xf32> to vector<8x128xf32>
    %127 = vector.extract_strided_slice %10 {offsets = [24, 128], sizes = [8, 128], strides = [1, 1]} : vector<64x256xf32> to vector<8x128xf32>
    %128 = arith.addf %126, %127 : vector<8x128xf32>
    %129 = tpu.concatenate %125, %128 in 0 : vector<8x128xf32>, vector<8x128xf32> -> vector<16x128xf32>
    %130 = arith.negf %129 : vector<16x128xf32>
    %131 = math.exp %130 : vector<16x128xf32>
    %cst_27 = arith.constant 1.000000e+00 : f32
    %132 = vector.broadcast %cst_27 : f32 to vector<16x128xf32>
    %133 = arith.addf %132, %131 : vector<16x128xf32>
    %134 = arith.divf %132, %133 : vector<16x128xf32>
    %135 = math.tanh %129 : vector<16x128xf32>
    %136 = vector.extract_strided_slice %134 {offsets = [0, 32], sizes = [16, 32], strides = [1, 1]} : vector<16x128xf32> to vector<16x32xf32>
    %137 = arith.mulf %136, %114 : vector<16x32xf32>
    %138 = vector.extract_strided_slice %134 {offsets = [0, 0], sizes = [16, 32], strides = [1, 1]} : vector<16x128xf32> to vector<16x32xf32>
    %139 = vector.extract_strided_slice %135 {offsets = [0, 64], sizes = [16, 32], strides = [1, 1]} : vector<16x128xf32> to vector<16x32xf32>
    %140 = arith.mulf %138, %139 : vector<16x32xf32>
    %141 = arith.addf %137, %140 : vector<16x32xf32>
    %142 = vector.extract_strided_slice %134 {offsets = [0, 96], sizes = [16, 32], strides = [1, 1]} : vector<16x128xf32> to vector<16x32xf32>
    %143 = math.tanh %141 : vector<16x32xf32>
    %144 = arith.mulf %142, %143 : vector<16x32xf32>
    %145 = vector.extract_strided_slice %144 {offsets = [0, 0], sizes = [8, 32], strides = [1, 1]} : vector<16x32xf32> to vector<8x32xf32>
    %c32_28 = arith.constant 32 : index
    %c0_29 = arith.constant 0 : index
    %146 = vector.load %arg17[%c32_28, %c0_29] : memref<64x32xf32, #tpu.memory_space<vmem>>, vector<8x32xf32>
    tpu.vector_store %arg17[%c32_28, %c0_29], %145 {strides = array<i32>} : memref<64x32xf32, #tpu.memory_space<vmem>>, vector<8x32xf32>,
    %147 = vector.extract_strided_slice %144 {offsets = [8, 0], sizes = [8, 32], strides = [1, 1]} : vector<16x32xf32> to vector<8x32xf32>
    %c24_30 = arith.constant 24 : index
    %c0_31 = arith.constant 0 : index
    %148 = vector.load %arg18[%c24_30, %c0_31] : memref<64x32xf32, #tpu.memory_space<vmem>>, vector<8x32xf32>
    tpu.vector_store %arg18[%c24_30, %c0_31], %147 {strides = array<i32>} : memref<64x32xf32, #tpu.memory_space<vmem>>, vector<8x32xf32>,
    %cst_32 = arith.constant dense<0.000000e+00> : vector<16x256xf32>
    %149 = tpu.matmul %144, %11, %cst_32 {dimension_numbers = #tpu.dot_dimension_numbers<[1], [0], [0], [1], [0, 0, 1, 1], [], []>} : vector<16x32xf32>, vector<32x256xf32>, vector<16x256xf32> -> vector<16x256xf32>
    %150 = vector.extract_strided_slice %149 {offsets = [0, 0], sizes = [8, 128], strides = [1, 1]} : vector<16x256xf32> to vector<8x128xf32>
    %151 = vector.extract_strided_slice %10 {offsets = [40, 0], sizes = [8, 128], strides = [1, 1]} : vector<64x256xf32> to vector<8x128xf32>
    %152 = arith.addf %150, %151 : vector<8x128xf32>
    %153 = vector.extract_strided_slice %149 {offsets = [8, 128], sizes = [8, 128], strides = [1, 1]} : vector<16x256xf32> to vector<8x128xf32>
    %154 = vector.extract_strided_slice %10 {offsets = [16, 128], sizes = [8, 128], strides = [1, 1]} : vector<64x256xf32> to vector<8x128xf32>
    %155 = arith.addf %153, %154 : vector<8x128xf32>
    %156 = tpu.concatenate %152, %155 in 0 : vector<8x128xf32>, vector<8x128xf32> -> vector<16x128xf32>
    %157 = arith.negf %156 : vector<16x128xf32>
    %158 = math.exp %157 : vector<16x128xf32>
    %cst_33 = arith.constant 1.000000e+00 : f32
    %159 = vector.broadcast %cst_33 : f32 to vector<16x128xf32>
    %160 = arith.addf %159, %158 : vector<16x128xf32>
    %161 = arith.divf %159, %160 : vector<16x128xf32>
    %162 = math.tanh %156 : vector<16x128xf32>
    %163 = vector.extract_strided_slice %161 {offsets = [0, 32], sizes = [16, 32], strides = [1, 1]} : vector<16x128xf32> to vector<16x32xf32>
    %164 = arith.mulf %163, %141 : vector<16x32xf32>
    %165 = vector.extract_strided_slice %161 {offsets = [0, 0], sizes = [16, 32], strides = [1, 1]} : vector<16x128xf32> to vector<16x32xf32>
    %166 = vector.extract_strided_slice %162 {offsets = [0, 64], sizes = [16, 32], strides = [1, 1]} : vector<16x128xf32> to vector<16x32xf32>
    %167 = arith.mulf %165, %166 : vector<16x32xf32>
    %168 = arith.addf %164, %167 : vector<16x32xf32>
    %169 = vector.extract_strided_slice %161 {offsets = [0, 96], sizes = [16, 32], strides = [1, 1]} : vector<16x128xf32> to vector<16x32xf32>
    %170 = math.tanh %168 : vector<16x32xf32>
    %171 = arith.mulf %169, %170 : vector<16x32xf32>
    %172 = vector.extract_strided_slice %171 {offsets = [0, 0], sizes = [8, 32], strides = [1, 1]} : vector<16x32xf32> to vector<8x32xf32>
    %c40_34 = arith.constant 40 : index
    %c0_35 = arith.constant 0 : index
    %173 = vector.load %arg17[%c40_34, %c0_35] : memref<64x32xf32, #tpu.memory_space<vmem>>, vector<8x32xf32>
    tpu.vector_store %arg17[%c40_34, %c0_35], %172 {strides = array<i32>} : memref<64x32xf32, #tpu.memory_space<vmem>>, vector<8x32xf32>,
    %174 = vector.extract_strided_slice %171 {offsets = [8, 0], sizes = [8, 32], strides = [1, 1]} : vector<16x32xf32> to vector<8x32xf32>
    %c16_36 = arith.constant 16 : index
    %c0_37 = arith.constant 0 : index
    %175 = vector.load %arg18[%c16_36, %c0_37] : memref<64x32xf32, #tpu.memory_space<vmem>>, vector<8x32xf32>
    tpu.vector_store %arg18[%c16_36, %c0_37], %174 {strides = array<i32>} : memref<64x32xf32, #tpu.memory_space<vmem>>, vector<8x32xf32>,
    %cst_38 = arith.constant dense<0.000000e+00> : vector<16x256xf32>
    %176 = tpu.matmul %171, %11, %cst_38 {dimension_numbers = #tpu.dot_dimension_numbers<[1], [0], [0], [1], [0, 0, 1, 1], [], []>} : vector<16x32xf32>, vector<32x256xf32>, vector<16x256xf32> -> vector<16x256xf32>
    %177 = vector.extract_strided_slice %176 {offsets = [0, 0], sizes = [8, 128], strides = [1, 1]} : vector<16x256xf32> to vector<8x128xf32>
    %178 = vector.extract_strided_slice %10 {offsets = [48, 0], sizes = [8, 128], strides = [1, 1]} : vector<64x256xf32> to vector<8x128xf32>
    %179 = arith.addf %177, %178 : vector<8x128xf32>
    %180 = vector.extract_strided_slice %176 {offsets = [8, 128], sizes = [8, 128], strides = [1, 1]} : vector<16x256xf32> to vector<8x128xf32>
    %181 = vector.extract_strided_slice %10 {offsets = [8, 128], sizes = [8, 128], strides = [1, 1]} : vector<64x256xf32> to vector<8x128xf32>
    %182 = arith.addf %180, %181 : vector<8x128xf32>
    %183 = tpu.concatenate %179, %182 in 0 : vector<8x128xf32>, vector<8x128xf32> -> vector<16x128xf32>
    %184 = arith.negf %183 : vector<16x128xf32>
    %185 = math.exp %184 : vector<16x128xf32>
    %cst_39 = arith.constant 1.000000e+00 : f32
    %186 = vector.broadcast %cst_39 : f32 to vector<16x128xf32>
    %187 = arith.addf %186, %185 : vector<16x128xf32>
    %188 = arith.divf %186, %187 : vector<16x128xf32>
    %189 = math.tanh %183 : vector<16x128xf32>
    %190 = vector.extract_strided_slice %188 {offsets = [0, 32], sizes = [16, 32], strides = [1, 1]} : vector<16x128xf32> to vector<16x32xf32>
    %191 = arith.mulf %190, %168 : vector<16x32xf32>
    %192 = vector.extract_strided_slice %188 {offsets = [0, 0], sizes = [16, 32], strides = [1, 1]} : vector<16x128xf32> to vector<16x32xf32>
    %193 = vector.extract_strided_slice %189 {offsets = [0, 64], sizes = [16, 32], strides = [1, 1]} : vector<16x128xf32> to vector<16x32xf32>
    %194 = arith.mulf %192, %193 : vector<16x32xf32>
    %195 = arith.addf %191, %194 : vector<16x32xf32>
    %196 = vector.extract_strided_slice %188 {offsets = [0, 96], sizes = [16, 32], strides = [1, 1]} : vector<16x128xf32> to vector<16x32xf32>
    %197 = math.tanh %195 : vector<16x32xf32>
    %198 = arith.mulf %196, %197 : vector<16x32xf32>
    %199 = vector.extract_strided_slice %198 {offsets = [0, 0], sizes = [8, 32], strides = [1, 1]} : vector<16x32xf32> to vector<8x32xf32>
    %c48_40 = arith.constant 48 : index
    %c0_41 = arith.constant 0 : index
    %200 = vector.load %arg17[%c48_40, %c0_41] : memref<64x32xf32, #tpu.memory_space<vmem>>, vector<8x32xf32>
    tpu.vector_store %arg17[%c48_40, %c0_41], %199 {strides = array<i32>} : memref<64x32xf32, #tpu.memory_space<vmem>>, vector<8x32xf32>,
    %201 = vector.extract_strided_slice %198 {offsets = [8, 0], sizes = [8, 32], strides = [1, 1]} : vector<16x32xf32> to vector<8x32xf32>
    %c8_42 = arith.constant 8 : index
    %c0_43 = arith.constant 0 : index
    %202 = vector.load %arg18[%c8_42, %c0_43] : memref<64x32xf32, #tpu.memory_space<vmem>>, vector<8x32xf32>
    tpu.vector_store %arg18[%c8_42, %c0_43], %201 {strides = array<i32>} : memref<64x32xf32, #tpu.memory_space<vmem>>, vector<8x32xf32>,
    %cst_44 = arith.constant dense<0.000000e+00> : vector<16x256xf32>
    %203 = tpu.matmul %198, %11, %cst_44 {dimension_numbers = #tpu.dot_dimension_numbers<[1], [0], [0], [1], [0, 0, 1, 1], [], []>} : vector<16x32xf32>, vector<32x256xf32>, vector<16x256xf32> -> vector<16x256xf32>
    %204 = vector.extract_strided_slice %203 {offsets = [0, 0], sizes = [8, 128], strides = [1, 1]} : vector<16x256xf32> to vector<8x128xf32>
    %205 = vector.extract_strided_slice %10 {offsets = [56, 0], sizes = [8, 128], strides = [1, 1]} : vector<64x256xf32> to vector<8x128xf32>
    %206 = arith.addf %204, %205 : vector<8x128xf32>
    %207 = vector.extract_strided_slice %203 {offsets = [8, 128], sizes = [8, 128], strides = [1, 1]} : vector<16x256xf32> to vector<8x128xf32>
    %208 = vector.extract_strided_slice %10 {offsets = [0, 128], sizes = [8, 128], strides = [1, 1]} : vector<64x256xf32> to vector<8x128xf32>
    %209 = arith.addf %207, %208 : vector<8x128xf32>
    %210 = tpu.concatenate %206, %209 in 0 : vector<8x128xf32>, vector<8x128xf32> -> vector<16x128xf32>
    %211 = arith.negf %210 : vector<16x128xf32>
    %212 = math.exp %211 : vector<16x128xf32>
    %cst_45 = arith.constant 1.000000e+00 : f32
    %213 = vector.broadcast %cst_45 : f32 to vector<16x128xf32>
    %214 = arith.addf %213, %212 : vector<16x128xf32>
    %215 = arith.divf %213, %214 : vector<16x128xf32>
    %216 = math.tanh %210 : vector<16x128xf32>
    %217 = vector.extract_strided_slice %215 {offsets = [0, 32], sizes = [16, 32], strides = [1, 1]} : vector<16x128xf32> to vector<16x32xf32>
    %218 = arith.mulf %217, %195 : vector<16x32xf32>
    %219 = vector.extract_strided_slice %215 {offsets = [0, 0], sizes = [16, 32], strides = [1, 1]} : vector<16x128xf32> to vector<16x32xf32>
    %220 = vector.extract_strided_slice %216 {offsets = [0, 64], sizes = [16, 32], strides = [1, 1]} : vector<16x128xf32> to vector<16x32xf32>
    %221 = arith.mulf %219, %220 : vector<16x32xf32>
    %222 = arith.addf %218, %221 : vector<16x32xf32>
    %223 = vector.extract_strided_slice %215 {offsets = [0, 96], sizes = [16, 32], strides = [1, 1]} : vector<16x128xf32> to vector<16x32xf32>
    %224 = math.tanh %222 : vector<16x32xf32>
    %225 = arith.mulf %223, %224 : vector<16x32xf32>
    %226 = vector.extract_strided_slice %225 {offsets = [0, 0], sizes = [8, 32], strides = [1, 1]} : vector<16x32xf32> to vector<8x32xf32>
    %c56_46 = arith.constant 56 : index
    %c0_47 = arith.constant 0 : index
    %227 = vector.load %arg17[%c56_46, %c0_47] : memref<64x32xf32, #tpu.memory_space<vmem>>, vector<8x32xf32>
    tpu.vector_store %arg17[%c56_46, %c0_47], %226 {strides = array<i32>} : memref<64x32xf32, #tpu.memory_space<vmem>>, vector<8x32xf32>,
    %228 = vector.extract_strided_slice %225 {offsets = [8, 0], sizes = [8, 32], strides = [1, 1]} : vector<16x32xf32> to vector<8x32xf32>
    %c0_48 = arith.constant 0 : index
    %c0_49 = arith.constant 0 : index
    %229 = vector.load %arg18[%c0_48, %c0_49] : memref<64x32xf32, #tpu.memory_space<vmem>>, vector<8x32xf32>
    tpu.vector_store %arg18[%c0_48, %c0_49], %228 {strides = array<i32>} : memref<64x32xf32, #tpu.memory_space<vmem>>, vector<8x32xf32>,
    %c0_50 = arith.constant 0 : index
    %c0_51 = arith.constant 0 : index
    %230 = vector.load %arg17[%c0_50, %c0_51] : memref<64x32xf32, #tpu.memory_space<vmem>>, vector<64x32xf32>
    %c0_52 = arith.constant 0 : index
    %c0_53 = arith.constant 0 : index
    %231 = vector.load %arg18[%c0_52, %c0_53] : memref<64x32xf32, #tpu.memory_space<vmem>>, vector<64x32xf32>
    %c0_54 = arith.constant 0 : index
    %c0_55 = arith.constant 0 : index
    %232 = vector.load %arg4[%c0_54, %c0_55] : memref<32x256xf32, #tpu.memory_space<vmem>>, vector<32x256xf32>
    %cst_56 = arith.constant dense<0.000000e+00> : vector<64x256xf32>
    %233 = tpu.matmul %230, %232, %cst_56 {dimension_numbers = #tpu.dot_dimension_numbers<[1], [0], [0], [1], [0, 0, 1, 1], [], []>} : vector<64x32xf32>, vector<32x256xf32>, vector<64x256xf32> -> vector<64x256xf32>
    %c0_57 = arith.constant 0 : index
    %c0_58 = arith.constant 0 : index
    %234 = vector.load %arg5[%c0_57, %c0_58] : memref<32x256xf32, #tpu.memory_space<vmem>>, vector<32x256xf32>
    %cst_59 = arith.constant dense<0.000000e+00> : vector<64x256xf32>
    %235 = tpu.matmul %231, %234, %cst_59 {dimension_numbers = #tpu.dot_dimension_numbers<[1], [0], [0], [1], [0, 0, 1, 1], [], []>} : vector<64x32xf32>, vector<32x256xf32>, vector<64x256xf32> -> vector<64x256xf32>
    %236 = arith.addf %233, %235 : vector<64x256xf32>
    %c0_60 = arith.constant 0 : index
    %c0_61 = arith.constant 0 : index
    %237 = vector.load %arg6[%c0_60, %c0_61] : memref<1x256xf32, #tpu.memory_space<vmem>>, vector<1x256xf32>
    %238 = vector.broadcast %237 : vector<1x256xf32> to vector<64x256xf32>
    %239 = arith.addf %236, %238 : vector<64x256xf32>
    %c0_62 = arith.constant 0 : index
    %c0_63 = arith.constant 0 : index
    %240 = vector.load %arg7[%c0_62, %c0_63] : memref<32x256xf32, #tpu.memory_space<vmem>>, vector<32x256xf32>
    %cst_64 = arith.constant 0.000000e+00 : f32
    %241 = vector.broadcast %cst_64 : f32 to vector<16x32xf32>
    %cst_65 = arith.constant 0.000000e+00 : f32
    %242 = vector.broadcast %cst_65 : f32 to vector<16x32xf32>
    %cst_66 = arith.constant dense<0.000000e+00> : vector<16x256xf32>
    %243 = tpu.matmul %241, %240, %cst_66 {dimension_numbers = #tpu.dot_dimension_numbers<[1], [0], [0], [1], [0, 0, 1, 1], [], []>} : vector<16x32xf32>, vector<32x256xf32>, vector<16x256xf32> -> vector<16x256xf32>
    %244 = vector.extract_strided_slice %243 {offsets = [0, 0], sizes = [8, 128], strides = [1, 1]} : vector<16x256xf32> to vector<8x128xf32>
    %245 = vector.extract_strided_slice %239 {offsets = [0, 0], sizes = [8, 128], strides = [1, 1]} : vector<64x256xf32> to vector<8x128xf32>
    %246 = arith.addf %244, %245 : vector<8x128xf32>
    %247 = vector.extract_strided_slice %243 {offsets = [8, 128], sizes = [8, 128], strides = [1, 1]} : vector<16x256xf32> to vector<8x128xf32>
    %248 = vector.extract_strided_slice %239 {offsets = [56, 128], sizes = [8, 128], strides = [1, 1]} : vector<64x256xf32> to vector<8x128xf32>
    %249 = arith.addf %247, %248 : vector<8x128xf32>
    %250 = tpu.concatenate %246, %249 in 0 : vector<8x128xf32>, vector<8x128xf32> -> vector<16x128xf32>
    %251 = arith.negf %250 : vector<16x128xf32>
    %252 = math.exp %251 : vector<16x128xf32>
    %cst_67 = arith.constant 1.000000e+00 : f32
    %253 = vector.broadcast %cst_67 : f32 to vector<16x128xf32>
    %254 = arith.addf %253, %252 : vector<16x128xf32>
    %255 = arith.divf %253, %254 : vector<16x128xf32>
    %256 = math.tanh %250 : vector<16x128xf32>
    %257 = vector.extract_strided_slice %255 {offsets = [0, 32], sizes = [16, 32], strides = [1, 1]} : vector<16x128xf32> to vector<16x32xf32>
    %258 = arith.mulf %257, %242 : vector<16x32xf32>
    %259 = vector.extract_strided_slice %255 {offsets = [0, 0], sizes = [16, 32], strides = [1, 1]} : vector<16x128xf32> to vector<16x32xf32>
    %260 = vector.extract_strided_slice %256 {offsets = [0, 64], sizes = [16, 32], strides = [1, 1]} : vector<16x128xf32> to vector<16x32xf32>
    %261 = arith.mulf %259, %260 : vector<16x32xf32>
    %262 = arith.addf %258, %261 : vector<16x32xf32>
    %263 = vector.extract_strided_slice %255 {offsets = [0, 96], sizes = [16, 32], strides = [1, 1]} : vector<16x128xf32> to vector<16x32xf32>
    %264 = math.tanh %262 : vector<16x32xf32>
    %265 = arith.mulf %263, %264 : vector<16x32xf32>
    %266 = vector.extract_strided_slice %265 {offsets = [0, 0], sizes = [8, 32], strides = [1, 1]} : vector<16x32xf32> to vector<8x32xf32>
    %c0_68 = arith.constant 0 : index
    %c0_69 = arith.constant 0 : index
    %267 = vector.load %arg19[%c0_68, %c0_69] : memref<64x32xf32, #tpu.memory_space<vmem>>, vector<8x32xf32>
    tpu.vector_store %arg19[%c0_68, %c0_69], %266 {strides = array<i32>} : memref<64x32xf32, #tpu.memory_space<vmem>>, vector<8x32xf32>,
    %268 = vector.extract_strided_slice %265 {offsets = [8, 0], sizes = [8, 32], strides = [1, 1]} : vector<16x32xf32> to vector<8x32xf32>
    %c56_70 = arith.constant 56 : index
    %c0_71 = arith.constant 0 : index
    %269 = vector.load %arg20[%c56_70, %c0_71] : memref<64x32xf32, #tpu.memory_space<vmem>>, vector<8x32xf32>
    tpu.vector_store %arg20[%c56_70, %c0_71], %268 {strides = array<i32>} : memref<64x32xf32, #tpu.memory_space<vmem>>, vector<8x32xf32>,
    %cst_72 = arith.constant dense<0.000000e+00> : vector<16x256xf32>
    %270 = tpu.matmul %265, %240, %cst_72 {dimension_numbers = #tpu.dot_dimension_numbers<[1], [0], [0], [1], [0, 0, 1, 1], [], []>} : vector<16x32xf32>, vector<32x256xf32>, vector<16x256xf32> -> vector<16x256xf32>
    %271 = vector.extract_strided_slice %270 {offsets = [0, 0], sizes = [8, 128], strides = [1, 1]} : vector<16x256xf32> to vector<8x128xf32>
    %272 = vector.extract_strided_slice %239 {offsets = [8, 0], sizes = [8, 128], strides = [1, 1]} : vector<64x256xf32> to vector<8x128xf32>
    %273 = arith.addf %271, %272 : vector<8x128xf32>
    %274 = vector.extract_strided_slice %270 {offsets = [8, 128], sizes = [8, 128], strides = [1, 1]} : vector<16x256xf32> to vector<8x128xf32>
    %275 = vector.extract_strided_slice %239 {offsets = [48, 128], sizes = [8, 128], strides = [1, 1]} : vector<64x256xf32> to vector<8x128xf32>
    %276 = arith.addf %274, %275 : vector<8x128xf32>
    %277 = tpu.concatenate %273, %276 in 0 : vector<8x128xf32>, vector<8x128xf32> -> vector<16x128xf32>
    %278 = arith.negf %277 : vector<16x128xf32>
    %279 = math.exp %278 : vector<16x128xf32>
    %cst_73 = arith.constant 1.000000e+00 : f32
    %280 = vector.broadcast %cst_73 : f32 to vector<16x128xf32>
    %281 = arith.addf %280, %279 : vector<16x128xf32>
    %282 = arith.divf %280, %281 : vector<16x128xf32>
    %283 = math.tanh %277 : vector<16x128xf32>
    %284 = vector.extract_strided_slice %282 {offsets = [0, 32], sizes = [16, 32], strides = [1, 1]} : vector<16x128xf32> to vector<16x32xf32>
    %285 = arith.mulf %284, %262 : vector<16x32xf32>
    %286 = vector.extract_strided_slice %282 {offsets = [0, 0], sizes = [16, 32], strides = [1, 1]} : vector<16x128xf32> to vector<16x32xf32>
    %287 = vector.extract_strided_slice %283 {offsets = [0, 64], sizes = [16, 32], strides = [1, 1]} : vector<16x128xf32> to vector<16x32xf32>
    %288 = arith.mulf %286, %287 : vector<16x32xf32>
    %289 = arith.addf %285, %288 : vector<16x32xf32>
    %290 = vector.extract_strided_slice %282 {offsets = [0, 96], sizes = [16, 32], strides = [1, 1]} : vector<16x128xf32> to vector<16x32xf32>
    %291 = math.tanh %289 : vector<16x32xf32>
    %292 = arith.mulf %290, %291 : vector<16x32xf32>
    %293 = vector.extract_strided_slice %292 {offsets = [0, 0], sizes = [8, 32], strides = [1, 1]} : vector<16x32xf32> to vector<8x32xf32>
    %c8_74 = arith.constant 8 : index
    %c0_75 = arith.constant 0 : index
    %294 = vector.load %arg19[%c8_74, %c0_75] : memref<64x32xf32, #tpu.memory_space<vmem>>, vector<8x32xf32>
    tpu.vector_store %arg19[%c8_74, %c0_75], %293 {strides = array<i32>} : memref<64x32xf32, #tpu.memory_space<vmem>>, vector<8x32xf32>,
    %295 = vector.extract_strided_slice %292 {offsets = [8, 0], sizes = [8, 32], strides = [1, 1]} : vector<16x32xf32> to vector<8x32xf32>
    %c48_76 = arith.constant 48 : index
    %c0_77 = arith.constant 0 : index
    %296 = vector.load %arg20[%c48_76, %c0_77] : memref<64x32xf32, #tpu.memory_space<vmem>>, vector<8x32xf32>
    tpu.vector_store %arg20[%c48_76, %c0_77], %295 {strides = array<i32>} : memref<64x32xf32, #tpu.memory_space<vmem>>, vector<8x32xf32>,
    %cst_78 = arith.constant dense<0.000000e+00> : vector<16x256xf32>
    %297 = tpu.matmul %292, %240, %cst_78 {dimension_numbers = #tpu.dot_dimension_numbers<[1], [0], [0], [1], [0, 0, 1, 1], [], []>} : vector<16x32xf32>, vector<32x256xf32>, vector<16x256xf32> -> vector<16x256xf32>
    %298 = vector.extract_strided_slice %297 {offsets = [0, 0], sizes = [8, 128], strides = [1, 1]} : vector<16x256xf32> to vector<8x128xf32>
    %299 = vector.extract_strided_slice %239 {offsets = [16, 0], sizes = [8, 128], strides = [1, 1]} : vector<64x256xf32> to vector<8x128xf32>
    %300 = arith.addf %298, %299 : vector<8x128xf32>
    %301 = vector.extract_strided_slice %297 {offsets = [8, 128], sizes = [8, 128], strides = [1, 1]} : vector<16x256xf32> to vector<8x128xf32>
    %302 = vector.extract_strided_slice %239 {offsets = [40, 128], sizes = [8, 128], strides = [1, 1]} : vector<64x256xf32> to vector<8x128xf32>
    %303 = arith.addf %301, %302 : vector<8x128xf32>
    %304 = tpu.concatenate %300, %303 in 0 : vector<8x128xf32>, vector<8x128xf32> -> vector<16x128xf32>
    %305 = arith.negf %304 : vector<16x128xf32>
    %306 = math.exp %305 : vector<16x128xf32>
    %cst_79 = arith.constant 1.000000e+00 : f32
    %307 = vector.broadcast %cst_79 : f32 to vector<16x128xf32>
    %308 = arith.addf %307, %306 : vector<16x128xf32>
    %309 = arith.divf %307, %308 : vector<16x128xf32>
    %310 = math.tanh %304 : vector<16x128xf32>
    %311 = vector.extract_strided_slice %309 {offsets = [0, 32], sizes = [16, 32], strides = [1, 1]} : vector<16x128xf32> to vector<16x32xf32>
    %312 = arith.mulf %311, %289 : vector<16x32xf32>
    %313 = vector.extract_strided_slice %309 {offsets = [0, 0], sizes = [16, 32], strides = [1, 1]} : vector<16x128xf32> to vector<16x32xf32>
    %314 = vector.extract_strided_slice %310 {offsets = [0, 64], sizes = [16, 32], strides = [1, 1]} : vector<16x128xf32> to vector<16x32xf32>
    %315 = arith.mulf %313, %314 : vector<16x32xf32>
    %316 = arith.addf %312, %315 : vector<16x32xf32>
    %317 = vector.extract_strided_slice %309 {offsets = [0, 96], sizes = [16, 32], strides = [1, 1]} : vector<16x128xf32> to vector<16x32xf32>
    %318 = math.tanh %316 : vector<16x32xf32>
    %319 = arith.mulf %317, %318 : vector<16x32xf32>
    %320 = vector.extract_strided_slice %319 {offsets = [0, 0], sizes = [8, 32], strides = [1, 1]} : vector<16x32xf32> to vector<8x32xf32>
    %c16_80 = arith.constant 16 : index
    %c0_81 = arith.constant 0 : index
    %321 = vector.load %arg19[%c16_80, %c0_81] : memref<64x32xf32, #tpu.memory_space<vmem>>, vector<8x32xf32>
    tpu.vector_store %arg19[%c16_80, %c0_81], %320 {strides = array<i32>} : memref<64x32xf32, #tpu.memory_space<vmem>>, vector<8x32xf32>,
    %322 = vector.extract_strided_slice %319 {offsets = [8, 0], sizes = [8, 32], strides = [1, 1]} : vector<16x32xf32> to vector<8x32xf32>
    %c40_82 = arith.constant 40 : index
    %c0_83 = arith.constant 0 : index
    %323 = vector.load %arg20[%c40_82, %c0_83] : memref<64x32xf32, #tpu.memory_space<vmem>>, vector<8x32xf32>
    tpu.vector_store %arg20[%c40_82, %c0_83], %322 {strides = array<i32>} : memref<64x32xf32, #tpu.memory_space<vmem>>, vector<8x32xf32>,
    %cst_84 = arith.constant dense<0.000000e+00> : vector<16x256xf32>
    %324 = tpu.matmul %319, %240, %cst_84 {dimension_numbers = #tpu.dot_dimension_numbers<[1], [0], [0], [1], [0, 0, 1, 1], [], []>} : vector<16x32xf32>, vector<32x256xf32>, vector<16x256xf32> -> vector<16x256xf32>
    %325 = vector.extract_strided_slice %324 {offsets = [0, 0], sizes = [8, 128], strides = [1, 1]} : vector<16x256xf32> to vector<8x128xf32>
    %326 = vector.extract_strided_slice %239 {offsets = [24, 0], sizes = [8, 128], strides = [1, 1]} : vector<64x256xf32> to vector<8x128xf32>
    %327 = arith.addf %325, %326 : vector<8x128xf32>
    %328 = vector.extract_strided_slice %324 {offsets = [8, 128], sizes = [8, 128], strides = [1, 1]} : vector<16x256xf32> to vector<8x128xf32>
    %329 = vector.extract_strided_slice %239 {offsets = [32, 128], sizes = [8, 128], strides = [1, 1]} : vector<64x256xf32> to vector<8x128xf32>
    %330 = arith.addf %328, %329 : vector<8x128xf32>
    %331 = tpu.concatenate %327, %330 in 0 : vector<8x128xf32>, vector<8x128xf32> -> vector<16x128xf32>
    %332 = arith.negf %331 : vector<16x128xf32>
    %333 = math.exp %332 : vector<16x128xf32>
    %cst_85 = arith.constant 1.000000e+00 : f32
    %334 = vector.broadcast %cst_85 : f32 to vector<16x128xf32>
    %335 = arith.addf %334, %333 : vector<16x128xf32>
    %336 = arith.divf %334, %335 : vector<16x128xf32>
    %337 = math.tanh %331 : vector<16x128xf32>
    %338 = vector.extract_strided_slice %336 {offsets = [0, 32], sizes = [16, 32], strides = [1, 1]} : vector<16x128xf32> to vector<16x32xf32>
    %339 = arith.mulf %338, %316 : vector<16x32xf32>
    %340 = vector.extract_strided_slice %336 {offsets = [0, 0], sizes = [16, 32], strides = [1, 1]} : vector<16x128xf32> to vector<16x32xf32>
    %341 = vector.extract_strided_slice %337 {offsets = [0, 64], sizes = [16, 32], strides = [1, 1]} : vector<16x128xf32> to vector<16x32xf32>
    %342 = arith.mulf %340, %341 : vector<16x32xf32>
    %343 = arith.addf %339, %342 : vector<16x32xf32>
    %344 = vector.extract_strided_slice %336 {offsets = [0, 96], sizes = [16, 32], strides = [1, 1]} : vector<16x128xf32> to vector<16x32xf32>
    %345 = math.tanh %343 : vector<16x32xf32>
    %346 = arith.mulf %344, %345 : vector<16x32xf32>
    %347 = vector.extract_strided_slice %346 {offsets = [0, 0], sizes = [8, 32], strides = [1, 1]} : vector<16x32xf32> to vector<8x32xf32>
    %c24_86 = arith.constant 24 : index
    %c0_87 = arith.constant 0 : index
    %348 = vector.load %arg19[%c24_86, %c0_87] : memref<64x32xf32, #tpu.memory_space<vmem>>, vector<8x32xf32>
    tpu.vector_store %arg19[%c24_86, %c0_87], %347 {strides = array<i32>} : memref<64x32xf32, #tpu.memory_space<vmem>>, vector<8x32xf32>,
    %349 = vector.extract_strided_slice %346 {offsets = [8, 0], sizes = [8, 32], strides = [1, 1]} : vector<16x32xf32> to vector<8x32xf32>
    %c32_88 = arith.constant 32 : index
    %c0_89 = arith.constant 0 : index
    %350 = vector.load %arg20[%c32_88, %c0_89] : memref<64x32xf32, #tpu.memory_space<vmem>>, vector<8x32xf32>
    tpu.vector_store %arg20[%c32_88, %c0_89], %349 {strides = array<i32>} : memref<64x32xf32, #tpu.memory_space<vmem>>, vector<8x32xf32>,
    %cst_90 = arith.constant dense<0.000000e+00> : vector<16x256xf32>
    %351 = tpu.matmul %346, %240, %cst_90 {dimension_numbers = #tpu.dot_dimension_numbers<[1], [0], [0], [1], [0, 0, 1, 1], [], []>} : vector<16x32xf32>, vector<32x256xf32>, vector<16x256xf32> -> vector<16x256xf32>
    %352 = vector.extract_strided_slice %351 {offsets = [0, 0], sizes = [8, 128], strides = [1, 1]} : vector<16x256xf32> to vector<8x128xf32>
    %353 = vector.extract_strided_slice %239 {offsets = [32, 0], sizes = [8, 128], strides = [1, 1]} : vector<64x256xf32> to vector<8x128xf32>
    %354 = arith.addf %352, %353 : vector<8x128xf32>
    %355 = vector.extract_strided_slice %351 {offsets = [8, 128], sizes = [8, 128], strides = [1, 1]} : vector<16x256xf32> to vector<8x128xf32>
    %356 = vector.extract_strided_slice %239 {offsets = [24, 128], sizes = [8, 128], strides = [1, 1]} : vector<64x256xf32> to vector<8x128xf32>
    %357 = arith.addf %355, %356 : vector<8x128xf32>
    %358 = tpu.concatenate %354, %357 in 0 : vector<8x128xf32>, vector<8x128xf32> -> vector<16x128xf32>
    %359 = arith.negf %358 : vector<16x128xf32>
    %360 = math.exp %359 : vector<16x128xf32>
    %cst_91 = arith.constant 1.000000e+00 : f32
    %361 = vector.broadcast %cst_91 : f32 to vector<16x128xf32>
    %362 = arith.addf %361, %360 : vector<16x128xf32>
    %363 = arith.divf %361, %362 : vector<16x128xf32>
    %364 = math.tanh %358 : vector<16x128xf32>
    %365 = vector.extract_strided_slice %363 {offsets = [0, 32], sizes = [16, 32], strides = [1, 1]} : vector<16x128xf32> to vector<16x32xf32>
    %366 = arith.mulf %365, %343 : vector<16x32xf32>
    %367 = vector.extract_strided_slice %363 {offsets = [0, 0], sizes = [16, 32], strides = [1, 1]} : vector<16x128xf32> to vector<16x32xf32>
    %368 = vector.extract_strided_slice %364 {offsets = [0, 64], sizes = [16, 32], strides = [1, 1]} : vector<16x128xf32> to vector<16x32xf32>
    %369 = arith.mulf %367, %368 : vector<16x32xf32>
    %370 = arith.addf %366, %369 : vector<16x32xf32>
    %371 = vector.extract_strided_slice %363 {offsets = [0, 96], sizes = [16, 32], strides = [1, 1]} : vector<16x128xf32> to vector<16x32xf32>
    %372 = math.tanh %370 : vector<16x32xf32>
    %373 = arith.mulf %371, %372 : vector<16x32xf32>
    %374 = vector.extract_strided_slice %373 {offsets = [0, 0], sizes = [8, 32], strides = [1, 1]} : vector<16x32xf32> to vector<8x32xf32>
    %c32_92 = arith.constant 32 : index
    %c0_93 = arith.constant 0 : index
    %375 = vector.load %arg19[%c32_92, %c0_93] : memref<64x32xf32, #tpu.memory_space<vmem>>, vector<8x32xf32>
    tpu.vector_store %arg19[%c32_92, %c0_93], %374 {strides = array<i32>} : memref<64x32xf32, #tpu.memory_space<vmem>>, vector<8x32xf32>,
    %376 = vector.extract_strided_slice %373 {offsets = [8, 0], sizes = [8, 32], strides = [1, 1]} : vector<16x32xf32> to vector<8x32xf32>
    %c24_94 = arith.constant 24 : index
    %c0_95 = arith.constant 0 : index
    %377 = vector.load %arg20[%c24_94, %c0_95] : memref<64x32xf32, #tpu.memory_space<vmem>>, vector<8x32xf32>
    tpu.vector_store %arg20[%c24_94, %c0_95], %376 {strides = array<i32>} : memref<64x32xf32, #tpu.memory_space<vmem>>, vector<8x32xf32>,
    %cst_96 = arith.constant dense<0.000000e+00> : vector<16x256xf32>
    %378 = tpu.matmul %373, %240, %cst_96 {dimension_numbers = #tpu.dot_dimension_numbers<[1], [0], [0], [1], [0, 0, 1, 1], [], []>} : vector<16x32xf32>, vector<32x256xf32>, vector<16x256xf32> -> vector<16x256xf32>
    %379 = vector.extract_strided_slice %378 {offsets = [0, 0], sizes = [8, 128], strides = [1, 1]} : vector<16x256xf32> to vector<8x128xf32>
    %380 = vector.extract_strided_slice %239 {offsets = [40, 0], sizes = [8, 128], strides = [1, 1]} : vector<64x256xf32> to vector<8x128xf32>
    %381 = arith.addf %379, %380 : vector<8x128xf32>
    %382 = vector.extract_strided_slice %378 {offsets = [8, 128], sizes = [8, 128], strides = [1, 1]} : vector<16x256xf32> to vector<8x128xf32>
    %383 = vector.extract_strided_slice %239 {offsets = [16, 128], sizes = [8, 128], strides = [1, 1]} : vector<64x256xf32> to vector<8x128xf32>
    %384 = arith.addf %382, %383 : vector<8x128xf32>
    %385 = tpu.concatenate %381, %384 in 0 : vector<8x128xf32>, vector<8x128xf32> -> vector<16x128xf32>
    %386 = arith.negf %385 : vector<16x128xf32>
    %387 = math.exp %386 : vector<16x128xf32>
    %cst_97 = arith.constant 1.000000e+00 : f32
    %388 = vector.broadcast %cst_97 : f32 to vector<16x128xf32>
    %389 = arith.addf %388, %387 : vector<16x128xf32>
    %390 = arith.divf %388, %389 : vector<16x128xf32>
    %391 = math.tanh %385 : vector<16x128xf32>
    %392 = vector.extract_strided_slice %390 {offsets = [0, 32], sizes = [16, 32], strides = [1, 1]} : vector<16x128xf32> to vector<16x32xf32>
    %393 = arith.mulf %392, %370 : vector<16x32xf32>
    %394 = vector.extract_strided_slice %390 {offsets = [0, 0], sizes = [16, 32], strides = [1, 1]} : vector<16x128xf32> to vector<16x32xf32>
    %395 = vector.extract_strided_slice %391 {offsets = [0, 64], sizes = [16, 32], strides = [1, 1]} : vector<16x128xf32> to vector<16x32xf32>
    %396 = arith.mulf %394, %395 : vector<16x32xf32>
    %397 = arith.addf %393, %396 : vector<16x32xf32>
    %398 = vector.extract_strided_slice %390 {offsets = [0, 96], sizes = [16, 32], strides = [1, 1]} : vector<16x128xf32> to vector<16x32xf32>
    %399 = math.tanh %397 : vector<16x32xf32>
    %400 = arith.mulf %398, %399 : vector<16x32xf32>
    %401 = vector.extract_strided_slice %400 {offsets = [0, 0], sizes = [8, 32], strides = [1, 1]} : vector<16x32xf32> to vector<8x32xf32>
    %c40_98 = arith.constant 40 : index
    %c0_99 = arith.constant 0 : index
    %402 = vector.load %arg19[%c40_98, %c0_99] : memref<64x32xf32, #tpu.memory_space<vmem>>, vector<8x32xf32>
    tpu.vector_store %arg19[%c40_98, %c0_99], %401 {strides = array<i32>} : memref<64x32xf32, #tpu.memory_space<vmem>>, vector<8x32xf32>,
    %403 = vector.extract_strided_slice %400 {offsets = [8, 0], sizes = [8, 32], strides = [1, 1]} : vector<16x32xf32> to vector<8x32xf32>
    %c16_100 = arith.constant 16 : index
    %c0_101 = arith.constant 0 : index
    %404 = vector.load %arg20[%c16_100, %c0_101] : memref<64x32xf32, #tpu.memory_space<vmem>>, vector<8x32xf32>
    tpu.vector_store %arg20[%c16_100, %c0_101], %403 {strides = array<i32>} : memref<64x32xf32, #tpu.memory_space<vmem>>, vector<8x32xf32>,
    %cst_102 = arith.constant dense<0.000000e+00> : vector<16x256xf32>
    %405 = tpu.matmul %400, %240, %cst_102 {dimension_numbers = #tpu.dot_dimension_numbers<[1], [0], [0], [1], [0, 0, 1, 1], [], []>} : vector<16x32xf32>, vector<32x256xf32>, vector<16x256xf32> -> vector<16x256xf32>
    %406 = vector.extract_strided_slice %405 {offsets = [0, 0], sizes = [8, 128], strides = [1, 1]} : vector<16x256xf32> to vector<8x128xf32>
    %407 = vector.extract_strided_slice %239 {offsets = [48, 0], sizes = [8, 128], strides = [1, 1]} : vector<64x256xf32> to vector<8x128xf32>
    %408 = arith.addf %406, %407 : vector<8x128xf32>
    %409 = vector.extract_strided_slice %405 {offsets = [8, 128], sizes = [8, 128], strides = [1, 1]} : vector<16x256xf32> to vector<8x128xf32>
    %410 = vector.extract_strided_slice %239 {offsets = [8, 128], sizes = [8, 128], strides = [1, 1]} : vector<64x256xf32> to vector<8x128xf32>
    %411 = arith.addf %409, %410 : vector<8x128xf32>
    %412 = tpu.concatenate %408, %411 in 0 : vector<8x128xf32>, vector<8x128xf32> -> vector<16x128xf32>
    %413 = arith.negf %412 : vector<16x128xf32>
    %414 = math.exp %413 : vector<16x128xf32>
    %cst_103 = arith.constant 1.000000e+00 : f32
    %415 = vector.broadcast %cst_103 : f32 to vector<16x128xf32>
    %416 = arith.addf %415, %414 : vector<16x128xf32>
    %417 = arith.divf %415, %416 : vector<16x128xf32>
    %418 = math.tanh %412 : vector<16x128xf32>
    %419 = vector.extract_strided_slice %417 {offsets = [0, 32], sizes = [16, 32], strides = [1, 1]} : vector<16x128xf32> to vector<16x32xf32>
    %420 = arith.mulf %419, %397 : vector<16x32xf32>
    %421 = vector.extract_strided_slice %417 {offsets = [0, 0], sizes = [16, 32], strides = [1, 1]} : vector<16x128xf32> to vector<16x32xf32>
    %422 = vector.extract_strided_slice %418 {offsets = [0, 64], sizes = [16, 32], strides = [1, 1]} : vector<16x128xf32> to vector<16x32xf32>
    %423 = arith.mulf %421, %422 : vector<16x32xf32>
    %424 = arith.addf %420, %423 : vector<16x32xf32>
    %425 = vector.extract_strided_slice %417 {offsets = [0, 96], sizes = [16, 32], strides = [1, 1]} : vector<16x128xf32> to vector<16x32xf32>
    %426 = math.tanh %424 : vector<16x32xf32>
    %427 = arith.mulf %425, %426 : vector<16x32xf32>
    %428 = vector.extract_strided_slice %427 {offsets = [0, 0], sizes = [8, 32], strides = [1, 1]} : vector<16x32xf32> to vector<8x32xf32>
    %c48_104 = arith.constant 48 : index
    %c0_105 = arith.constant 0 : index
    %429 = vector.load %arg19[%c48_104, %c0_105] : memref<64x32xf32, #tpu.memory_space<vmem>>, vector<8x32xf32>
    tpu.vector_store %arg19[%c48_104, %c0_105], %428 {strides = array<i32>} : memref<64x32xf32, #tpu.memory_space<vmem>>, vector<8x32xf32>,
    %430 = vector.extract_strided_slice %427 {offsets = [8, 0], sizes = [8, 32], strides = [1, 1]} : vector<16x32xf32> to vector<8x32xf32>
    %c8_106 = arith.constant 8 : index
    %c0_107 = arith.constant 0 : index
    %431 = vector.load %arg20[%c8_106, %c0_107] : memref<64x32xf32, #tpu.memory_space<vmem>>, vector<8x32xf32>
    tpu.vector_store %arg20[%c8_106, %c0_107], %430 {strides = array<i32>} : memref<64x32xf32, #tpu.memory_space<vmem>>, vector<8x32xf32>,
    %cst_108 = arith.constant dense<0.000000e+00> : vector<16x256xf32>
    %432 = tpu.matmul %427, %240, %cst_108 {dimension_numbers = #tpu.dot_dimension_numbers<[1], [0], [0], [1], [0, 0, 1, 1], [], []>} : vector<16x32xf32>, vector<32x256xf32>, vector<16x256xf32> -> vector<16x256xf32>
    %433 = vector.extract_strided_slice %432 {offsets = [0, 0], sizes = [8, 128], strides = [1, 1]} : vector<16x256xf32> to vector<8x128xf32>
    %434 = vector.extract_strided_slice %239 {offsets = [56, 0], sizes = [8, 128], strides = [1, 1]} : vector<64x256xf32> to vector<8x128xf32>
    %435 = arith.addf %433, %434 : vector<8x128xf32>
    %436 = vector.extract_strided_slice %432 {offsets = [8, 128], sizes = [8, 128], strides = [1, 1]} : vector<16x256xf32> to vector<8x128xf32>
    %437 = vector.extract_strided_slice %239 {offsets = [0, 128], sizes = [8, 128], strides = [1, 1]} : vector<64x256xf32> to vector<8x128xf32>
    %438 = arith.addf %436, %437 : vector<8x128xf32>
    %439 = tpu.concatenate %435, %438 in 0 : vector<8x128xf32>, vector<8x128xf32> -> vector<16x128xf32>
    %440 = arith.negf %439 : vector<16x128xf32>
    %441 = math.exp %440 : vector<16x128xf32>
    %cst_109 = arith.constant 1.000000e+00 : f32
    %442 = vector.broadcast %cst_109 : f32 to vector<16x128xf32>
    %443 = arith.addf %442, %441 : vector<16x128xf32>
    %444 = arith.divf %442, %443 : vector<16x128xf32>
    %445 = math.tanh %439 : vector<16x128xf32>
    %446 = vector.extract_strided_slice %444 {offsets = [0, 32], sizes = [16, 32], strides = [1, 1]} : vector<16x128xf32> to vector<16x32xf32>
    %447 = arith.mulf %446, %424 : vector<16x32xf32>
    %448 = vector.extract_strided_slice %444 {offsets = [0, 0], sizes = [16, 32], strides = [1, 1]} : vector<16x128xf32> to vector<16x32xf32>
    %449 = vector.extract_strided_slice %445 {offsets = [0, 64], sizes = [16, 32], strides = [1, 1]} : vector<16x128xf32> to vector<16x32xf32>
    %450 = arith.mulf %448, %449 : vector<16x32xf32>
    %451 = arith.addf %447, %450 : vector<16x32xf32>
    %452 = vector.extract_strided_slice %444 {offsets = [0, 96], sizes = [16, 32], strides = [1, 1]} : vector<16x128xf32> to vector<16x32xf32>
    %453 = math.tanh %451 : vector<16x32xf32>
    %454 = arith.mulf %452, %453 : vector<16x32xf32>
    %455 = vector.extract_strided_slice %454 {offsets = [0, 0], sizes = [8, 32], strides = [1, 1]} : vector<16x32xf32> to vector<8x32xf32>
    %c56_110 = arith.constant 56 : index
    %c0_111 = arith.constant 0 : index
    %456 = vector.load %arg19[%c56_110, %c0_111] : memref<64x32xf32, #tpu.memory_space<vmem>>, vector<8x32xf32>
    tpu.vector_store %arg19[%c56_110, %c0_111], %455 {strides = array<i32>} : memref<64x32xf32, #tpu.memory_space<vmem>>, vector<8x32xf32>,
    %457 = vector.extract_strided_slice %454 {offsets = [8, 0], sizes = [8, 32], strides = [1, 1]} : vector<16x32xf32> to vector<8x32xf32>
    %c0_112 = arith.constant 0 : index
    %c0_113 = arith.constant 0 : index
    %458 = vector.load %arg20[%c0_112, %c0_113] : memref<64x32xf32, #tpu.memory_space<vmem>>, vector<8x32xf32>
    tpu.vector_store %arg20[%c0_112, %c0_113], %457 {strides = array<i32>} : memref<64x32xf32, #tpu.memory_space<vmem>>, vector<8x32xf32>,
    %c0_114 = arith.constant 0 : index
    %c0_115 = arith.constant 0 : index
    %459 = vector.load %arg19[%c0_114, %c0_115] : memref<64x32xf32, #tpu.memory_space<vmem>>, vector<64x32xf32>
    %c0_116 = arith.constant 0 : index
    %c0_117 = arith.constant 0 : index
    %460 = vector.load %arg20[%c0_116, %c0_117] : memref<64x32xf32, #tpu.memory_space<vmem>>, vector<64x32xf32>
    %c0_118 = arith.constant 0 : index
    %c0_119 = arith.constant 0 : index
    %461 = vector.load %arg8[%c0_118, %c0_119] : memref<32x1xf32, #tpu.memory_space<vmem>>, vector<32x1xf32>
    %cst_120 = arith.constant dense<0.000000e+00> : vector<64x1xf32>
    %462 = tpu.matmul %459, %461, %cst_120 {dimension_numbers = #tpu.dot_dimension_numbers<[1], [0], [0], [1], [0, 0, 1, 1], [], []>} : vector<64x32xf32>, vector<32x1xf32>, vector<64x1xf32> -> vector<64x1xf32>
    %c0_121 = arith.constant 0 : index
    %c0_122 = arith.constant 0 : index
    %463 = vector.load %arg9[%c0_121, %c0_122] : memref<32x1xf32, #tpu.memory_space<vmem>>, vector<32x1xf32>
    %cst_123 = arith.constant dense<0.000000e+00> : vector<64x1xf32>
    %464 = tpu.matmul %460, %463, %cst_123 {dimension_numbers = #tpu.dot_dimension_numbers<[1], [0], [0], [1], [0, 0, 1, 1], [], []>} : vector<64x32xf32>, vector<32x1xf32>, vector<64x1xf32> -> vector<64x1xf32>
    %465 = arith.addf %462, %464 : vector<64x1xf32>
    %c0_124 = arith.constant 0 : index
    %c0_125 = arith.constant 0 : index
    %466 = vector.load %arg10[%c0_124, %c0_125] : memref<1x1xf32, #tpu.memory_space<vmem>>, vector<1x1xf32>
    %467 = vector.broadcast %466 : vector<1x1xf32> to vector<64x1xf32>
    %468 = arith.addf %465, %467 : vector<64x1xf32>
    %469 = vector.extract_strided_slice %468 {offsets = [0, 0], sizes = [8, 1], strides = [1, 1]} : vector<64x1xf32> to vector<8x1xf32>
    %470 = vector.extract_strided_slice %468 {offsets = [8, 0], sizes = [8, 1], strides = [1, 1]} : vector<64x1xf32> to vector<8x1xf32>
    %471 = arith.maximumf %469, %470 : vector<8x1xf32>
    %472 = vector.extract_strided_slice %468 {offsets = [16, 0], sizes = [8, 1], strides = [1, 1]} : vector<64x1xf32> to vector<8x1xf32>
    %473 = arith.maximumf %471, %472 : vector<8x1xf32>
    %474 = vector.extract_strided_slice %468 {offsets = [24, 0], sizes = [8, 1], strides = [1, 1]} : vector<64x1xf32> to vector<8x1xf32>
    %475 = arith.maximumf %473, %474 : vector<8x1xf32>
    %476 = vector.extract_strided_slice %468 {offsets = [32, 0], sizes = [8, 1], strides = [1, 1]} : vector<64x1xf32> to vector<8x1xf32>
    %477 = arith.maximumf %475, %476 : vector<8x1xf32>
    %478 = vector.extract_strided_slice %468 {offsets = [40, 0], sizes = [8, 1], strides = [1, 1]} : vector<64x1xf32> to vector<8x1xf32>
    %479 = arith.maximumf %477, %478 : vector<8x1xf32>
    %480 = vector.extract_strided_slice %468 {offsets = [48, 0], sizes = [8, 1], strides = [1, 1]} : vector<64x1xf32> to vector<8x1xf32>
    %481 = arith.maximumf %479, %480 : vector<8x1xf32>
    %482 = vector.extract_strided_slice %468 {offsets = [56, 0], sizes = [8, 1], strides = [1, 1]} : vector<64x1xf32> to vector<8x1xf32>
    %483 = arith.maximumf %481, %482 : vector<8x1xf32>
    %484 = tpu.concatenate %483, %483, %483, %483, %483, %483, %483, %483 in 0 : vector<8x1xf32>, vector<8x1xf32>, vector<8x1xf32>, vector<8x1xf32>, vector<8x1xf32>, vector<8x1xf32>, vector<8x1xf32>, vector<8x1xf32> -> vector<64x1xf32>
    %485 = arith.subf %468, %484 : vector<64x1xf32>
    %486 = math.exp %485 : vector<64x1xf32>
    %487 = vector.extract_strided_slice %486 {offsets = [0, 0], sizes = [8, 1], strides = [1, 1]} : vector<64x1xf32> to vector<8x1xf32>
    %488 = vector.extract_strided_slice %486 {offsets = [8, 0], sizes = [8, 1], strides = [1, 1]} : vector<64x1xf32> to vector<8x1xf32>
    %489 = arith.addf %487, %488 : vector<8x1xf32>
    %490 = vector.extract_strided_slice %486 {offsets = [16, 0], sizes = [8, 1], strides = [1, 1]} : vector<64x1xf32> to vector<8x1xf32>
    %491 = arith.addf %489, %490 : vector<8x1xf32>
    %492 = vector.extract_strided_slice %486 {offsets = [24, 0], sizes = [8, 1], strides = [1, 1]} : vector<64x1xf32> to vector<8x1xf32>
    %493 = arith.addf %491, %492 : vector<8x1xf32>
    %494 = vector.extract_strided_slice %486 {offsets = [32, 0], sizes = [8, 1], strides = [1, 1]} : vector<64x1xf32> to vector<8x1xf32>
    %495 = arith.addf %493, %494 : vector<8x1xf32>
    %496 = vector.extract_strided_slice %486 {offsets = [40, 0], sizes = [8, 1], strides = [1, 1]} : vector<64x1xf32> to vector<8x1xf32>
    %497 = arith.addf %495, %496 : vector<8x1xf32>
    %498 = vector.extract_strided_slice %486 {offsets = [48, 0], sizes = [8, 1], strides = [1, 1]} : vector<64x1xf32> to vector<8x1xf32>
    %499 = arith.addf %497, %498 : vector<8x1xf32>
    %500 = vector.extract_strided_slice %486 {offsets = [56, 0], sizes = [8, 1], strides = [1, 1]} : vector<64x1xf32> to vector<8x1xf32>
    %501 = arith.addf %499, %500 : vector<8x1xf32>
    %502 = tpu.reciprocal %501 {approx = true} : vector<8x1xf32> -> vector<8x1xf32>
    %503 = tpu.concatenate %502, %502, %502, %502, %502, %502, %502, %502 in 0 : vector<8x1xf32>, vector<8x1xf32>, vector<8x1xf32>, vector<8x1xf32>, vector<8x1xf32>, vector<8x1xf32>, vector<8x1xf32>, vector<8x1xf32> -> vector<64x1xf32>
    %504 = arith.mulf %486, %503 : vector<64x1xf32>
    %505 = vector.broadcast %504 : vector<64x1xf32> to vector<64x32xf32>
    %506 = arith.mulf %505, %459 : vector<64x32xf32>
    %507 = vector.broadcast %504 : vector<64x1xf32> to vector<64x32xf32>
    %508 = arith.mulf %507, %460 : vector<64x32xf32>
    %509 = vector.extract_strided_slice %506 {offsets = [0, 0], sizes = [8, 32], strides = [1, 1]} : vector<64x32xf32> to vector<8x32xf32>
    %510 = vector.extract_strided_slice %508 {offsets = [0, 0], sizes = [8, 32], strides = [1, 1]} : vector<64x32xf32> to vector<8x32xf32>
    %511 = vector.extract_strided_slice %506 {offsets = [8, 0], sizes = [8, 32], strides = [1, 1]} : vector<64x32xf32> to vector<8x32xf32>
    %512 = arith.addf %509, %511 : vector<8x32xf32>
    %513 = vector.extract_strided_slice %508 {offsets = [8, 0], sizes = [8, 32], strides = [1, 1]} : vector<64x32xf32> to vector<8x32xf32>
    %514 = arith.addf %510, %513 : vector<8x32xf32>
    %515 = vector.extract_strided_slice %506 {offsets = [16, 0], sizes = [8, 32], strides = [1, 1]} : vector<64x32xf32> to vector<8x32xf32>
    %516 = arith.addf %512, %515 : vector<8x32xf32>
    %517 = vector.extract_strided_slice %508 {offsets = [16, 0], sizes = [8, 32], strides = [1, 1]} : vector<64x32xf32> to vector<8x32xf32>
    %518 = arith.addf %514, %517 : vector<8x32xf32>
    %519 = vector.extract_strided_slice %506 {offsets = [24, 0], sizes = [8, 32], strides = [1, 1]} : vector<64x32xf32> to vector<8x32xf32>
    %520 = arith.addf %516, %519 : vector<8x32xf32>
    %521 = vector.extract_strided_slice %508 {offsets = [24, 0], sizes = [8, 32], strides = [1, 1]} : vector<64x32xf32> to vector<8x32xf32>
    %522 = arith.addf %518, %521 : vector<8x32xf32>
    %523 = vector.extract_strided_slice %506 {offsets = [32, 0], sizes = [8, 32], strides = [1, 1]} : vector<64x32xf32> to vector<8x32xf32>
    %524 = arith.addf %520, %523 : vector<8x32xf32>
    %525 = vector.extract_strided_slice %508 {offsets = [32, 0], sizes = [8, 32], strides = [1, 1]} : vector<64x32xf32> to vector<8x32xf32>
    %526 = arith.addf %522, %525 : vector<8x32xf32>
    %527 = vector.extract_strided_slice %506 {offsets = [40, 0], sizes = [8, 32], strides = [1, 1]} : vector<64x32xf32> to vector<8x32xf32>
    %528 = arith.addf %524, %527 : vector<8x32xf32>
    %529 = vector.extract_strided_slice %508 {offsets = [40, 0], sizes = [8, 32], strides = [1, 1]} : vector<64x32xf32> to vector<8x32xf32>
    %530 = arith.addf %526, %529 : vector<8x32xf32>
    %531 = vector.extract_strided_slice %506 {offsets = [48, 0], sizes = [8, 32], strides = [1, 1]} : vector<64x32xf32> to vector<8x32xf32>
    %532 = arith.addf %528, %531 : vector<8x32xf32>
    %533 = vector.extract_strided_slice %508 {offsets = [48, 0], sizes = [8, 32], strides = [1, 1]} : vector<64x32xf32> to vector<8x32xf32>
    %534 = arith.addf %530, %533 : vector<8x32xf32>
    %535 = vector.extract_strided_slice %506 {offsets = [56, 0], sizes = [8, 32], strides = [1, 1]} : vector<64x32xf32> to vector<8x32xf32>
    %536 = arith.addf %532, %535 : vector<8x32xf32>
    %537 = vector.extract_strided_slice %508 {offsets = [56, 0], sizes = [8, 32], strides = [1, 1]} : vector<64x32xf32> to vector<8x32xf32>
    %538 = arith.addf %534, %537 : vector<8x32xf32>
    %c0_126 = arith.constant 0 : index
    %c0_127 = arith.constant 0 : index
    %539 = vector.load %arg11[%c0_126, %c0_127] : memref<32x32xf32, #tpu.memory_space<vmem>>, vector<32x32xf32>
    %cst_128 = arith.constant dense<0.000000e+00> : vector<8x32xf32>
    %540 = tpu.matmul %536, %539, %cst_128 {dimension_numbers = #tpu.dot_dimension_numbers<[1], [0], [0], [1], [0, 0, 1, 1], [], []>} : vector<8x32xf32>, vector<32x32xf32>, vector<8x32xf32> -> vector<8x32xf32>
    %c0_129 = arith.constant 0 : index
    %c0_130 = arith.constant 0 : index
    %541 = vector.load %arg12[%c0_129, %c0_130] : memref<32x32xf32, #tpu.memory_space<vmem>>, vector<32x32xf32>
    %cst_131 = arith.constant dense<0.000000e+00> : vector<8x32xf32>
    %542 = tpu.matmul %538, %541, %cst_131 {dimension_numbers = #tpu.dot_dimension_numbers<[1], [0], [0], [1], [0, 0, 1, 1], [], []>} : vector<8x32xf32>, vector<32x32xf32>, vector<8x32xf32> -> vector<8x32xf32>
    %543 = arith.addf %540, %542 : vector<8x32xf32>
    %c0_132 = arith.constant 0 : index
    %c0_133 = arith.constant 0 : index
    %544 = vector.load %arg13[%c0_132, %c0_133] : memref<1x32xf32, #tpu.memory_space<vmem>>, vector<1x32xf32>
    %545 = vector.broadcast %544 : vector<1x32xf32> to vector<8x32xf32>
    %546 = arith.addf %543, %545 : vector<8x32xf32>
    %cst_134 = arith.constant 0.000000e+00 : f32
    %547 = vector.broadcast %cst_134 : f32 to vector<8x32xf32>
    %548 = arith.maximumf %546, %547 : vector<8x32xf32>
    %c0_135 = arith.constant 0 : index
    %c0_136 = arith.constant 0 : index
    %549 = vector.load %arg14[%c0_135, %c0_136] : memref<32x1xf32, #tpu.memory_space<vmem>>, vector<32x1xf32>
    %cst_137 = arith.constant dense<0.000000e+00> : vector<8x1xf32>
    %550 = tpu.matmul %548, %549, %cst_137 {dimension_numbers = #tpu.dot_dimension_numbers<[1], [0], [0], [1], [0, 0, 1, 1], [], []>} : vector<8x32xf32>, vector<32x1xf32>, vector<8x1xf32> -> vector<8x1xf32>
    %c0_138 = arith.constant 0 : index
    %c0_139 = arith.constant 0 : index
    %551 = vector.load %arg15[%c0_138, %c0_139] : memref<1x1xf32, #tpu.memory_space<vmem>>, vector<1x1xf32>
    %552 = vector.broadcast %551 : vector<1x1xf32> to vector<8x1xf32>
    %553 = arith.addf %550, %552 : vector<8x1xf32>
    %554 = arith.negf %553 : vector<8x1xf32>
    %555 = math.exp %554 : vector<8x1xf32>
    %cst_140 = arith.constant 1.000000e+00 : f32
    %556 = vector.broadcast %cst_140 : f32 to vector<8x1xf32>
    %557 = arith.addf %556, %555 : vector<8x1xf32>
    %558 = arith.divf %556, %557 : vector<8x1xf32>
    %c0_141 = arith.constant 0 : index
    %c0_142 = arith.constant 0 : index
    %559 = vector.load %arg16[%c0_141, %c0_142] : memref<8x1xf32, #tpu.memory_space<vmem>>, vector<8x1xf32>
    tpu.vector_store %arg16[%c0_141, %c0_142], %558 {strides = array<i32>} : memref<8x1xf32, #tpu.memory_space<vmem>>, vector<8x1xf32>,
    return
  }
}

</mosaic_0001>

<bundles_post_ra>
// kernel: tpu_custom_call.1
= control target key start
LH: loop header
LB: loop body
LE: loop exit
PB: predicated region body
PF: predicated region fallthrough
CT: control target
= control target key end

     0   :  { %s5373_s0 = inlined_call_operand.vmem [shape: s32[64,1], index: 0, kind: input, shape index: {}]   ;;  %s5374_s1 = inlined_call_operand.vmem [shape: f32[50,256], index: 1, kind: input, shape index: {}]   ;;  %s5375_s2 = inlined_call_operand.hbm [shape: f32[1,256], index: 2, kind: input, shape index: {}]   ;;  %s5376_s3 = inlined_call_operand.vmem [shape: f32[32,256], index: 3, kind: input, shape index: {}]   ;;  %s5377_s4 = inlined_call_operand.hbm [shape: f32[32,256], index: 4, kind: input, shape index: {}]   ;;  %s5378_s5 = inlined_call_operand.hbm [shape: f32[32,256], index: 5, kind: input, shape index: {}]   ;;  %s5379_s6 = inlined_call_operand.hbm [shape: f32[1,256], index: 6, kind: input, shape index: {}]   ;;  %s5380_s7 = inlined_call_operand.hbm [shape: f32[32,256], index: 7, kind: input, shape index: {}]   ;;  %s5381_s8 = inlined_call_operand.vmem [shape: f32[32,1], index: 8, kind: input, shape index: {}]   ;;  %s5382_s9 = inlined_call_operand.vmem [shape: f32[32,1], index: 9, kind: input, shape index: {}]   ;;  %s5383_s10 = inlined_call_operand.<no memory space> [shape: f32[1,1], index: 10, kind: input, shape index: {}]   ;;  %s5384_s11 = inlined_call_operand.vmem [shape: f32[32,32], index: 11, kind: input, shape index: {}]   ;;  %s5385_s12 = inlined_call_operand.hbm [shape: f32[32,32], index: 12, kind: input, shape index: {}]   ;;  %s5386_s13 = inlined_call_operand.vmem [shape: f32[1,32], index: 13, kind: input, shape index: {}]   ;;  %s5387_s14 = inlined_call_operand.vmem [shape: f32[32,1], index: 14, kind: input, shape index: {}]   ;;  %s5388_s16 = inlined_call_operand.vmem [shape: f32[8,1], index: 16, kind: output, shape index: {}]   ;;  %s5389_s15 = inlined_call_operand.<no memory space> [shape: f32[1,1], index: 15, kind: input, shape index: {}]  }
   0x1   :  { %5391 = sst [smem:[#allocation22_spill]] %s5373_s0  ;;  %v21_v0 = vstv %s5383_s10  ;;  %v23_v1 = vstv %s5389_s15 }
   0x2   :  { %22 = vst [vmem:[#allocation6] sm:$0x1] %v21_v0  ;;  %24 = vst [vmem:[#allocation7] sm:$0x1] %v23_v1 }
   0x3   :  { %25 = vsyncpa [#allocation9], 0 }
   0x4   :  { %26 = vsyncpa [#allocation11], 0 }
   0x5   :  { %27 = vsyncpa [#allocation14], 0 }
   0x6   :  { %28 = vsyncpa [#allocation17], 0  ;;  %s4490_s25 = smov [#allocation10]   ;;  %s4350_s29 = scalar_lea.hbm %s5377_s4, 1024 }
   0x7   :  { %s50_s26 = sshll.u32 %s4490_s25, 4  ;;  %p4351_p0 = scmp.ne.s32.totalorder %s5377_s4, %s4350_s29  ;;  %s51_s26 = int_to_ptr.vmem [resolvable:$true] %s50_s26 }
   0x8   :  { %p4354_p1 = scmp.lt.u32.totalorder %s4350_s29, %s5377_s4 }
   0xa   :  { %p4356_p2 = pnand %p4354_p1, %p4351_p0 }
   0xc   :  { %4359 = shalt.err (!%p4356_p2)
}
   0xd   :  { %s4360_s15 = scalar_lea.vmem %s51_s26, 1024  ;;  %p4365_p4 = scmp.lt.s32.totalorder %s51_s26, %s51_s26 }
   0xe   :  { %p4361_p3 = scmp.ne.s32.totalorder %s51_s26, %s4360_s15  ;;  %p4366_p5 = scmp.lt.s32.totalorder %s4360_s15, %s4360_s15 }
  0x10   :  { %p4367_p6 = por %p4366_p5, %p4365_p4 }
  0x12   :  { %p4368_p7 = pnand %p4367_p6, %p4361_p3 }
  0x14   :  { %4371 = shalt.err (!%p4368_p7)
}
  0x15   :  { %s4491_s18 = smov 256   ;;  %s4492_s19 = smov 16  }
  0x16   :  { %56 = dma.hbm_to_vmem [thread:$0]  %s5377_s4, 1024, %s51_s26, [#allocation11], %s4491_s18, %s4491_s18, %s4492_s19  }
  0x17   :  { %s4493_s22 = smov [#allocation13]   ;;  %s4494_s24 = smov [#allocation8]  }
  0x18   :  { %s75_s23 = sshll.u32 %s4493_s22, 4  ;;  %s39_s25 = sshll.u32 %s4494_s24, 4  ;;  %s76_s23 = int_to_ptr.vmem [resolvable:$true] %s75_s23  ;;  %s40_s25 = int_to_ptr.vmem [resolvable:$true] %s39_s25 }
  0x19   :  { %s4372_s29 = scalar_lea.hbm %s5379_s6, 32 }
  0x1a   :  { %p4373_p8 = scmp.ne.s32.totalorder %s5379_s6, %s4372_s29  ;;  %p4376_p9 = scmp.lt.u32.totalorder %s4372_s29, %s5379_s6 }
  0x1c   :  { %p4378_p10 = pnand %p4376_p9, %p4373_p8 }
  0x1e   :  { %4381 = shalt.err (!%p4378_p10)
}
  0x1f   :  { %s4382_s4 = scalar_lea.vmem %s76_s23, 32  ;;  %p4387_p12 = scmp.lt.s32.totalorder %s76_s23, %s76_s23 }
  0x20   :  { %p4383_p11 = scmp.ne.s32.totalorder %s76_s23, %s4382_s4  ;;  %p4388_p13 = scmp.lt.s32.totalorder %s4382_s4, %s4382_s4 }
  0x22   :  { %p4389_p0 = por %p4388_p13, %p4387_p12 }
  0x24   :  { %p4390_p1 = pnand %p4389_p0, %p4383_p11 }
  0x26   :  { %4393 = shalt.err (!%p4390_p1)
}
  0x27   :  { %78 = dma.hbm_to_vmem [thread:$0]  %s5379_s6, 32, %s76_s23, [#allocation14]  }
  0x28   :  { %s4394_s22 = scalar_lea.hbm %s5375_s2, 32 }
  0x29   :  { %p4395_p2 = scmp.ne.s32.totalorder %s5375_s2, %s4394_s22  ;;  %p4398_p3 = scmp.lt.u32.totalorder %s4394_s22, %s5375_s2 }
  0x2b   :  { %p4400_p4 = pnand %p4398_p3, %p4395_p2 }
  0x2d   :  { %4403 = shalt.err (!%p4400_p4)
}
  0x2e   :  { %s4404_s30 = scalar_lea.vmem %s40_s25, 32  ;;  %p4409_p6 = scmp.lt.s32.totalorder %s40_s25, %s40_s25 }
  0x2f   :  { %p4405_p5 = scmp.ne.s32.totalorder %s40_s25, %s4404_s30  ;;  %p4410_p7 = scmp.lt.s32.totalorder %s4404_s30, %s4404_s30 }
  0x31   :  { %p4411_p8 = por %p4410_p7, %p4409_p6 }
  0x33   :  { %p4412_p9 = pnand %p4411_p8, %p4405_p5 }
  0x35   :  { %4415 = shalt.err (!%p4412_p9)
}
  0x36   :  { %42 = dma.hbm_to_vmem [thread:$0]  %s5375_s2, 32, %s40_s25, [#allocation9]  }
  0x37   :  { %s4495_s0 = smov [#allocation12]   ;;  %s4496_s17 = smov [#allocation15]  }
  0x38   :  { %s62_s10 = sshll.u32 %s4495_s0, 4  ;;  %s84_s4 = sshll.u32 %s4496_s17, 4  ;;  %s63_s10 = int_to_ptr.vmem [resolvable:$true] %s62_s10  ;;  %s85_s4 = int_to_ptr.vmem [resolvable:$true] %s84_s4 }
  0x39   :  { %s4416_s20 = scalar_lea.hbm %s5378_s5, 1024 }
  0x3a   :  { %p4417_p10 = scmp.ne.s32.totalorder %s5378_s5, %s4416_s20  ;;  %p4420_p11 = scmp.lt.u32.totalorder %s4416_s20, %s5378_s5 }
  0x3c   :  { %p4422_p12 = pnand %p4420_p11, %p4417_p10 }
  0x3e   :  { %4425 = shalt.err (!%p4422_p12)
}
  0x3f   :  { %s4426_s2 = scalar_lea.vmem %s63_s10, 1024  ;;  %p4431_p0 = scmp.lt.s32.totalorder %s63_s10, %s63_s10 }
  0x40   :  { %p4427_p13 = scmp.ne.s32.totalorder %s63_s10, %s4426_s2  ;;  %p4432_p1 = scmp.lt.s32.totalorder %s4426_s2, %s4426_s2 }
  0x42   :  { %p4433_p2 = por %p4432_p1, %p4431_p0 }
  0x44   :  { %p4434_p3 = pnand %p4433_p2, %p4427_p13 }
  0x46   :  { %4437 = shalt.err (!%p4434_p3)
}
  0x47   :  { %68 = dma.hbm_to_vmem [thread:$0]  %s5378_s5, 1024, %s63_s10, [#allocation11], %s4491_s18, %s4491_s18, %s4492_s19  }
  0x48   :  { %s4438_s6 = scalar_lea.hbm %s5380_s7, 1024 }
  0x49   :  { %p4439_p4 = scmp.ne.s32.totalorder %s5380_s7, %s4438_s6  ;;  %p4442_p5 = scmp.lt.u32.totalorder %s4438_s6, %s5380_s7 }
  0x4b   :  { %p4444_p6 = pnand %p4442_p5, %p4439_p4 }
  0x4d   :  { %4447 = shalt.err (!%p4444_p6)
}
  0x4e   :  { %s4448_s15 = scalar_lea.vmem %s85_s4, 1024  ;;  %p4453_p8 = scmp.lt.s32.totalorder %s85_s4, %s85_s4 }
  0x4f   :  { %p4449_p7 = scmp.ne.s32.totalorder %s85_s4, %s4448_s15  ;;  %p4454_p9 = scmp.lt.s32.totalorder %s4448_s15, %s4448_s15 }
  0x51   :  { %p4455_p10 = por %p4454_p9, %p4453_p8 }
  0x53   :  { %p4456_p11 = pnand %p4455_p10, %p4449_p7 }
  0x55   :  { %4459 = shalt.err (!%p4456_p11)
}
  0x56   :  { %90 = dma.hbm_to_vmem [thread:$0]  %s5380_s7, 1024, %s85_s4, [#allocation14], %s4491_s18, %s4491_s18, %s4492_s19  }
  0x57   :  { %s4497_s20 = smov [#allocation16]   ;;  %s4460_s27 = scalar_lea.hbm %s5385_s12, 512 }
  0x58   :  { %s104_s21 = sshll.u32 %s4497_s20, 4  ;;  %p4461_p12 = scmp.ne.s32.totalorder %s5385_s12, %s4460_s27  ;;  %s105_s21 = int_to_ptr.vmem [resolvable:$true] %s104_s21 }
  0x59   :  { %p4464_p13 = scmp.lt.u32.totalorder %s4460_s27, %s5385_s12 }
  0x5b   :  { %p4466_p0 = pnand %p4464_p13, %p4461_p12 }
  0x5d   :  { %4469 = shalt.err (!%p4466_p0)
}
  0x5e   :  { %s4470_s30 = scalar_lea.vmem %s105_s21, 512  ;;  %p4475_p2 = scmp.lt.s32.totalorder %s105_s21, %s105_s21 }
  0x5f   :  { %p4471_p1 = scmp.ne.s32.totalorder %s105_s21, %s4470_s30  ;;  %p4476_p3 = scmp.lt.s32.totalorder %s4470_s30, %s4470_s30 }
  0x61   :  { %p4477_p4 = por %p4476_p3, %p4475_p2 }
  0x63   :  { %p4478_p5 = pnand %p4477_p4, %p4471_p1 }
  0x65   :  { %4481 = shalt.err (!%p4478_p5)
}
  0x66   :  { %s4498_s7 = smov 128   ;;  %s4499_s18 = smov 8  }
  0x67   :  { %110 = dma.hbm_to_vmem [thread:$0]  %s5385_s12, 512, %s105_s21, [#allocation17], %s4498_s7, %s4498_s7, %s4499_s18  }
  0x68   :  { %4482 = dma.done.wait [#allocation9], 32  }
  0x69   :  { %4483 = vsyncadd [#allocation9], 4294967264 }
  0x6a   :  { %4484 = dma.done.wait [#allocation11], 2048  }
  0x6b   :  { %4485 = vsyncadd [#allocation11], 4294965248 }
  0x6c   :  { %4486 = dma.done.wait [#allocation14], 1056  }
  0x6d   :  { %4487 = vsyncadd [#allocation14], 4294966240 }
  0x6e   :  { %4488 = dma.done.wait [#allocation17], 512  }
  0x6f   :  { %4489 = vsyncadd [#allocation17], 4294966784  ;;  %v4500_v2 = vmov 0   ;;  %v4501_v3 = vmov 0.0   ;;  %s5392_s0 = sld [smem:[#allocation22_spill]]  ;;  %v194_v8 = vld [vmem:[%s5374_s1 + $0x8] sm:$0xff]  ;;  %v143_v44 = vlaneseq }
  0x70   :  { %4071 = vset.pattern.permute.xlu1 %v4500_v2  ;;  %4070 = vset.pattern.permute.xlu0 %v4500_v2  ;;  %v196_v9 = vld [vmem:[%s5374_s1 + $0x18] sm:$0xff]  ;;  %v193_v10 = vld [vmem:[%s5374_s1] sm:$0xff]  ;;  %v195_v11 = vld [vmem:[%s5374_s1 + $0x10] sm:$0xff]  ;;  %vm244_vm0 = vcmask 1041408   ;;  %vm219_vm1 = vcmask 408576   ;;  %s4503_s25 = smov 32  }
  0x71   :  { %315 = vmatprep.mubr.f32.mxu0 %v4501_v3  ;;  %440 = vmatprep.mubr.f32.mxu1 %v4501_v3  ;;  %v3840_v13 = vpack.c.bf16 %v196_v9, %v194_v8  ;;  %v3842_v14 = vpack.c.bf16 %v195_v11, %v193_v10  ;;  %v198_v15 = vld [vmem:[%s5374_s1 + $0x28] sm:$0xff]  ;;  %v200_v16 = vld [vmem:[%s5374_s1 + $0x38] sm:$0xff]  ;;  %v197_v17 = vld [vmem:[%s5374_s1 + $0x20] sm:$0xff]  ;;  %v144_v45 = vand.u32 127, %v143_v44  ;;  %v4820_v2 = vshrl.u32 %v143_v44, 7 }
  0x72   :  { %v3844_v18 = vpack.c.bf16 %v200_v16, %v198_v15  ;;  %v199_v19 = vld [vmem:[%s5374_s1 + $0x30] sm:$0xff]  ;;  %v202_v20 = vld [vmem:[%s5374_s1 + $0x48] sm:$0xff]  ;;  %v204_v21 = vld [vmem:[%s5374_s1 + $0x58] sm:$0xff]  ;;  %vm372_vm10 = vcmask 261120   ;;  %vm4505_vm11 = vmmov 0   ;;  %vm3601_vm12 = vcmask 7168  }
  0x73   :  { %3841 = vmatprep.subr.bf16.mxu0 %v3840_v13  ;;  %v365_v23 = vld [vmem:[%s5376_s3 + $0x8] sm:$0xff]  ;;  %v367_v24 = vld [vmem:[%s5376_s3 + $0x18] sm:$0xff]  ;;  %v3846_v25 = vpack.c.bf16 %v199_v19, %v197_v17  ;;  %v201_v27 = vld [vmem:[%s5374_s1 + $0x40] sm:$0xff]  ;;  %v3848_v30 = vpack.c.bf16 %v204_v21, %v202_v20 }
  0x74   :  { %3843 = vmatpush1.bf16.msra.mxu0 %v3842_v14  ;;  %v4734_v26 = vpack.c.bf16 %v367_v24, %v365_v23  ;;  %v364_v28 = vld [vmem:[%s5376_s3] sm:$0xff]  ;;  %v366_v29 = vld [vmem:[%s5376_s3 + $0x10] sm:$0xff]  ;;  %v369_v33 = vld [vmem:[%s5376_s3 + $0x28] sm:$0xff] }
  0x75   :  { %v137_v4 = vld [vmem:[%s5392_s0 + $0x10] sm:$0xff]  ;;  %v135_v5 = vld [vmem:[%s5392_s0] sm:$0xff]  ;;  %v138_v6 = vld [vmem:[%s5392_s0 + $0x18] sm:$0xff]  ;;  %3845 = vmatprep.subr.bf16.mxu0 %v3844_v18  ;;  %v4748_v32 = vpack.c.bf16 %v366_v29, %v364_v28 }
  0x76   :  { %152 = vperm.xlu1 %4071, %v137_v4   ;;  %146 = vperm.xlu0 %4070, %v135_v5   ;;  %v136_v7 = vld [vmem:[%s5392_s0 + $0x8] sm:$0xff]  ;;  %v139_v22 = vld [vmem:[%s5392_s0 + $0x20] sm:$0xff]  ;;  %v203_v31 = vld [vmem:[%s5374_s1 + $0x50] sm:$0xff]  ;;  %v211_v4 = vsub.s32 0, %v4820_v2 }
  0x77   :  { %v140_v12 = vld [vmem:[%s5392_s0 + $0x28] sm:$0xff]  ;;  %v371_v34 = vld [vmem:[%s5376_s3 + $0x38] sm:$0xff]  ;;  %v368_v36 = vld [vmem:[%s5376_s3 + $0x20] sm:$0xff]  ;;  %3853 = vmatprep.subr.bf16.mxu1 %v4734_v26  ;;  %v3850_v40 = vpack.c.bf16 %v203_v31, %v201_v27 }
  0x78   :  { %v4756_v35 = vpack.c.bf16 %v371_v34, %v369_v33  ;;  %v370_v37 = vld [vmem:[%s5376_s3 + $0x30] sm:$0xff]  ;;  %v142_v38 = vld [vmem:[%s5392_s0 + $0x38] sm:$0xff]  ;;  %3847 = vmatpush1.bf16.msra.mxu0 %v3846_v25  ;;  %3855 = vmatpush1.bf16.msra.mxu1 %v4748_v32  ;;  %v206_v42 = vld [vmem:[%s5374_s1 + $0x68] sm:$0x3] }
  0x79   :  { %v141_v39 = vld [vmem:[%s5392_s0 + $0x30] sm:$0xff]  ;;  %v4772_v41 = vpack.c.bf16 %v370_v37, %v368_v36  ;;  %3849 = vmatprep.subr.bf16.mxu0 %v3848_v30  ;;  %v205_v43 = vld [vmem:[%s5374_s1 + $0x60] sm:$0x3]  ;;  %v207_v5 = vld [vmem:[#allocation8] sm:$0x3]  ;;  %s4502_s1 = smov 64  }
  0x7a   :  { %155 = vperm.xlu1 %4071, %v138_v6   ;;  %149 = vperm.xlu0 %4070, %v136_v7   ;;  %v215_v6 = vsub.s32 1, %v4820_v2  ;;  %v212_v7 = vrot.slane %v207_v5, %v211_v4 }
  0x7b   :  { %3857 = vmatprep.subr.bf16.mxu1 %v4756_v35 }
  0x7c   :  { %3851 = vmatpush1.bf16.msra.mxu0 %v3850_v40  ;;  %3859 = vmatpush1.bf16.msra.mxu1 %v4772_v41  ;;  %v216_v8 = vrot.slane %v207_v5, %v215_v6 }
  0x7d   :  { %3619 = vmatprep.subr.msk.mxu0 %vm244_vm0, %v206_v42  ;;  %3861 = vmatprep.subr.bf16.mxu1 %v4734_v26 }
  0x7e   :  { %161 = vperm.xlu1 %4071, %v140_v12   ;;  %158 = vperm.xlu0 %4070, %v139_v22  }
  0x7f   :  { %441 = vmatmul.mubr.f32.vlgmr.msra.gmra.mrb[0].mxu1 %v4501_v3 }
  0x80   :  { %3620 = vmatpush1.msk.msra.mxu0 %vm244_vm0, %v205_v43  ;;  %445 = vmatprep.mubr.f32.mxu1 %v4501_v3 }
  0x81   :  { %3863 = vmatpush1.bf16.msra.mxu1 %v4748_v32  ;;  %3893 = vmatprep.subr.bf16.mxu0 %v4734_v26 }
  0x82   :  { %167 = vperm.xlu1 %4071, %v142_v38   ;;  %164 = vperm.xlu0 %4070, %v141_v39  }
  0x83   :  { %3865 = vmatprep.subr.bf16.mxu1 %v4756_v35  ;;  %446 = vmatmul.mubr.f32.gmra.mrb[2].mxu1 %v4501_v3 }
  0x84   :  { %579 = vmatprep.mubr.f32.mxu1 %v4501_v3 }
  0x85   :  { %3867 = vmatpush1.bf16.msra.mxu1 %v4772_v41 }
  0x86   :  { %3869 = vmatprep.subr.bf16.mxu1 %v4734_v26 }
  0xf5   :  { %v147_v46 = vpop.permute.xlu0 %146  ;;  %v153_v48 = vpop.permute.xlu1 %152 }
  0xf6   :  { %vm169_vm2 = vcmp.eq.s32.totalorder %v147_v46, %v144_v45  ;;  %vm171_vm3 = vcmp.eq.s32.totalorder %v153_v48, %v144_v45 }
  0xf7   :  { %v3611_v47 = vsel %vm169_vm2, 1.0, %v4501_v3  ;;  %v3613_v51 = vsel %vm171_vm3, 1.0, %v4501_v3 }
  0xf8   :  { %3621 = vmatmul.mubr.msk.f32.vlgmr.msra.gmra.mrb[0].mxu0 %vm219_vm1, %v3611_v47 }
  0xf9   :  { %v150_v49 = vpop.permute.xlu0 %149  ;;  %321 = vmatprep.mubr.f32.mxu0 %v4501_v3  ;;  %3895 = vmatpush1.bf16.msra.mxu0 %v4748_v32  ;;  %v156_v52 = vpop.permute.xlu1 %155 }
  0xfa   :  { %vm170_vm4 = vcmp.eq.s32.totalorder %v150_v49, %v144_v45  ;;  %3897 = vmatprep.subr.bf16.mxu0 %v4756_v35  ;;  %vm172_vm5 = vcmp.eq.s32.totalorder %v156_v52, %v144_v45 }
  0xfb   :  { %v3612_v50 = vsel %vm170_vm4, 1.0, %v4501_v3  ;;  %v3614_v54 = vsel %vm172_vm5, 1.0, %v4501_v3 }
  0xfc   :  { %3622 = vmatmul.mubr.msk.f32.gmra.mrb[2].mxu0 %vm219_vm1, %v3612_v50 }
  0xfd   :  { %327 = vmatprep.mubr.f32.mxu0 %v4501_v3  ;;  %3899 = vmatpush1.bf16.msra.mxu0 %v4772_v41  ;;  %v159_v53 = vpop.permute.xlu0 %158  ;;  %v162_v55 = vpop.permute.xlu1 %161 }
  0xfe   :  { %3909 = vmatprep.subr.bf16.mxu0 %v4734_v26  ;;  %vm173_vm6 = vcmp.eq.s32.totalorder %v159_v53, %v144_v45  ;;  %vm174_vm7 = vcmp.eq.s32.totalorder %v162_v55, %v144_v45 }
  0xff   :  { %v3615_v56 = vsel %vm173_vm6, 1.0, %v4501_v3  ;;  %v3616_v58 = vsel %vm174_vm7, 1.0, %v4501_v3 }
 0x100   :  { %3623 = vmatmul.mubr.msk.f32.gmra.mrb[4].mxu0 %vm219_vm1, %v3613_v51 }
 0x101   :  { %333 = vmatprep.mubr.f32.mxu0 %v4501_v3  ;;  %v165_v57 = vpop.permute.xlu0 %164  ;;  %v168_v59 = vpop.permute.xlu1 %167 }
 0x102   :  { %vm175_vm8 = vcmp.eq.s32.totalorder %v165_v57, %v144_v45  ;;  %vm176_vm9 = vcmp.eq.s32.totalorder %v168_v59, %v144_v45 }
 0x103   :  { %v3617_v60 = vsel %vm175_vm8, 1.0, %v4501_v3  ;;  %v3618_v61 = vsel %vm176_vm9, 1.0, %v4501_v3 }
 0x104   :  { %3624 = vmatmul.mubr.msk.f32.gmra.mrb[6].mxu0 %vm219_vm1, %v3614_v54 }
 0x105   :  { %339 = vmatprep.mubr.f32.mxu0 %v4501_v3 }
 0x108   :  { %3625 = vmatmul.mubr.msk.f32.gmra.mrb[8].mxu0 %vm219_vm1, %v3615_v56 }
 0x109   :  { %345 = vmatprep.mubr.f32.mxu0 %v4501_v3 }
 0x10c   :  { %3626 = vmatmul.mubr.msk.f32.gmra.mrb[10].mxu0 %vm219_vm1, %v3616_v58 }
 0x10d   :  { %351 = vmatprep.mubr.f32.mxu0 %v4501_v3 }
 0x110   :  { %3627 = vmatmul.mubr.msk.f32.gmra.mrb[12].mxu0 %vm219_vm1, %v3617_v60 }
 0x111   :  { %357 = vmatprep.mubr.f32.mxu0 %v4501_v3 }
 0x114   :  { %3628 = vmatmul.mubr.msk.f32.gmra.mrb[14].mxu0 %vm219_vm1, %v3618_v61 }
 0x115   :  { %1135 = vmatprep.mubr.f32.mxu0 %v4501_v3 }
 0x152   :  { %v442_v62 = vpop.f32.mrb[0].mxu1 }
 0x153   :  { %v444_v63 = vpop.f32.mrb[1].mxu1 }
 0x156   :  { %v447_v0 = vpop.f32.mrb[2].mxu1 }
 0x157   :  { %v448_v1 = vpop.f32.mrb[3].mxu1 }
 0x1cb   :  { %v317_v9 = vpop.f32.mrb[0].mxu0 }
 0x1cc   :  { %v318_v10 = vadd.f32 %v317_v9, %v212_v7  ;;  %v319_v11 = vpop.f32.mrb[1].mxu0 }
 0x1cd   :  { %v4828_v12 = vadd.f32 %v319_v11, %v216_v8 }
 0x1ce   :  { %v451_v13 = vadd.f32 %v442_v62, %v318_v10 }
 0x1cf   :  { %v323_v14 = vpop.f32.mrb[2].mxu0 }
 0x1d0   :  { %4072 = vtanh.f32 %v451_v13  ;;  %v4830_v15 = vadd.f32 %v323_v14, %v212_v7  ;;  %v325_v16 = vpop.f32.mrb[3].mxu0  ;;  %v3629_v49 = vmul.f32 -1.442695, %v451_v13 }
 0x1d1   :  { %v4832_v17 = vadd.f32 %v325_v16, %v216_v8 }
 0x1d3   :  { %v329_v18 = vpop.f32.mrb[4].mxu0 }
 0x1d4   :  { %v4834_v19 = vadd.f32 %v329_v18, %v212_v7  ;;  %v331_v20 = vpop.f32.mrb[5].mxu0 }
 0x1d5   :  { %v4836_v21 = vadd.f32 %v331_v20, %v216_v8 }
 0x1d7   :  { %v335_v22 = vpop.f32.mrb[6].mxu0 }
 0x1d8   :  { %v4838_v23 = vadd.f32 %v335_v22, %v212_v7  ;;  %v337_v24 = vpop.f32.mrb[7].mxu0 }
 0x1d9   :  { %v4840_v25 = vadd.f32 %v337_v24, %v216_v8 }
 0x1da   :  { %v4073_v27 = vpop.eup %4072 }
 0x1db   :  { %471 = vrot.lane.b32.xlu0 %v4073_v27, %s4502_s1  ;;  %v341_v28 = vpop.f32.mrb[8].mxu0 }
 0x1dc   :  { %v4843_v29 = vadd.f32 %v341_v28, %v212_v7  ;;  %v343_v30 = vpop.f32.mrb[9].mxu0 }
 0x1dd   :  { %v4845_v31 = vadd.f32 %v343_v30, %v216_v8 }
 0x1df   :  { %v347_v33 = vpop.f32.mrb[10].mxu0 }
 0x1e0   :  { %v4847_v34 = vadd.f32 %v347_v33, %v212_v7  ;;  %v349_v36 = vpop.f32.mrb[11].mxu0 }
 0x1e1   :  { %v4849_v37 = vadd.f32 %v349_v36, %v216_v8 }
 0x1e3   :  { %v353_v38 = vpop.f32.mrb[12].mxu0 }
 0x1e4   :  { %v4851_v39 = vadd.f32 %v353_v38, %v212_v7  ;;  %v355_v40 = vpop.f32.mrb[13].mxu0 }
 0x1e5   :  { %v4853_v42 = vadd.f32 %v355_v40, %v216_v8 }
 0x1e7   :  { %v359_v43 = vpop.f32.mrb[14].mxu0 }
 0x1e8   :  { %v4855_v44 = vadd.f32 %v359_v43, %v212_v7  ;;  %v361_v45 = vpop.f32.mrb[15].mxu0 }
 0x1e9   :  { %v362_v46 = vadd.f32 %v361_v45, %v216_v8 }
 0x1eb   :  { %v452_v47 = vadd.f32 %v448_v1, %v362_v46 }
 0x1ed   :  { %4074 = vtanh.f32 %v452_v47  ;;  %v3630_v52 = vmul.f32 -1.442695, %v452_v47 }
 0x1ee   :  { %4076 = vpow2.f32 %v3629_v49 }
 0x1f7   :  { %v4075_v48 = vpop.eup %4074 }
 0x1f8   :  { %473 = vrot.lane.b32.xlu1 %v4075_v48, %s4502_s1  ;;  %v4077_v50 = vpop.eup %4076 }
 0x1f9   :  { %v459_v51 = vadd.f32 1.0, %v4077_v50 }
 0x1fb   :  { %4078 = vrcp.f32 %v459_v51 }
 0x1fc   :  { %4080 = vpow2.f32 %v3630_v52 }
 0x205   :  { %v4079_v53 = vpop.eup %4078 }
 0x206   :  { %v4081_v56 = vpop.eup %4080  ;;  %v467_v61 = vmul.f32 0.0, %v4079_v53 }
 0x207   :  { %v460_v57 = vadd.f32 1.0, %v4081_v56 }
 0x209   :  { %4082 = vrcp.f32 %v460_v57 }
 0x213   :  { %v4083_v58 = vpop.eup %4082 }
 0x214   :  { %v468_v1 = vmul.f32 0.0, %v4083_v58 }
 0x24d   :  { %v472_v54 = vpop.permute.xlu0 %471 }
 0x24e   :  { %v477_v55 = vmul.f32 %v4079_v53, %v472_v54 }
 0x250   :  { %481 = vrot.lane.b32.xlu0 %v477_v55, %s4503_s25 }
 0x26a   :  { %v474_v59 = vpop.permute.xlu1 %473 }
 0x26b   :  { %v478_v60 = vmul.f32 %v4083_v58, %v474_v59 }
 0x26d   :  { %483 = vrot.lane.b32.xlu1 %v478_v60, %s4503_s25 }
 0x2c2   :  { %v482_v62 = vpop.permute.xlu0 %481 }
 0x2c3   :  { %v487_v63 = vadd.f32 %v482_v62, %v467_v61 }
 0x2c5   :  { %4084 = vtanh.f32 %v487_v63 }
 0x2cf   :  { %v4085_v0 = vpop.eup %4084 }
 0x2d0   :  { %493 = vrot.lane.b32.xlu0 %v4085_v0, %s4502_s1 }
 0x2df   :  { %v484_v5 = vpop.permute.xlu1 %483 }
 0x2e0   :  { %v488_v7 = vadd.f32 %v484_v5, %v468_v1 }
 0x2e2   :  { %4086 = vtanh.f32 %v488_v7 }
 0x2ec   :  { %v4087_v8 = vpop.eup %4086 }
 0x2ed   :  { %495 = vrot.lane.b32.xlu1 %v4087_v8, %s4502_s1 }
 0x342   :  { %v494_v9 = vpop.permute.xlu0 %493 }
 0x343   :  { %v499_v10 = vmul.f32 %v4079_v53, %v494_v9 }
 0x345   :  { %502 = vrot.lane.b32.xlu0 %v499_v10, %s4503_s25 }
 0x35f   :  { %v496_v11 = vpop.permute.xlu1 %495 }
 0x360   :  { %v500_v13 = vmul.f32 %v4083_v58, %v496_v11 }
 0x362   :  { %507 = vrot.lane.b32.xlu1 %v500_v13, %s4503_s25 }
 0x3b7   :  { %v503_v14 = vpop.permute.xlu0 %502 }
 0x3b8   :  { %505 = vst.msk [vmem:[#allocation2] sm:$0xff] %vm372_vm10, %v503_v14  ;;  %3631 = vmatmul.mubr.msk.f32.vlgmr.msra.gmra.mrb[4].mxu1 %vm372_vm10, %v503_v14 }
 0x3b9   :  { %584 = vmatprep.mubr.f32.mxu1 %v4501_v3  ;;  %3871 = vmatpush1.bf16.msra.mxu1 %v4748_v32 }
 0x3ba   :  { %3873 = vmatprep.subr.bf16.mxu1 %v4756_v35 }
 0x3bd   :  { %3875 = vmatpush1.bf16.msra.mxu1 %v4772_v41 }
 0x3be   :  { %3877 = vmatprep.subr.bf16.mxu1 %v4734_v26 }
 0x3d4   :  { %v508_v16 = vpop.permute.xlu1 %507 }
 0x3d5   :  { %510 = vst.msk [vmem:[#allocation3 + $0x38] sm:$0xff] %vm372_vm10, %v508_v16  ;;  %3632 = vmatmul.mubr.msk.f32.gmra.mrb[6].mxu1 %vm372_vm10, %v508_v16 }
 0x3d6   :  { %718 = vmatprep.mubr.f32.mxu1 %v4501_v3 }
 0x48b   :  { %v581_v18 = vpop.f32.mrb[4].mxu1 }
 0x48c   :  { %v590_v20 = vadd.f32 %v581_v18, %v4830_v15  ;;  %v583_v22 = vpop.f32.mrb[5].mxu1 }
 0x48e   :  { %4088 = vtanh.f32 %v590_v20  ;;  %v3633_v36 = vmul.f32 -1.442695, %v590_v20 }
 0x498   :  { %v4089_v24 = vpop.eup %4088 }
 0x499   :  { %610 = vrot.lane.b32.xlu0 %v4089_v24, %s4502_s1 }
 0x4a8   :  { %v586_v27 = vpop.f32.mrb[6].mxu1 }
 0x4a9   :  { %v587_v28 = vpop.f32.mrb[7].mxu1 }
 0x4aa   :  { %v591_v30 = vadd.f32 %v587_v28, %v4853_v42 }
 0x4ac   :  { %4090 = vtanh.f32 %v591_v30  ;;  %v3634_v43 = vmul.f32 -1.442695, %v591_v30 }
 0x4ad   :  { %4092 = vpow2.f32 %v3633_v36 }
 0x4b6   :  { %v4091_v33 = vpop.eup %4090 }
 0x4b7   :  { %612 = vrot.lane.b32.xlu1 %v4091_v33, %s4502_s1  ;;  %v4093_v38 = vpop.eup %4092 }
 0x4b8   :  { %v598_v40 = vadd.f32 1.0, %v4093_v38 }
 0x4ba   :  { %4094 = vrcp.f32 %v598_v40 }
 0x4bb   :  { %4096 = vpow2.f32 %v3634_v43 }
 0x4c4   :  { %v4095_v15 = vpop.eup %4094 }
 0x4c5   :  { %v4097_v47 = vpop.eup %4096  ;;  %v606_v51 = vmul.f32 %v4095_v15, %v487_v63 }
 0x4c6   :  { %v599_v48 = vadd.f32 1.0, %v4097_v47 }
 0x4c8   :  { %4098 = vrcp.f32 %v599_v48 }
 0x4d2   :  { %v4099_v42 = vpop.eup %4098 }
 0x4d3   :  { %v607_v55 = vmul.f32 %v4099_v42, %v488_v7 }
 0x50b   :  { %v611_v45 = vpop.permute.xlu0 %610 }
 0x50c   :  { %v616_v46 = vmul.f32 %v4095_v15, %v611_v45 }
 0x50e   :  { %620 = vrot.lane.b32.xlu0 %v616_v46, %s4503_s25 }
 0x529   :  { %v613_v49 = vpop.permute.xlu1 %612 }
 0x52a   :  { %v617_v50 = vmul.f32 %v4099_v42, %v613_v49 }
 0x52c   :  { %622 = vrot.lane.b32.xlu1 %v617_v50, %s4503_s25 }
 0x580   :  { %v621_v52 = vpop.permute.xlu0 %620 }
 0x581   :  { %v626_v53 = vadd.f32 %v621_v52, %v606_v51 }
 0x583   :  { %4100 = vtanh.f32 %v626_v53 }
 0x58d   :  { %v4101_v54 = vpop.eup %4100 }
 0x58e   :  { %632 = vrot.lane.b32.xlu0 %v4101_v54, %s4502_s1 }
 0x59e   :  { %v623_v56 = vpop.permute.xlu1 %622 }
 0x59f   :  { %v627_v57 = vadd.f32 %v623_v56, %v607_v55 }
 0x5a1   :  { %4102 = vtanh.f32 %v627_v57 }
 0x5ab   :  { %v4103_v58 = vpop.eup %4102 }
 0x5ac   :  { %634 = vrot.lane.b32.xlu1 %v4103_v58, %s4502_s1 }
 0x600   :  { %v633_v59 = vpop.permute.xlu0 %632 }
 0x601   :  { %v638_v60 = vmul.f32 %v4095_v15, %v633_v59 }
 0x603   :  { %641 = vrot.lane.b32.xlu0 %v638_v60, %s4503_s25 }
 0x61e   :  { %v635_v61 = vpop.permute.xlu1 %634 }
 0x61f   :  { %v639_v62 = vmul.f32 %v4099_v42, %v635_v61 }
 0x621   :  { %646 = vrot.lane.b32.xlu1 %v639_v62, %s4503_s25 }
 0x675   :  { %v642_v63 = vpop.permute.xlu0 %641 }
 0x676   :  { %644 = vst.msk [vmem:[#allocation2 + $0x8] sm:$0xff] %vm372_vm10, %v642_v63  ;;  %3635 = vmatmul.mubr.msk.f32.vlgmr.msra.gmra.mrb[8].mxu1 %vm372_vm10, %v642_v63 }
 0x677   :  { %723 = vmatprep.mubr.f32.mxu1 %v4501_v3  ;;  %3879 = vmatpush1.bf16.msra.mxu1 %v4748_v32 }
 0x678   :  { %3881 = vmatprep.subr.bf16.mxu1 %v4756_v35 }
 0x67b   :  { %3883 = vmatpush1.bf16.msra.mxu1 %v4772_v41 }
 0x67c   :  { %3885 = vmatprep.subr.bf16.mxu1 %v4734_v26 }
 0x693   :  { %v647_v0 = vpop.permute.xlu1 %646 }
 0x694   :  { %649 = vst.msk [vmem:[#allocation3 + $0x30] sm:$0xff] %vm372_vm10, %v647_v0  ;;  %3636 = vmatmul.mubr.msk.f32.gmra.mrb[10].mxu1 %vm372_vm10, %v647_v0 }
 0x695   :  { %857 = vmatprep.mubr.f32.mxu1 %v4501_v3 }
 0x749   :  { %v720_v1 = vpop.f32.mrb[8].mxu1 }
 0x74a   :  { %v729_v5 = vadd.f32 %v720_v1, %v4834_v19  ;;  %v722_v7 = vpop.f32.mrb[9].mxu1 }
 0x74c   :  { %4104 = vtanh.f32 %v729_v5  ;;  %v3637_v14 = vmul.f32 -1.442695, %v729_v5 }
 0x756   :  { %v4105_v8 = vpop.eup %4104 }
 0x757   :  { %749 = vrot.lane.b32.xlu0 %v4105_v8, %s4502_s1 }
 0x767   :  { %v725_v9 = vpop.f32.mrb[10].mxu1 }
 0x768   :  { %v726_v10 = vpop.f32.mrb[11].mxu1 }
 0x769   :  { %v730_v11 = vadd.f32 %v726_v10, %v4849_v37 }
 0x76b   :  { %4106 = vtanh.f32 %v730_v11  ;;  %v3638_v19 = vmul.f32 -1.442695, %v730_v11 }
 0x76c   :  { %4108 = vpow2.f32 %v3637_v14 }
 0x775   :  { %v4107_v13 = vpop.eup %4106 }
 0x776   :  { %751 = vrot.lane.b32.xlu1 %v4107_v13, %s4502_s1  ;;  %v4109_v16 = vpop.eup %4108 }
 0x777   :  { %v737_v18 = vadd.f32 1.0, %v4109_v16 }
 0x779   :  { %4110 = vrcp.f32 %v737_v18 }
 0x77a   :  { %4112 = vpow2.f32 %v3638_v19 }
 0x783   :  { %v4111_v20 = vpop.eup %4110 }
 0x784   :  { %v4113_v27 = vpop.eup %4112  ;;  %v745_v36 = vmul.f32 %v4111_v20, %v626_v53 }
 0x785   :  { %v738_v28 = vadd.f32 1.0, %v4113_v27 }
 0x787   :  { %4114 = vrcp.f32 %v738_v28 }
 0x791   :  { %v4115_v37 = vpop.eup %4114 }
 0x792   :  { %v746_v15 = vmul.f32 %v4115_v37, %v627_v57 }
 0x7c9   :  { %v750_v22 = vpop.permute.xlu0 %749 }
 0x7ca   :  { %v755_v24 = vmul.f32 %v4111_v20, %v750_v22 }
 0x7cc   :  { %759 = vrot.lane.b32.xlu0 %v755_v24, %s4503_s25 }
 0x7e8   :  { %v752_v30 = vpop.permute.xlu1 %751 }
 0x7e9   :  { %v756_v33 = vmul.f32 %v4115_v37, %v752_v30 }
 0x7eb   :  { %761 = vrot.lane.b32.xlu1 %v756_v33, %s4503_s25 }
 0x83e   :  { %v760_v38 = vpop.permute.xlu0 %759 }
 0x83f   :  { %v765_v40 = vadd.f32 %v760_v38, %v745_v36 }
 0x841   :  { %4116 = vtanh.f32 %v765_v40 }
 0x84b   :  { %v4117_v43 = vpop.eup %4116 }
 0x84c   :  { %771 = vrot.lane.b32.xlu0 %v4117_v43, %s4502_s1 }
 0x85d   :  { %v762_v45 = vpop.permute.xlu1 %761 }
 0x85e   :  { %v766_v46 = vadd.f32 %v762_v45, %v746_v15 }
 0x860   :  { %4118 = vtanh.f32 %v766_v46 }
 0x86a   :  { %v4119_v47 = vpop.eup %4118 }
 0x86b   :  { %773 = vrot.lane.b32.xlu1 %v4119_v47, %s4502_s1 }
 0x8be   :  { %v772_v48 = vpop.permute.xlu0 %771 }
 0x8bf   :  { %v777_v42 = vmul.f32 %v4111_v20, %v772_v48 }
 0x8c1   :  { %780 = vrot.lane.b32.xlu0 %v777_v42, %s4503_s25 }
 0x8dd   :  { %v774_v49 = vpop.permute.xlu1 %773 }
 0x8de   :  { %v778_v50 = vmul.f32 %v4115_v37, %v774_v49 }
 0x8e0   :  { %785 = vrot.lane.b32.xlu1 %v778_v50, %s4503_s25 }
 0x933   :  { %v781_v51 = vpop.permute.xlu0 %780 }
 0x934   :  { %783 = vst.msk [vmem:[#allocation2 + $0x10] sm:$0xff] %vm372_vm10, %v781_v51  ;;  %3639 = vmatmul.mubr.msk.f32.vlgmr.msra.gmra.mrb[12].mxu1 %vm372_vm10, %v781_v51 }
 0x935   :  { %862 = vmatprep.mubr.f32.mxu1 %v4501_v3  ;;  %3887 = vmatpush1.bf16.msra.mxu1 %v4748_v32 }
 0x936   :  { %3889 = vmatprep.subr.bf16.mxu1 %v4756_v35 }
 0x939   :  { %3891 = vmatpush1.bf16.msra.mxu1 %v4772_v41 }
 0x93a   :  { %3901 = vmatprep.subr.bf16.mxu1 %v4734_v26 }
 0x952   :  { %v786_v52 = vpop.permute.xlu1 %785 }
 0x953   :  { %788 = vst.msk [vmem:[#allocation3 + $0x28] sm:$0xff] %vm372_vm10, %v786_v52  ;;  %3640 = vmatmul.mubr.msk.f32.gmra.mrb[14].mxu1 %vm372_vm10, %v786_v52 }
 0x954   :  { %996 = vmatprep.mubr.f32.mxu1 %v4501_v3 }
 0xa07   :  { %v859_v53 = vpop.f32.mrb[12].mxu1 }
 0xa08   :  { %v868_v54 = vadd.f32 %v859_v53, %v4838_v23  ;;  %v861_v55 = vpop.f32.mrb[13].mxu1 }
 0xa0a   :  { %4120 = vtanh.f32 %v868_v54  ;;  %v3641_v60 = vmul.f32 -1.442695, %v868_v54 }
 0xa14   :  { %v4121_v56 = vpop.eup %4120 }
 0xa15   :  { %888 = vrot.lane.b32.xlu0 %v4121_v56, %s4502_s1 }
 0xa26   :  { %v864_v57 = vpop.f32.mrb[14].mxu1 }
 0xa27   :  { %v865_v58 = vpop.f32.mrb[15].mxu1 }
 0xa28   :  { %v869_v59 = vadd.f32 %v865_v58, %v4845_v31 }
 0xa2a   :  { %4122 = vtanh.f32 %v869_v59  ;;  %v3642_v0 = vmul.f32 -1.442695, %v869_v59 }
 0xa2b   :  { %4124 = vpow2.f32 %v3641_v60 }
 0xa34   :  { %v4123_v26 = vpop.eup %4122 }
 0xa35   :  { %890 = vrot.lane.b32.xlu1 %v4123_v26, %s4502_s1  ;;  %v4125_v61 = vpop.eup %4124 }
 0xa36   :  { %v876_v62 = vadd.f32 1.0, %v4125_v61 }
 0xa38   :  { %4126 = vrcp.f32 %v876_v62 }
 0xa39   :  { %4128 = vpow2.f32 %v3642_v0 }
 0xa42   :  { %v4127_v63 = vpop.eup %4126 }
 0xa43   :  { %v4129_v5 = vpop.eup %4128  ;;  %v884_v10 = vmul.f32 %v4127_v63, %v765_v40 }
 0xa44   :  { %v877_v7 = vadd.f32 1.0, %v4129_v5 }
 0xa46   :  { %4130 = vrcp.f32 %v877_v7 }
 0xa50   :  { %v4131_v31 = vpop.eup %4130 }
 0xa51   :  { %v885_v16 = vmul.f32 %v4131_v31, %v766_v46 }
 0xa87   :  { %v889_v23 = vpop.permute.xlu0 %888 }
 0xa88   :  { %v894_v1 = vmul.f32 %v4127_v63, %v889_v23 }
 0xa8a   :  { %898 = vrot.lane.b32.xlu0 %v894_v1, %s4503_s25 }
 0xaa7   :  { %v891_v8 = vpop.permute.xlu1 %890 }
 0xaa8   :  { %v895_v9 = vmul.f32 %v4131_v31, %v891_v8 }
 0xaaa   :  { %900 = vrot.lane.b32.xlu1 %v895_v9, %s4503_s25 }
 0xafc   :  { %v899_v11 = vpop.permute.xlu0 %898 }
 0xafd   :  { %v904_v13 = vadd.f32 %v899_v11, %v884_v10 }
 0xaff   :  { %4132 = vtanh.f32 %v904_v13 }
 0xb09   :  { %v4133_v14 = vpop.eup %4132 }
 0xb0a   :  { %910 = vrot.lane.b32.xlu0 %v4133_v14, %s4502_s1 }
 0xb1c   :  { %v901_v18 = vpop.permute.xlu1 %900 }
 0xb1d   :  { %v905_v20 = vadd.f32 %v901_v18, %v885_v16 }
 0xb1f   :  { %4134 = vtanh.f32 %v905_v20 }
 0xb29   :  { %v4135_v19 = vpop.eup %4134 }
 0xb2a   :  { %912 = vrot.lane.b32.xlu1 %v4135_v19, %s4502_s1 }
 0xb7c   :  { %v911_v22 = vpop.permute.xlu0 %910 }
 0xb7d   :  { %v916_v24 = vmul.f32 %v4127_v63, %v911_v22 }
 0xb7f   :  { %919 = vrot.lane.b32.xlu0 %v916_v24, %s4503_s25 }
 0xb9c   :  { %v913_v27 = vpop.permute.xlu1 %912 }
 0xb9d   :  { %v917_v28 = vmul.f32 %v4131_v31, %v913_v27 }
 0xb9f   :  { %924 = vrot.lane.b32.xlu1 %v917_v28, %s4503_s25 }
 0xbf1   :  { %v920_v37 = vpop.permute.xlu0 %919 }
 0xbf2   :  { %922 = vst.msk [vmem:[#allocation2 + $0x18] sm:$0xff] %vm372_vm10, %v920_v37  ;;  %3643 = vmatmul.mubr.msk.f32.vlgmr.msra.gmra.mrb[16].mxu1 %vm372_vm10, %v920_v37 }
 0xbf3   :  { %1001 = vmatprep.mubr.f32.mxu1 %v4501_v3  ;;  %3903 = vmatpush1.bf16.msra.mxu1 %v4748_v32 }
 0xbf4   :  { %3905 = vmatprep.subr.bf16.mxu1 %v4756_v35 }
 0xbf7   :  { %3907 = vmatpush1.bf16.msra.mxu1 %v4772_v41 }
 0xc11   :  { %v925_v30 = vpop.permute.xlu1 %924 }
 0xc12   :  { %927 = vst.msk [vmem:[#allocation3 + $0x20] sm:$0xff] %vm372_vm10, %v925_v30  ;;  %3644 = vmatmul.mubr.msk.f32.gmra.mrb[18].mxu1 %vm372_vm10, %v925_v30 }
 0xc13   :  { %1274 = vmatprep.mubr.f32.mxu1 %v4501_v3 }
 0xcc5   :  { %v998_v33 = vpop.f32.mrb[16].mxu1 }
 0xcc6   :  { %v1007_v36 = vadd.f32 %v998_v33, %v4843_v29  ;;  %v1000_v38 = vpop.f32.mrb[17].mxu1 }
 0xcc8   :  { %4136 = vtanh.f32 %v1007_v36  ;;  %v3645_v47 = vmul.f32 -1.442695, %v1007_v36 }
 0xcd2   :  { %v4137_v40 = vpop.eup %4136 }
 0xcd3   :  { %1027 = vrot.lane.b32.xlu0 %v4137_v40, %s4502_s1 }
 0xce5   :  { %v1003_v43 = vpop.f32.mrb[18].mxu1 }
 0xce6   :  { %v1004_v15 = vpop.f32.mrb[19].mxu1 }
 0xce7   :  { %v1008_v45 = vadd.f32 %v1004_v15, %v4840_v25 }
 0xce9   :  { %4138 = vtanh.f32 %v1008_v45  ;;  %v3646_v51 = vmul.f32 -1.442695, %v1008_v45 }
 0xcea   :  { %4140 = vpow2.f32 %v3645_v47 }
 0xcf3   :  { %v4139_v46 = vpop.eup %4138 }
 0xcf4   :  { %1029 = vrot.lane.b32.xlu1 %v4139_v46, %s4502_s1  ;;  %v4141_v48 = vpop.eup %4140 }
 0xcf5   :  { %v1015_v42 = vadd.f32 1.0, %v4141_v48 }
 0xcf7   :  { %4142 = vrcp.f32 %v1015_v42 }
 0xcf8   :  { %4144 = vpow2.f32 %v3646_v51 }
 0xd01   :  { %v4143_v49 = vpop.eup %4142 }
 0xd02   :  { %v4145_v52 = vpop.eup %4144  ;;  %v1023_v56 = vmul.f32 %v4143_v49, %v904_v13 }
 0xd03   :  { %v1016_v53 = vadd.f32 1.0, %v4145_v52 }
 0xd05   :  { %4146 = vrcp.f32 %v1016_v53 }
 0xd0f   :  { %v4147_v25 = vpop.eup %4146 }
 0xd10   :  { %v1024_v26 = vmul.f32 %v4147_v25, %v905_v20 }
 0xd45   :  { %v1028_v29 = vpop.permute.xlu0 %1027 }
 0xd46   :  { %v1033_v50 = vmul.f32 %v4143_v49, %v1028_v29 }
 0xd48   :  { %1037 = vrot.lane.b32.xlu0 %v1033_v50, %s4503_s25 }
 0xd66   :  { %v1030_v54 = vpop.permute.xlu1 %1029 }
 0xd67   :  { %v1034_v55 = vmul.f32 %v4147_v25, %v1030_v54 }
 0xd69   :  { %1039 = vrot.lane.b32.xlu1 %v1034_v55, %s4503_s25 }
 0xdba   :  { %v1038_v57 = vpop.permute.xlu0 %1037 }
 0xdbb   :  { %v1043_v58 = vadd.f32 %v1038_v57, %v1023_v56 }
 0xdbd   :  { %4148 = vtanh.f32 %v1043_v58 }
 0xdc7   :  { %v4149_v59 = vpop.eup %4148 }
 0xdc8   :  { %1049 = vrot.lane.b32.xlu0 %v4149_v59, %s4502_s1 }
 0xddb   :  { %v1040_v60 = vpop.permute.xlu1 %1039 }
 0xddc   :  { %v1044_v61 = vadd.f32 %v1040_v60, %v1024_v26 }
 0xdde   :  { %4150 = vtanh.f32 %v1044_v61 }
 0xde8   :  { %v4151_v62 = vpop.eup %4150 }
 0xde9   :  { %1051 = vrot.lane.b32.xlu1 %v4151_v62, %s4502_s1 }
 0xe3a   :  { %v1050_v63 = vpop.permute.xlu0 %1049 }
 0xe3b   :  { %v1055_v23 = vmul.f32 %v4143_v49, %v1050_v63 }
 0xe3d   :  { %1058 = vrot.lane.b32.xlu0 %v1055_v23, %s4503_s25 }
 0xe5b   :  { %v1052_v0 = vpop.permute.xlu1 %1051 }
 0xe5c   :  { %v1056_v1 = vmul.f32 %v4147_v25, %v1052_v0 }
 0xe5e   :  { %1063 = vrot.lane.b32.xlu1 %v1056_v1, %s4503_s25 }
 0xeaf   :  { %v1059_v5 = vpop.permute.xlu0 %1058 }
 0xeb0   :  { %1061 = vst.msk [vmem:[#allocation2 + $0x20] sm:$0xff] %vm372_vm10, %v1059_v5  ;;  %3647 = vmatmul.mubr.msk.f32.vlgmr.msra.gmra.mrb[16].mxu0 %vm372_vm10, %v1059_v5 }
 0xeb1   :  { %1140 = vmatprep.mubr.f32.mxu0 %v4501_v3  ;;  %3911 = vmatpush1.bf16.msra.mxu0 %v4748_v32 }
 0xeb2   :  { %3913 = vmatprep.subr.bf16.mxu0 %v4756_v35 }
 0xeb5   :  { %3915 = vmatpush1.bf16.msra.mxu0 %v4772_v41 }
 0xed0   :  { %v1064_v7 = vpop.permute.xlu1 %1063 }
 0xed1   :  { %1066 = vst.msk [vmem:[#allocation3 + $0x18] sm:$0xff] %vm372_vm10, %v1064_v7  ;;  %3648 = vmatmul.mubr.msk.f32.gmra.mrb[18].mxu0 %vm372_vm10, %v1064_v7 }
 0xed2   :  { %1413 = vmatprep.mubr.f32.mxu0 %v4501_v3 }
 0xf83   :  { %v1137_v31 = vpop.f32.mrb[16].mxu0 }
 0xf84   :  { %v1146_v8 = vadd.f32 %v1137_v31, %v4847_v34  ;;  %v1139_v9 = vpop.f32.mrb[17].mxu0 }
 0xf86   :  { %4152 = vtanh.f32 %v1146_v8  ;;  %v3649_v13 = vmul.f32 -1.442695, %v1146_v8 }
 0xf90   :  { %v4153_v10 = vpop.eup %4152 }
 0xf91   :  { %1166 = vrot.lane.b32.xlu0 %v4153_v10, %s4502_s1 }
 0xfa4   :  { %v1142_v32 = vpop.f32.mrb[18].mxu0 }
 0xfa5   :  { %v1143_v11 = vpop.f32.mrb[19].mxu0 }
 0xfa6   :  { %v1147_v35 = vadd.f32 %v1143_v11, %v4836_v21 }
 0xfa8   :  { %4154 = vtanh.f32 %v1147_v35  ;;  %v3650_v19 = vmul.f32 -1.442695, %v1147_v35 }
 0xfa9   :  { %4156 = vpow2.f32 %v3649_v13 }
 0xfb2   :  { %v4155_v41 = vpop.eup %4154 }
 0xfb3   :  { %1168 = vrot.lane.b32.xlu1 %v4155_v41, %s4502_s1  ;;  %v4157_v14 = vpop.eup %4156 }
 0xfb4   :  { %v1154_v16 = vadd.f32 1.0, %v4157_v14 }
 0xfb6   :  { %4158 = vrcp.f32 %v1154_v16 }
 0xfb7   :  { %4160 = vpow2.f32 %v3650_v19 }
 0xfc0   :  { %v4159_v18 = vpop.eup %4158 }
 0xfc1   :  { %v4161_v22 = vpop.eup %4160  ;;  %v1162_v37 = vmul.f32 %v4159_v18, %v1043_v58 }
 0xfc2   :  { %v1155_v24 = vadd.f32 1.0, %v4161_v22 }
 0xfc4   :  { %4162 = vrcp.f32 %v1155_v24 }
 0xfce   :  { %v4163_v21 = vpop.eup %4162 }
 0xfcf   :  { %v1163_v38 = vmul.f32 %v4163_v21, %v1044_v61 }
0x1003   :  { %v1167_v34 = vpop.permute.xlu0 %1166 }
0x1004   :  { %v1172_v20 = vmul.f32 %v4159_v18, %v1167_v34 }
0x1006   :  { %1176 = vrot.lane.b32.xlu0 %v1172_v20, %s4503_s25 }
0x1025   :  { %v1169_v27 = vpop.permute.xlu1 %1168 }
0x1026   :  { %v1173_v28 = vmul.f32 %v4163_v21, %v1169_v27 }
0x1028   :  { %1178 = vrot.lane.b32.xlu1 %v1173_v28, %s4503_s25 }
0x1078   :  { %v1177_v30 = vpop.permute.xlu0 %1176 }
0x1079   :  { %v1182_v33 = vadd.f32 %v1177_v30, %v1162_v37 }
0x107b   :  { %4164 = vtanh.f32 %v1182_v33 }
0x1085   :  { %v4165_v36 = vpop.eup %4164 }
0x1086   :  { %1188 = vrot.lane.b32.xlu0 %v4165_v36, %s4502_s1 }
0x109a   :  { %v1179_v40 = vpop.permute.xlu1 %1178 }
0x109b   :  { %v1183_v43 = vadd.f32 %v1179_v40, %v1163_v38 }
0x109d   :  { %4166 = vtanh.f32 %v1183_v43 }
0x10a7   :  { %v4167_v15 = vpop.eup %4166 }
0x10a8   :  { %1190 = vrot.lane.b32.xlu1 %v4167_v15, %s4502_s1 }
0x10f8   :  { %v1189_v45 = vpop.permute.xlu0 %1188 }
0x10f9   :  { %v1194_v46 = vmul.f32 %v4159_v18, %v1189_v45 }
0x10fb   :  { %1197 = vrot.lane.b32.xlu0 %v1194_v46, %s4503_s25 }
0x111a   :  { %v1191_v47 = vpop.permute.xlu1 %1190 }
0x111b   :  { %v1195_v48 = vmul.f32 %v4163_v21, %v1191_v47 }
0x111d   :  { %1202 = vrot.lane.b32.xlu1 %v1195_v48, %s4503_s25 }
0x116d   :  { %v1198_v42 = vpop.permute.xlu0 %1197 }
0x116e   :  { %1200 = vst.msk [vmem:[#allocation2 + $0x28] sm:$0xff] %vm372_vm10, %v1198_v42  ;;  %3651 = vmatmul.mubr.msk.f32.vlgmr.msra.gmra.mrb[20].mxu1 %vm372_vm10, %v1198_v42 }
0x116f   :  { %1279 = vmatprep.mubr.f32.mxu1 %v4501_v3 }
0x118f   :  { %v1203_v49 = vpop.permute.xlu1 %1202 }
0x1190   :  { %1205 = vst.msk [vmem:[#allocation3 + $0x10] sm:$0xff] %vm372_vm10, %v1203_v49  ;;  %3652 = vmatmul.mubr.msk.f32.gmra.mrb[22].mxu1 %vm372_vm10, %v1203_v49 }
0x1191   :  { %1604 = vmatprep.mubr.f32.mxu1 %v4501_v3 }
0x1241   :  { %v1276_v29 = vpop.f32.mrb[20].mxu1 }
0x1242   :  { %v1285_v50 = vadd.f32 %v1276_v29, %v4851_v39  ;;  %v1278_v51 = vpop.f32.mrb[21].mxu1 }
0x1243   :  { %v1509_v51 = vld [vmem:[#allocation12 + $0x8] sm:$0xff] }
0x1244   :  { %4168 = vtanh.f32 %v1285_v50  ;;  %v3653_v56 = vmul.f32 -1.442695, %v1285_v50 }
0x124e   :  { %v4169_v52 = vpop.eup %4168 }
0x124f   :  { %1305 = vrot.lane.b32.xlu0 %v4169_v52, %s4502_s1  ;;  %v1511_v52 = vld [vmem:[#allocation12 + $0x18] sm:$0xff] }
0x1263   :  { %v1281_v53 = vpop.f32.mrb[22].mxu1 }
0x1264   :  { %v1282_v25 = vpop.f32.mrb[23].mxu1  ;;  %v3916_v53 = vpack.c.bf16 %v1511_v52, %v1509_v51 }
0x1265   :  { %v1286_v54 = vadd.f32 %v1282_v25, %v4832_v17 }
0x1266   :  { %3917 = vmatprep.subr.bf16.mxu1 %v3916_v53  ;;  %v1790_v53 = vld [vmem:[#allocation13] sm:$0x3] }
0x1267   :  { %4170 = vtanh.f32 %v1286_v54  ;;  %v3654_v60 = vmul.f32 -1.442695, %v1286_v54 }
0x1268   :  { %4172 = vpow2.f32 %v3653_v56  ;;  %v1510_v56 = vld [vmem:[#allocation12 + $0x10] sm:$0xff] }
0x1271   :  { %v4171_v55 = vpop.eup %4170 }
0x1272   :  { %1307 = vrot.lane.b32.xlu1 %v4171_v55, %s4502_s1  ;;  %v4173_v57 = vpop.eup %4172  ;;  %v1508_v55 = vld [vmem:[#allocation12] sm:$0xff] }
0x1273   :  { %v1293_v58 = vadd.f32 1.0, %v4173_v57  ;;  %v3918_v57 = vpack.c.bf16 %v1510_v56, %v1508_v55 }
0x1275   :  { %4174 = vrcp.f32 %v1293_v58  ;;  %v1513_v58 = vld [vmem:[#allocation12 + $0x28] sm:$0xff]  ;;  %3919 = vmatpush1.bf16.msra.mxu1 %v3918_v57 }
0x1276   :  { %4176 = vpow2.f32 %v3654_v60  ;;  %v1514_v60 = vld [vmem:[#allocation12 + $0x30] sm:$0xff] }
0x127f   :  { %v4175_v59 = vpop.eup %4174 }
0x1280   :  { %v4177_v61 = vpop.eup %4176  ;;  %v1301_v0 = vmul.f32 %v4175_v59, %v1182_v33 }
0x1281   :  { %v1294_v62 = vadd.f32 1.0, %v4177_v61  ;;  %v1501_v61 = vld [vmem:[#allocation10 + $0x8] sm:$0xff] }
0x1283   :  { %4178 = vrcp.f32 %v1294_v62  ;;  %v1503_v62 = vld [vmem:[#allocation10 + $0x18] sm:$0xff] }
0x128d   :  { %v4179_v17 = vpop.eup %4178 }
0x128e   :  { %v1302_v31 = vmul.f32 %v4179_v17, %v1183_v43 }
0x12c1   :  { %v1306_v39 = vpop.permute.xlu0 %1305 }
0x12c2   :  { %v1311_v26 = vmul.f32 %v4175_v59, %v1306_v39  ;;  %v1512_v39 = vld [vmem:[#allocation12 + $0x20] sm:$0xff] }
0x12c4   :  { %1315 = vrot.lane.b32.xlu0 %v1311_v26, %s4503_s25 }
0x12e4   :  { %v1308_v63 = vpop.permute.xlu1 %1307 }
0x12e5   :  { %v1312_v23 = vmul.f32 %v4179_v17, %v1308_v63  ;;  %v3924_v63 = vpack.c.bf16 %v1503_v62, %v1501_v61 }
0x12e7   :  { %1317 = vrot.lane.b32.xlu1 %v1312_v23, %s4503_s25 }
0x1336   :  { %v1316_v1 = vpop.permute.xlu0 %1315 }
0x1337   :  { %v1321_v5 = vadd.f32 %v1316_v1, %v1301_v0  ;;  %v1819_v1 = vld [vmem:[#allocation15 + $0x8] sm:$0xff] }
0x1339   :  { %4180 = vtanh.f32 %v1321_v5 }
0x1343   :  { %v4181_v7 = vpop.eup %4180 }
0x1344   :  { %1327 = vrot.lane.b32.xlu0 %v4181_v7, %s4502_s1 }
0x1359   :  { %v1318_v8 = vpop.permute.xlu1 %1317 }
0x135a   :  { %v1322_v9 = vadd.f32 %v1318_v8, %v1302_v31  ;;  %v1818_v31 = vld [vmem:[#allocation15] sm:$0xff]  ;;  %v1820_v8 = vld [vmem:[#allocation15 + $0x10] sm:$0xff] }
0x135c   :  { %4182 = vtanh.f32 %v1322_v9 }
0x1366   :  { %v4183_v10 = vpop.eup %4182 }
0x1367   :  { %1329 = vrot.lane.b32.xlu1 %v4183_v10, %s4502_s1  ;;  %v1823_v10 = vld [vmem:[#allocation15 + $0x28] sm:$0xff] }
0x13b6   :  { %v1328_v32 = vpop.permute.xlu0 %1327 }
0x13b7   :  { %v1333_v11 = vmul.f32 %v4175_v59, %v1328_v32  ;;  %v1515_v59 = vld [vmem:[#allocation12 + $0x38] sm:$0xff] }
0x13b8   :  { %v3920_v26 = vpack.c.bf16 %v1515_v59, %v1513_v58  ;;  %v1825_v32 = vld [vmem:[#allocation15 + $0x38] sm:$0xff] }
0x13b9   :  { %1336 = vrot.lane.b32.xlu0 %v1333_v11, %s4503_s25  ;;  %v5000_v11 = vpack.c.bf16 %v1825_v32, %v1823_v10 }
0x13ba   :  { %3921 = vmatprep.subr.bf16.mxu1 %v3920_v26 }
0x13d9   :  { %v1330_v35 = vpop.permute.xlu1 %1329 }
0x13da   :  { %v1334_v41 = vmul.f32 %v4179_v17, %v1330_v35  ;;  %v3922_v17 = vpack.c.bf16 %v1514_v60, %v1512_v39  ;;  %v1822_v35 = vld [vmem:[#allocation15 + $0x20] sm:$0xff] }
0x13dc   :  { %1341 = vrot.lane.b32.xlu1 %v1334_v41, %s4503_s25  ;;  %3923 = vmatpush1.bf16.msra.mxu1 %v3922_v17  ;;  %v1824_v41 = vld [vmem:[#allocation15 + $0x30] sm:$0xff] }
0x13dd   :  { %3925 = vmatprep.subr.bf16.mxu1 %v3924_v63 }
0x142b   :  { %v1337_v13 = vpop.permute.xlu0 %1336 }
0x142c   :  { %1339 = vst.msk [vmem:[#allocation2 + $0x30] sm:$0xff] %vm372_vm10, %v1337_v13  ;;  %3655 = vmatmul.mubr.msk.f32.vlgmr.msra.gmra.mrb[20].mxu0 %vm372_vm10, %v1337_v13  ;;  %v5002_v13 = vpack.c.bf16 %v1824_v41, %v1822_v35 }
0x142d   :  { %1418 = vmatprep.mubr.f32.mxu0 %v4501_v3 }
0x144e   :  { %v1342_v14 = vpop.permute.xlu1 %1341 }
0x144f   :  { %1344 = vst.msk [vmem:[#allocation3 + $0x8] sm:$0xff] %vm372_vm10, %v1342_v14  ;;  %3656 = vmatmul.mubr.msk.f32.gmra.mrb[22].mxu0 %vm372_vm10, %v1342_v14 }
0x1450   :  { %1890 = vmatprep.mubr.f32.mxu0 %v4501_v3 }
0x14ff   :  { %v1415_v16 = vpop.f32.mrb[20].mxu0 }
0x1500   :  { %v1424_v18 = vadd.f32 %v1415_v16, %v4855_v44  ;;  %v1417_v34 = vpop.f32.mrb[21].mxu0 }
0x1501   :  { %v1502_v34 = vld [vmem:[#allocation10 + $0x10] sm:$0xff] }
0x1502   :  { %4184 = vtanh.f32 %v1424_v18  ;;  %v3657_v27 = vmul.f32 -1.442695, %v1424_v18  ;;  %v1500_v18 = vld [vmem:[#allocation10] sm:$0xff] }
0x150c   :  { %v4185_v20 = vpop.eup %4184 }
0x150d   :  { %1444 = vrot.lane.b32.xlu1 %v4185_v20, %s4502_s1  ;;  %v1505_v20 = vld [vmem:[#allocation10 + $0x28] sm:$0xff] }
0x1522   :  { %v1420_v19 = vpop.f32.mrb[22].mxu0 }
0x1523   :  { %v1421_v22 = vpop.f32.mrb[23].mxu0  ;;  %v1507_v19 = vld [vmem:[#allocation10 + $0x38] sm:$0xff] }
0x1524   :  { %v1425_v24 = vadd.f32 %v1421_v22, %v4828_v12  ;;  %v3926_v22 = vpack.c.bf16 %v1502_v34, %v1500_v18 }
0x1526   :  { %4186 = vtanh.f32 %v1425_v24  ;;  %v3658_v36 = vmul.f32 -1.442695, %v1425_v24  ;;  %v3928_v24 = vpack.c.bf16 %v1507_v19, %v1505_v20 }
0x1527   :  { %4188 = vpow2.f32 %v3657_v27  ;;  %v1506_v27 = vld [vmem:[#allocation10 + $0x30] sm:$0xff] }
0x1530   :  { %v4187_v21 = vpop.eup %4186 }
0x1531   :  { %1446 = vrot.lane.b32.xlu0 %v4187_v21, %s4502_s1  ;;  %v4189_v28 = vpop.eup %4188  ;;  %v1504_v21 = vld [vmem:[#allocation10 + $0x20] sm:$0xff] }
0x1532   :  { %v1432_v37 = vadd.f32 1.0, %v4189_v28 }
0x1534   :  { %4190 = vrcp.f32 %v1432_v37  ;;  %v3930_v37 = vpack.c.bf16 %v1506_v27, %v1504_v21 }
0x1535   :  { %4192 = vpow2.f32 %v3658_v36  ;;  %v1496_v36 = vld [vmem:[#allocation3 + $0x20] sm:$0xff] }
0x153e   :  { %v4191_v30 = vpop.eup %4190 }
0x153f   :  { %v4193_v38 = vpop.eup %4192  ;;  %v1440_v45 = vmul.f32 %v4191_v30, %v1321_v5  ;;  %v1821_v5 = vld [vmem:[#allocation15 + $0x18] sm:$0xff] }
0x1540   :  { %v1433_v40 = vadd.f32 1.0, %v4193_v38  ;;  %v4994_v7 = vpack.c.bf16 %v1821_v5, %v1819_v1  ;;  %v1497_v38 = vld [vmem:[#allocation3 + $0x28] sm:$0xff] }
0x1542   :  { %4194 = vrcp.f32 %v1433_v40  ;;  %3933 = vmatprep.subr.bf16.mxu0 %v4994_v7  ;;  %v1498_v40 = vld [vmem:[#allocation3 + $0x30] sm:$0xff] }
0x154c   :  { %v4195_v12 = vpop.eup %4194 }
0x154d   :  { %v1441_v42 = vmul.f32 %v4195_v12, %v1322_v9  ;;  %v4996_v9 = vpack.c.bf16 %v1820_v8, %v1818_v31 }
0x154f   :  { %3935 = vmatpush1.bf16.msra.mxu0 %v4996_v9 }
0x1550   :  { %3937 = vmatprep.subr.bf16.mxu0 %v5000_v11 }
0x1553   :  { %3939 = vmatpush1.bf16.msra.mxu0 %v5002_v13 }
0x1554   :  { %3941 = vmatprep.subr.bf16.mxu0 %v4994_v7 }
0x1556   :  { %1891 = vmatmul.mubr.f32.vlgmr.msra.gmra.mrb[24].mxu0 %v4501_v3 }
0x1557   :  { %1895 = vmatprep.mubr.f32.mxu0 %v4501_v3  ;;  %3943 = vmatpush1.bf16.msra.mxu0 %v4996_v9 }
0x1558   :  { %3945 = vmatprep.subr.bf16.mxu0 %v5000_v11 }
0x155a   :  { %1896 = vmatmul.mubr.f32.gmra.mrb[26].mxu0 %v4501_v3 }
0x155b   :  { %3947 = vmatpush1.bf16.msra.mxu0 %v5002_v13  ;;  %2029 = vmatprep.mubr.f32.mxu0 %v4501_v3 }
0x155c   :  { %3949 = vmatprep.subr.bf16.mxu0 %v4994_v7 }
0x157f   :  { %v1445_v44 = vpop.permute.xlu1 %1444 }
0x1580   :  { %v1450_v33 = vmul.f32 %v4191_v30, %v1445_v44  ;;  %v1494_v44 = vld [vmem:[#allocation3 + $0x10] sm:$0xff] }
0x1582   :  { %1454 = vrot.lane.b32.xlu1 %v1450_v33, %s4503_s25  ;;  %v1495_v33 = vld [vmem:[#allocation3 + $0x18] sm:$0xff] }
0x15a3   :  { %v1447_v43 = vpop.permute.xlu0 %1446 }
0x15a4   :  { %v1451_v15 = vmul.f32 %v4195_v12, %v1447_v43  ;;  %v1484_v43 = vld [vmem:[#allocation2] sm:$0xff] }
0x15a6   :  { %1456 = vrot.lane.b32.xlu0 %v1451_v15, %s4503_s25  ;;  %v1485_v15 = vld [vmem:[#allocation2 + $0x8] sm:$0xff] }
0x15f4   :  { %v1455_v46 = vpop.permute.xlu1 %1454 }
0x15f5   :  { %v1460_v47 = vadd.f32 %v1455_v46, %v1440_v45  ;;  %v1486_v45 = vld [vmem:[#allocation2 + $0x10] sm:$0xff]  ;;  %v1487_v46 = vld [vmem:[#allocation2 + $0x18] sm:$0xff] }
0x15f7   :  { %4196 = vtanh.f32 %v1460_v47  ;;  %v1488_v47 = vld [vmem:[#allocation2 + $0x20] sm:$0xff] }
0x1601   :  { %v4197_v48 = vpop.eup %4196 }
0x1602   :  { %1466 = vrot.lane.b32.xlu1 %v4197_v48, %s4502_s1  ;;  %v1489_v48 = vld [vmem:[#allocation2 + $0x28] sm:$0xff] }
0x1618   :  { %v1457_v49 = vpop.permute.xlu0 %1456 }
0x1619   :  { %v1461_v29 = vadd.f32 %v1457_v49, %v1441_v42  ;;  %v1490_v42 = vld [vmem:[#allocation2 + $0x30] sm:$0xff] }
0x161b   :  { %4198 = vtanh.f32 %v1461_v29 }
0x1625   :  { %v4199_v50 = vpop.eup %4198 }
0x1626   :  { %1468 = vrot.lane.b32.xlu0 %v4199_v50, %s4502_s1 }
0x1629   :  { %v1892_v29 = vpop.f32.mrb[24].mxu0 }
0x162a   :  { %v1894_v50 = vpop.f32.mrb[25].mxu0 }
0x162d   :  { %v1897_v51 = vpop.f32.mrb[26].mxu0 }
0x162e   :  { %v1898_v52 = vpop.f32.mrb[27].mxu0 }
0x1674   :  { %v1467_v25 = vpop.permute.xlu1 %1466 }
0x1675   :  { %v1472_v54 = vmul.f32 %v4191_v30, %v1467_v25  ;;  %v1493_v30 = vld [vmem:[#allocation3 + $0x8] sm:$0xff]  ;;  %v1795_v25 = vrot.slane %v1790_v53, %v211_v4 }
0x1677   :  { %1475 = vrot.lane.b32.xlu1 %v1472_v54, %s4503_s25  ;;  %v1799_v54 = vrot.slane %v1790_v53, %v215_v6 }
0x1698   :  { %v1469_v23 = vpop.permute.xlu0 %1468 }
0x1699   :  { %v1473_v0 = vmul.f32 %v4195_v12, %v1469_v23  ;;  %v1499_v12 = vld [vmem:[#allocation3 + $0x38] sm:$0xff] }
0x169b   :  { %1480 = vrot.lane.b32.xlu0 %v1473_v0, %s4503_s25 }
0x16e9   :  { %v1476_v14 = vpop.permute.xlu1 %1475 }
0x16ea   :  { %1478 = vst.msk [vmem:[#allocation2 + $0x38] sm:$0xff] %vm372_vm10, %v1476_v14 }
0x16f1   :  { %v1491_v49 = vld [vmem:[#allocation2 + $0x38] sm:$0xff] }
0x170d   :  { %v1481_v16 = vpop.permute.xlu0 %1480 }
0x170e   :  { %1483 = vst.msk [vmem:[#allocation3] sm:$0xff] %vm372_vm10, %v1481_v16 }
0x1715   :  { %v1492_v28 = vld [vmem:[#allocation3] sm:$0xff] }
0x1716   :  { %3659 = vmatmul.mubr.msk.f32.vlgmr.msra.gmra.mrb[24].mxu1 %vm372_vm10, %v1492_v28 }
0x1717   :  { %3927 = vmatpush1.bf16.msra.mxu1 %v3926_v22  ;;  %1610 = vmatprep.mubr.f32.mxu1 %v4501_v3 }
0x1718   :  { %3929 = vmatprep.subr.bf16.mxu1 %v3928_v24 }
0x171a   :  { %3660 = vmatmul.mubr.msk.f32.gmra.mrb[26].mxu1 %vm372_vm10, %v1493_v30 }
0x171b   :  { %1616 = vmatprep.mubr.f32.mxu1 %v4501_v3  ;;  %3931 = vmatpush1.bf16.msra.mxu1 %v3930_v37 }
0x171e   :  { %3661 = vmatmul.mubr.msk.f32.gmra.mrb[28].mxu1 %vm372_vm10, %v1494_v44 }
0x171f   :  { %1622 = vmatprep.mubr.f32.mxu1 %v4501_v3 }
0x1722   :  { %3662 = vmatmul.mubr.msk.f32.gmra.mrb[30].mxu1 %vm372_vm10, %v1495_v33 }
0x1723   :  { %1628 = vmatprep.mubr.f32.mxu1 %v4501_v3 }
0x1726   :  { %3663 = vmatmul.mubr.msk.f32.gmra.mrb[32].mxu1 %vm372_vm10, %v1496_v36 }
0x1727   :  { %1634 = vmatprep.mubr.f32.mxu1 %v4501_v3 }
0x172a   :  { %3664 = vmatmul.mubr.msk.f32.gmra.mrb[34].mxu1 %vm372_vm10, %v1497_v38 }
0x172b   :  { %1640 = vmatprep.mubr.f32.mxu1 %v4501_v3 }
0x172e   :  { %3665 = vmatmul.mubr.msk.f32.gmra.mrb[36].mxu1 %vm372_vm10, %v1498_v40 }
0x172f   :  { %1646 = vmatprep.mubr.f32.mxu1 %v4501_v3 }
0x1732   :  { %3666 = vmatmul.mubr.msk.f32.gmra.mrb[38].mxu1 %vm372_vm10, %v1499_v12 }
0x1733   :  { %1741 = vmatprep.mubr.f32.mxu1 %v4501_v3 }
0x1736   :  { %3667 = vmatmul.mubr.msk.f32.vlgmr.msra.gmra.mrb[24].mxu1 %vm372_vm10, %v1484_v43 }
0x1737   :  { %1747 = vmatprep.mubr.f32.mxu1 %v4501_v3 }
0x173a   :  { %3668 = vmatmul.mubr.msk.f32.gmra.mrb[26].mxu1 %vm372_vm10, %v1485_v15 }
0x173b   :  { %1753 = vmatprep.mubr.f32.mxu1 %v4501_v3 }
0x173e   :  { %3669 = vmatmul.mubr.msk.f32.gmra.mrb[28].mxu1 %vm372_vm10, %v1486_v45 }
0x173f   :  { %1759 = vmatprep.mubr.f32.mxu1 %v4501_v3 }
0x1742   :  { %3670 = vmatmul.mubr.msk.f32.gmra.mrb[30].mxu1 %vm372_vm10, %v1487_v46 }
0x1743   :  { %1765 = vmatprep.mubr.f32.mxu1 %v4501_v3 }
0x1746   :  { %3671 = vmatmul.mubr.msk.f32.gmra.mrb[32].mxu1 %vm372_vm10, %v1488_v47 }
0x1747   :  { %1771 = vmatprep.mubr.f32.mxu1 %v4501_v3 }
0x174a   :  { %3672 = vmatmul.mubr.msk.f32.gmra.mrb[34].mxu1 %vm372_vm10, %v1489_v48 }
0x174b   :  { %1777 = vmatprep.mubr.f32.mxu1 %v4501_v3 }
0x174e   :  { %3673 = vmatmul.mubr.msk.f32.gmra.mrb[36].mxu1 %vm372_vm10, %v1490_v42 }
0x174f   :  { %1783 = vmatprep.mubr.f32.mxu1 %v4501_v3 }
0x1752   :  { %3674 = vmatmul.mubr.msk.f32.gmra.mrb[38].mxu1 %vm372_vm10, %v1491_v49 }
0x1809   :  { %v1743_v55 = vpop.f32.mrb[24].mxu1 }
0x180a   :  { %v1802_v56 = vadd.f32 %v1795_v25, %v1743_v55  ;;  %v1745_v57 = vpop.f32.mrb[25].mxu1 }
0x180b   :  { %v5052_v58 = vadd.f32 %v1799_v54, %v1745_v57 }
0x180c   :  { %v1901_v59 = vadd.f32 %v1892_v29, %v1802_v56 }
0x180d   :  { %v1749_v39 = vpop.f32.mrb[26].mxu1 }
0x180e   :  { %4200 = vtanh.f32 %v1901_v59  ;;  %v5054_v26 = vadd.f32 %v1795_v25, %v1749_v39  ;;  %v1751_v60 = vpop.f32.mrb[27].mxu1  ;;  %v3675_v37 = vmul.f32 -1.442695, %v1901_v59 }
0x180f   :  { %v5056_v61 = vadd.f32 %v1799_v54, %v1751_v60 }
0x1811   :  { %v1755_v62 = vpop.f32.mrb[28].mxu1 }
0x1812   :  { %v5058_v17 = vadd.f32 %v1795_v25, %v1755_v62  ;;  %v1757_v4 = vpop.f32.mrb[29].mxu1 }
0x1813   :  { %v5060_v63 = vadd.f32 %v1799_v54, %v1757_v4 }
0x1815   :  { %v1761_v2 = vpop.f32.mrb[30].mxu1 }
0x1816   :  { %v5062_v6 = vadd.f32 %v1795_v25, %v1761_v2  ;;  %v1763_v23 = vpop.f32.mrb[31].mxu1 }
0x1817   :  { %v5064_v0 = vadd.f32 %v1799_v54, %v1763_v23 }
0x1818   :  { %v4201_v1 = vpop.eup %4200 }
0x1819   :  { %1921 = vrot.lane.b32.xlu0 %v4201_v1, %s4502_s1  ;;  %v1767_v5 = vpop.f32.mrb[32].mxu1 }
0x181a   :  { %v5067_v31 = vadd.f32 %v1795_v25, %v1767_v5  ;;  %v1769_v8 = vpop.f32.mrb[33].mxu1 }
0x181b   :  { %v5069_v10 = vadd.f32 %v1799_v54, %v1769_v8 }
0x181d   :  { %v1773_v32 = vpop.f32.mrb[34].mxu1 }
0x181e   :  { %v5071_v35 = vadd.f32 %v1795_v25, %v1773_v32  ;;  %v1775_v41 = vpop.f32.mrb[35].mxu1 }
0x181f   :  { %v5073_v14 = vadd.f32 %v1799_v54, %v1775_v41 }
0x1821   :  { %v1779_v16 = vpop.f32.mrb[36].mxu1 }
0x1822   :  { %v5075_v18 = vadd.f32 %v1795_v25, %v1779_v16  ;;  %v1781_v34 = vpop.f32.mrb[37].mxu1 }
0x1823   :  { %v5077_v20 = vadd.f32 %v1799_v54, %v1781_v34 }
0x1825   :  { %v1785_v19 = vpop.f32.mrb[38].mxu1 }
0x1826   :  { %v5079_v22 = vadd.f32 %v1795_v25, %v1785_v19  ;;  %v1787_v24 = vpop.f32.mrb[39].mxu1 }
0x1827   :  { %v1817_v21 = vadd.f32 %v1799_v54, %v1787_v24 }
0x1829   :  { %v1902_v27 = vadd.f32 %v1898_v52, %v1817_v21 }
0x182b   :  { %4202 = vtanh.f32 %v1902_v27  ;;  %v3676_v33 = vmul.f32 -1.442695, %v1902_v27 }
0x182c   :  { %4204 = vpow2.f32 %v3675_v37 }
0x1835   :  { %v4203_v28 = vpop.eup %4202 }
0x1836   :  { %1923 = vrot.lane.b32.xlu1 %v4203_v28, %s4502_s1  ;;  %v4205_v30 = vpop.eup %4204 }
0x1837   :  { %v1909_v44 = vadd.f32 1.0, %v4205_v30 }
0x1839   :  { %4206 = vrcp.f32 %v1909_v44 }
0x183a   :  { %4208 = vpow2.f32 %v3676_v33 }
0x1843   :  { %v4207_v36 = vpop.eup %4206 }
0x1844   :  { %v4209_v12 = vpop.eup %4208  ;;  %v1917_v47 = vmul.f32 0.0, %v4207_v36 }
0x1845   :  { %v1910_v43 = vadd.f32 1.0, %v4209_v12 }
0x1847   :  { %4210 = vrcp.f32 %v1910_v43 }
0x1851   :  { %v4211_v15 = vpop.eup %4210 }
0x1852   :  { %v1918_v29 = vmul.f32 0.0, %v4211_v15 }
0x188b   :  { %v1922_v38 = vpop.permute.xlu0 %1921 }
0x188c   :  { %v1927_v40 = vmul.f32 %v4207_v36, %v1922_v38 }
0x188e   :  { %1931 = vrot.lane.b32.xlu0 %v1927_v40, %s4503_s25 }
0x18a8   :  { %v1924_v45 = vpop.permute.xlu1 %1923 }
0x18a9   :  { %v1928_v46 = vmul.f32 %v4211_v15, %v1924_v45 }
0x18ab   :  { %1933 = vrot.lane.b32.xlu1 %v1928_v46, %s4503_s25 }
0x1900   :  { %v1932_v48 = vpop.permute.xlu0 %1931 }
0x1901   :  { %v1937_v42 = vadd.f32 %v1932_v48, %v1917_v47 }
0x1903   :  { %4212 = vtanh.f32 %v1937_v42 }
0x190d   :  { %v4213_v49 = vpop.eup %4212 }
0x190e   :  { %1943 = vrot.lane.b32.xlu0 %v4213_v49, %s4502_s1 }
0x191d   :  { %v1934_v50 = vpop.permute.xlu1 %1933 }
0x191e   :  { %v1938_v51 = vadd.f32 %v1934_v50, %v1918_v29 }
0x1920   :  { %4214 = vtanh.f32 %v1938_v51 }
0x192a   :  { %v4215_v52 = vpop.eup %4214 }
0x192b   :  { %1945 = vrot.lane.b32.xlu1 %v4215_v52, %s4502_s1 }
0x1980   :  { %v1944_v53 = vpop.permute.xlu0 %1943 }
0x1981   :  { %v1949_v25 = vmul.f32 %v4207_v36, %v1944_v53 }
0x1983   :  { %1952 = vrot.lane.b32.xlu0 %v1949_v25, %s4503_s25 }
0x199d   :  { %v1946_v54 = vpop.permute.xlu1 %1945 }
0x199e   :  { %v1950_v55 = vmul.f32 %v4211_v15, %v1946_v54 }
0x19a0   :  { %1957 = vrot.lane.b32.xlu1 %v1950_v55, %s4503_s25 }
0x19f5   :  { %v1953_v56 = vpop.permute.xlu0 %1952 }
0x19f6   :  { %1955 = vst.msk [vmem:[#allocation4] sm:$0xff] %vm372_vm10, %v1953_v56  ;;  %3677 = vmatmul.mubr.msk.f32.vlgmr.msra.gmra.mrb[28].mxu0 %vm372_vm10, %v1953_v56 }
0x19f7   :  { %2034 = vmatprep.mubr.f32.mxu0 %v4501_v3  ;;  %3951 = vmatpush1.bf16.msra.mxu0 %v4996_v9 }
0x19f8   :  { %3953 = vmatprep.subr.bf16.mxu0 %v5000_v11 }
0x19fb   :  { %3955 = vmatpush1.bf16.msra.mxu0 %v5002_v13 }
0x19fc   :  { %3957 = vmatprep.subr.bf16.mxu0 %v4994_v7 }
0x1a12   :  { %v1958_v57 = vpop.permute.xlu1 %1957 }
0x1a13   :  { %1960 = vst.msk [vmem:[#allocation5 + $0x38] sm:$0xff] %vm372_vm10, %v1958_v57  ;;  %3678 = vmatmul.mubr.msk.f32.gmra.mrb[30].mxu0 %vm372_vm10, %v1958_v57 }
0x1a14   :  { %2168 = vmatprep.mubr.f32.mxu0 %v4501_v3 }
0x1ac9   :  { %v2031_v59 = vpop.f32.mrb[28].mxu0 }
0x1aca   :  { %v2040_v39 = vadd.f32 %v2031_v59, %v5054_v26  ;;  %v2033_v60 = vpop.f32.mrb[29].mxu0 }
0x1acc   :  { %4216 = vtanh.f32 %v2040_v39  ;;  %v3679_v5 = vmul.f32 -1.442695, %v2040_v39 }
0x1ad6   :  { %v4217_v62 = vpop.eup %4216 }
0x1ad7   :  { %2060 = vrot.lane.b32.xlu0 %v4217_v62, %s4502_s1 }
0x1ae6   :  { %v2036_v4 = vpop.f32.mrb[30].mxu0 }
0x1ae7   :  { %v2037_v2 = vpop.f32.mrb[31].mxu0 }
0x1ae8   :  { %v2041_v23 = vadd.f32 %v2037_v2, %v5077_v20 }
0x1aea   :  { %4218 = vtanh.f32 %v2041_v23  ;;  %v3680_v41 = vmul.f32 -1.442695, %v2041_v23 }
0x1aeb   :  { %4220 = vpow2.f32 %v3679_v5 }
0x1af4   :  { %v4219_v1 = vpop.eup %4218 }
0x1af5   :  { %2062 = vrot.lane.b32.xlu1 %v4219_v1, %s4502_s1  ;;  %v4221_v8 = vpop.eup %4220 }
0x1af6   :  { %v2048_v32 = vadd.f32 1.0, %v4221_v8 }
0x1af8   :  { %4222 = vrcp.f32 %v2048_v32 }
0x1af9   :  { %4224 = vpow2.f32 %v3680_v41 }
0x1b02   :  { %v4223_v26 = vpop.eup %4222 }
0x1b03   :  { %v4225_v19 = vpop.eup %4224  ;;  %v2056_v28 = vmul.f32 %v4223_v26, %v1937_v42 }
0x1b04   :  { %v2049_v24 = vadd.f32 1.0, %v4225_v19 }
0x1b06   :  { %4226 = vrcp.f32 %v2049_v24 }
0x1b10   :  { %v4227_v20 = vpop.eup %4226 }
0x1b11   :  { %v2057_v33 = vmul.f32 %v4227_v20, %v1938_v51 }
0x1b49   :  { %v2061_v16 = vpop.permute.xlu0 %2060 }
0x1b4a   :  { %v2066_v34 = vmul.f32 %v4223_v26, %v2061_v16 }
0x1b4c   :  { %2070 = vrot.lane.b32.xlu0 %v2066_v34, %s4503_s25 }
0x1b67   :  { %v2063_v21 = vpop.permute.xlu1 %2062 }
0x1b68   :  { %v2067_v27 = vmul.f32 %v4227_v20, %v2063_v21 }
0x1b6a   :  { %2072 = vrot.lane.b32.xlu1 %v2067_v27, %s4503_s25 }
0x1bbe   :  { %v2071_v37 = vpop.permute.xlu0 %2070 }
0x1bbf   :  { %v2076_v30 = vadd.f32 %v2071_v37, %v2056_v28 }
0x1bc1   :  { %4228 = vtanh.f32 %v2076_v30 }
0x1bcb   :  { %v4229_v44 = vpop.eup %4228 }
0x1bcc   :  { %2082 = vrot.lane.b32.xlu0 %v4229_v44, %s4502_s1 }
0x1bdc   :  { %v2073_v36 = vpop.permute.xlu1 %2072 }
0x1bdd   :  { %v2077_v38 = vadd.f32 %v2073_v36, %v2057_v33 }
0x1bdf   :  { %4230 = vtanh.f32 %v2077_v38 }
0x1be9   :  { %v4231_v40 = vpop.eup %4230 }
0x1bea   :  { %2084 = vrot.lane.b32.xlu1 %v4231_v40, %s4502_s1 }
0x1c3e   :  { %v2083_v12 = vpop.permute.xlu0 %2082 }
0x1c3f   :  { %v2088_v43 = vmul.f32 %v4223_v26, %v2083_v12 }
0x1c41   :  { %2091 = vrot.lane.b32.xlu0 %v2088_v43, %s4503_s25 }
0x1c5c   :  { %v2085_v15 = vpop.permute.xlu1 %2084 }
0x1c5d   :  { %v2089_v45 = vmul.f32 %v4227_v20, %v2085_v15 }
0x1c5f   :  { %2096 = vrot.lane.b32.xlu1 %v2089_v45, %s4503_s25 }
0x1cb3   :  { %v2092_v46 = vpop.permute.xlu0 %2091 }
0x1cb4   :  { %2094 = vst.msk [vmem:[#allocation4 + $0x8] sm:$0xff] %vm372_vm10, %v2092_v46  ;;  %3681 = vmatmul.mubr.msk.f32.vlgmr.msra.gmra.mrb[32].mxu0 %vm372_vm10, %v2092_v46 }
0x1cb5   :  { %2173 = vmatprep.mubr.f32.mxu0 %v4501_v3  ;;  %3959 = vmatpush1.bf16.msra.mxu0 %v4996_v9 }
0x1cb6   :  { %3961 = vmatprep.subr.bf16.mxu0 %v5000_v11 }
0x1cb9   :  { %3963 = vmatpush1.bf16.msra.mxu0 %v5002_v13 }
0x1cba   :  { %3965 = vmatprep.subr.bf16.mxu0 %v4994_v7 }
0x1cd1   :  { %v2097_v47 = vpop.permute.xlu1 %2096 }
0x1cd2   :  { %2099 = vst.msk [vmem:[#allocation5 + $0x30] sm:$0xff] %vm372_vm10, %v2097_v47  ;;  %3682 = vmatmul.mubr.msk.f32.gmra.mrb[34].mxu0 %vm372_vm10, %v2097_v47 }
0x1cd3   :  { %2307 = vmatprep.mubr.f32.mxu0 %v4501_v3 }
0x1d87   :  { %v2170_v48 = vpop.f32.mrb[32].mxu0 }
0x1d88   :  { %v2179_v42 = vadd.f32 %v2170_v48, %v5058_v17  ;;  %v2172_v49 = vpop.f32.mrb[33].mxu0 }
0x1d8a   :  { %4232 = vtanh.f32 %v2179_v42  ;;  %v3683_v25 = vmul.f32 -1.442695, %v2179_v42 }
0x1d94   :  { %v4233_v29 = vpop.eup %4232 }
0x1d95   :  { %2199 = vrot.lane.b32.xlu0 %v4233_v29, %s4502_s1 }
0x1da5   :  { %v2175_v50 = vpop.f32.mrb[34].mxu0 }
0x1da6   :  { %v2176_v51 = vpop.f32.mrb[35].mxu0 }
0x1da7   :  { %v2180_v52 = vadd.f32 %v2176_v51, %v5073_v14 }
0x1da9   :  { %4234 = vtanh.f32 %v2180_v52  ;;  %v3684_v17 = vmul.f32 -1.442695, %v2180_v52 }
0x1daa   :  { %4236 = vpow2.f32 %v3683_v25 }
0x1db3   :  { %v4235_v53 = vpop.eup %4234 }
0x1db4   :  { %2201 = vrot.lane.b32.xlu1 %v4235_v53, %s4502_s1  ;;  %v4237_v54 = vpop.eup %4236 }
0x1db5   :  { %v2187_v55 = vadd.f32 1.0, %v4237_v54 }
0x1db7   :  { %4238 = vrcp.f32 %v2187_v55 }
0x1db8   :  { %4240 = vpow2.f32 %v3684_v17 }
0x1dc1   :  { %v4239_v56 = vpop.eup %4238 }
0x1dc2   :  { %v4241_v39 = vpop.eup %4240  ;;  %v2195_v2 = vmul.f32 %v4239_v56, %v2076_v30 }
0x1dc3   :  { %v2188_v60 = vadd.f32 1.0, %v4241_v39 }
0x1dc5   :  { %4242 = vrcp.f32 %v2188_v60 }
0x1dcf   :  { %v4243_v14 = vpop.eup %4242 }
0x1dd0   :  { %v2196_v8 = vmul.f32 %v4243_v14, %v2077_v38 }
0x1e07   :  { %v2200_v57 = vpop.permute.xlu0 %2199 }
0x1e08   :  { %v2205_v59 = vmul.f32 %v4239_v56, %v2200_v57 }
0x1e0a   :  { %2209 = vrot.lane.b32.xlu0 %v2205_v59, %s4503_s25 }
0x1e26   :  { %v2202_v62 = vpop.permute.xlu1 %2201 }
0x1e27   :  { %v2206_v4 = vmul.f32 %v4243_v14, %v2202_v62 }
0x1e29   :  { %2211 = vrot.lane.b32.xlu1 %v2206_v4, %s4503_s25 }
0x1e7c   :  { %v2210_v23 = vpop.permute.xlu0 %2209 }
0x1e7d   :  { %v2215_v1 = vadd.f32 %v2210_v23, %v2195_v2 }
0x1e7f   :  { %4244 = vtanh.f32 %v2215_v1 }
0x1e89   :  { %v4245_v5 = vpop.eup %4244 }
0x1e8a   :  { %2221 = vrot.lane.b32.xlu0 %v4245_v5, %s4502_s1 }
0x1e9b   :  { %v2212_v32 = vpop.permute.xlu1 %2211 }
0x1e9c   :  { %v2216_v41 = vadd.f32 %v2212_v32, %v2196_v8 }
0x1e9e   :  { %4246 = vtanh.f32 %v2216_v41 }
0x1ea8   :  { %v4247_v26 = vpop.eup %4246 }
0x1ea9   :  { %2223 = vrot.lane.b32.xlu1 %v4247_v26, %s4502_s1 }
0x1efc   :  { %v2222_v16 = vpop.permute.xlu0 %2221 }
0x1efd   :  { %v2227_v34 = vmul.f32 %v4239_v56, %v2222_v16 }
0x1eff   :  { %2230 = vrot.lane.b32.xlu0 %v2227_v34, %s4503_s25 }
0x1f1b   :  { %v2224_v19 = vpop.permute.xlu1 %2223 }
0x1f1c   :  { %v2228_v24 = vmul.f32 %v4243_v14, %v2224_v19 }
0x1f1e   :  { %2235 = vrot.lane.b32.xlu1 %v2228_v24, %s4503_s25 }
0x1f71   :  { %v2231_v20 = vpop.permute.xlu0 %2230 }
0x1f72   :  { %2233 = vst.msk [vmem:[#allocation4 + $0x10] sm:$0xff] %vm372_vm10, %v2231_v20  ;;  %3685 = vmatmul.mubr.msk.f32.vlgmr.msra.gmra.mrb[36].mxu0 %vm372_vm10, %v2231_v20 }
0x1f73   :  { %2312 = vmatprep.mubr.f32.mxu0 %v4501_v3  ;;  %3967 = vmatpush1.bf16.msra.mxu0 %v4996_v9 }
0x1f74   :  { %3969 = vmatprep.subr.bf16.mxu0 %v5000_v11 }
0x1f77   :  { %3971 = vmatpush1.bf16.msra.mxu0 %v5002_v13 }
0x1f78   :  { %3973 = vmatprep.subr.bf16.mxu0 %v4994_v7 }
0x1f90   :  { %v2236_v21 = vpop.permute.xlu1 %2235 }
0x1f91   :  { %2238 = vst.msk [vmem:[#allocation5 + $0x28] sm:$0xff] %vm372_vm10, %v2236_v21  ;;  %3686 = vmatmul.mubr.msk.f32.gmra.mrb[38].mxu0 %vm372_vm10, %v2236_v21 }
0x1f92   :  { %2446 = vmatprep.mubr.f32.mxu0 %v4501_v3 }
0x2045   :  { %v2309_v27 = vpop.f32.mrb[36].mxu0 }
0x2046   :  { %v2318_v28 = vadd.f32 %v2309_v27, %v5062_v6  ;;  %v2311_v37 = vpop.f32.mrb[37].mxu0 }
0x2048   :  { %4248 = vtanh.f32 %v2318_v28  ;;  %v3687_v40 = vmul.f32 -1.442695, %v2318_v28 }
0x2052   :  { %v4249_v30 = vpop.eup %4248 }
0x2053   :  { %2338 = vrot.lane.b32.xlu0 %v4249_v30, %s4502_s1 }
0x2064   :  { %v2314_v44 = vpop.f32.mrb[38].mxu0 }
0x2065   :  { %v2315_v33 = vpop.f32.mrb[39].mxu0 }
0x2066   :  { %v2319_v36 = vadd.f32 %v2315_v33, %v5069_v10 }
0x2068   :  { %4250 = vtanh.f32 %v2319_v36  ;;  %v3688_v45 = vmul.f32 -1.442695, %v2319_v36 }
0x2069   :  { %4252 = vpow2.f32 %v3687_v40 }
0x2072   :  { %v4251_v38 = vpop.eup %4250 }
0x2073   :  { %2340 = vrot.lane.b32.xlu1 %v4251_v38, %s4502_s1  ;;  %v4253_v12 = vpop.eup %4252 }
0x2074   :  { %v2326_v43 = vadd.f32 1.0, %v4253_v12 }
0x2076   :  { %4254 = vrcp.f32 %v2326_v43 }
0x2077   :  { %4256 = vpow2.f32 %v3688_v45 }
0x2080   :  { %v4255_v15 = vpop.eup %4254 }
0x2081   :  { %v4257_v47 = vpop.eup %4256  ;;  %v2334_v29 = vmul.f32 %v4255_v15, %v2215_v1 }
0x2082   :  { %v2327_v48 = vadd.f32 1.0, %v4257_v47 }
0x2084   :  { %4258 = vrcp.f32 %v2327_v48 }
0x208e   :  { %v4259_v10 = vpop.eup %4258 }
0x208f   :  { %v2335_v53 = vmul.f32 %v4259_v10, %v2216_v41 }
0x20c5   :  { %v2339_v6 = vpop.permute.xlu0 %2338 }
0x20c6   :  { %v2344_v46 = vmul.f32 %v4255_v15, %v2339_v6 }
0x20c8   :  { %2348 = vrot.lane.b32.xlu0 %v2344_v46, %s4503_s25 }
0x20e5   :  { %v2341_v42 = vpop.permute.xlu1 %2340 }
0x20e6   :  { %v2345_v49 = vmul.f32 %v4259_v10, %v2341_v42 }
0x20e8   :  { %2350 = vrot.lane.b32.xlu1 %v2345_v49, %s4503_s25 }
0x213a   :  { %v2349_v50 = vpop.permute.xlu0 %2348 }
0x213b   :  { %v2354_v51 = vadd.f32 %v2349_v50, %v2334_v29 }
0x213d   :  { %4260 = vtanh.f32 %v2354_v51 }
0x2147   :  { %v4261_v52 = vpop.eup %4260 }
0x2148   :  { %2360 = vrot.lane.b32.xlu0 %v4261_v52, %s4502_s1 }
0x215a   :  { %v2351_v25 = vpop.permute.xlu1 %2350 }
0x215b   :  { %v2355_v54 = vadd.f32 %v2351_v25, %v2335_v53 }
0x215d   :  { %4262 = vtanh.f32 %v2355_v54 }
0x2167   :  { %v4263_v55 = vpop.eup %4262 }
0x2168   :  { %2362 = vrot.lane.b32.xlu1 %v4263_v55, %s4502_s1 }
0x21ba   :  { %v2361_v56 = vpop.permute.xlu0 %2360 }
0x21bb   :  { %v2366_v17 = vmul.f32 %v4255_v15, %v2361_v56 }
0x21bd   :  { %2369 = vrot.lane.b32.xlu0 %v2366_v17, %s4503_s25 }
0x21da   :  { %v2363_v57 = vpop.permute.xlu1 %2362 }
0x21db   :  { %v2367_v59 = vmul.f32 %v4259_v10, %v2363_v57 }
0x21dd   :  { %2374 = vrot.lane.b32.xlu1 %v2367_v59, %s4503_s25 }
0x222f   :  { %v2370_v39 = vpop.permute.xlu0 %2369 }
0x2230   :  { %2372 = vst.msk [vmem:[#allocation4 + $0x18] sm:$0xff] %vm372_vm10, %v2370_v39  ;;  %3689 = vmatmul.mubr.msk.f32.vlgmr.msra.gmra.mrb[40].mxu0 %vm372_vm10, %v2370_v39 }
0x2231   :  { %2451 = vmatprep.mubr.f32.mxu0 %v4501_v3  ;;  %3975 = vmatpush1.bf16.msra.mxu0 %v4996_v9 }
0x2232   :  { %3977 = vmatprep.subr.bf16.mxu0 %v5000_v11 }
0x2235   :  { %3979 = vmatpush1.bf16.msra.mxu0 %v5002_v13 }
0x2236   :  { %3981 = vmatprep.subr.bf16.mxu0 %v4994_v7 }
0x224f   :  { %v2375_v60 = vpop.permute.xlu1 %2374 }
0x2250   :  { %2377 = vst.msk [vmem:[#allocation5 + $0x20] sm:$0xff] %vm372_vm10, %v2375_v60  ;;  %3690 = vmatmul.mubr.msk.f32.gmra.mrb[42].mxu0 %vm372_vm10, %v2375_v60 }
0x2251   :  { %2585 = vmatprep.mubr.f32.mxu0 %v4501_v3 }
0x2303   :  { %v2448_v14 = vpop.f32.mrb[40].mxu0 }
0x2304   :  { %v2457_v62 = vadd.f32 %v2448_v14, %v5067_v31  ;;  %v2450_v4 = vpop.f32.mrb[41].mxu0 }
0x2306   :  { %4264 = vtanh.f32 %v2457_v62  ;;  %v3691_v32 = vmul.f32 -1.442695, %v2457_v62 }
0x2310   :  { %v4265_v2 = vpop.eup %4264 }
0x2311   :  { %2477 = vrot.lane.b32.xlu0 %v4265_v2, %s4502_s1 }
0x2323   :  { %v2453_v23 = vpop.f32.mrb[42].mxu0 }
0x2324   :  { %v2454_v1 = vpop.f32.mrb[43].mxu0 }
0x2325   :  { %v2458_v5 = vadd.f32 %v2454_v1, %v5064_v0 }
0x2327   :  { %4266 = vtanh.f32 %v2458_v5  ;;  %v3692_v19 = vmul.f32 -1.442695, %v2458_v5 }
0x2328   :  { %4268 = vpow2.f32 %v3691_v32 }
0x2331   :  { %v4267_v8 = vpop.eup %4266 }
0x2332   :  { %2479 = vrot.lane.b32.xlu1 %v4267_v8, %s4502_s1  ;;  %v4269_v41 = vpop.eup %4268 }
0x2333   :  { %v2465_v26 = vadd.f32 1.0, %v4269_v41 }
0x2335   :  { %4270 = vrcp.f32 %v2465_v26 }
0x2336   :  { %4272 = vpow2.f32 %v3692_v19 }
0x233f   :  { %v4271_v16 = vpop.eup %4270 }
0x2340   :  { %v4273_v24 = vpop.eup %4272  ;;  %v2473_v28 = vmul.f32 %v4271_v16, %v2354_v51 }
0x2341   :  { %v2466_v20 = vadd.f32 1.0, %v4273_v24 }
0x2343   :  { %4274 = vrcp.f32 %v2466_v20 }
0x234d   :  { %v4275_v0 = vpop.eup %4274 }
0x234e   :  { %v2474_v33 = vmul.f32 %v4275_v0, %v2355_v54 }
0x2383   :  { %v2478_v31 = vpop.permute.xlu0 %2477 }
0x2384   :  { %v2483_v34 = vmul.f32 %v4271_v16, %v2478_v31 }
0x2386   :  { %2487 = vrot.lane.b32.xlu0 %v2483_v34, %s4503_s25 }
0x23a4   :  { %v2480_v21 = vpop.permute.xlu1 %2479 }
0x23a5   :  { %v2484_v27 = vmul.f32 %v4275_v0, %v2480_v21 }
0x23a7   :  { %2489 = vrot.lane.b32.xlu1 %v2484_v27, %s4503_s25 }
0x23f8   :  { %v2488_v37 = vpop.permute.xlu0 %2487 }
0x23f9   :  { %v2493_v30 = vadd.f32 %v2488_v37, %v2473_v28 }
0x23fb   :  { %4276 = vtanh.f32 %v2493_v30 }
0x2405   :  { %v4277_v44 = vpop.eup %4276 }
0x2406   :  { %2499 = vrot.lane.b32.xlu0 %v4277_v44, %s4502_s1 }
0x2419   :  { %v2490_v36 = vpop.permute.xlu1 %2489 }
0x241a   :  { %v2494_v38 = vadd.f32 %v2490_v36, %v2474_v33 }
0x241c   :  { %4278 = vtanh.f32 %v2494_v38 }
0x2426   :  { %v4279_v40 = vpop.eup %4278 }
0x2427   :  { %2501 = vrot.lane.b32.xlu1 %v4279_v40, %s4502_s1 }
0x2478   :  { %v2500_v12 = vpop.permute.xlu0 %2499 }
0x2479   :  { %v2505_v43 = vmul.f32 %v4271_v16, %v2500_v12 }
0x247b   :  { %2508 = vrot.lane.b32.xlu0 %v2505_v43, %s4503_s25 }
0x2499   :  { %v2502_v15 = vpop.permute.xlu1 %2501 }
0x249a   :  { %v2506_v6 = vmul.f32 %v4275_v0, %v2502_v15 }
0x249c   :  { %2513 = vrot.lane.b32.xlu1 %v2506_v6, %s4503_s25 }
0x24ed   :  { %v2509_v45 = vpop.permute.xlu0 %2508 }
0x24ee   :  { %2511 = vst.msk [vmem:[#allocation4 + $0x20] sm:$0xff] %vm372_vm10, %v2509_v45  ;;  %3693 = vmatmul.mubr.msk.f32.vlgmr.msra.gmra.mrb[44].mxu0 %vm372_vm10, %v2509_v45 }
0x24ef   :  { %2590 = vmatprep.mubr.f32.mxu0 %v4501_v3  ;;  %3983 = vmatpush1.bf16.msra.mxu0 %v4996_v9 }
0x24f0   :  { %3985 = vmatprep.subr.bf16.mxu0 %v5000_v11 }
0x24f3   :  { %3987 = vmatpush1.bf16.msra.mxu0 %v5002_v13 }
0x24f4   :  { %3989 = vmatprep.subr.bf16.mxu0 %v4994_v7 }
0x250e   :  { %v2514_v46 = vpop.permute.xlu1 %2513 }
0x250f   :  { %2516 = vst.msk [vmem:[#allocation5 + $0x18] sm:$0xff] %vm372_vm10, %v2514_v46  ;;  %3694 = vmatmul.mubr.msk.f32.gmra.mrb[46].mxu0 %vm372_vm10, %v2514_v46 }
0x2510   :  { %2724 = vmatprep.mubr.f32.mxu0 %v4501_v3 }
0x25c1   :  { %v2587_v47 = vpop.f32.mrb[44].mxu0 }
0x25c2   :  { %v2596_v48 = vadd.f32 %v2587_v47, %v5071_v35  ;;  %v2589_v10 = vpop.f32.mrb[45].mxu0 }
0x25c4   :  { %4280 = vtanh.f32 %v2596_v48  ;;  %v3695_v51 = vmul.f32 -1.442695, %v2596_v48 }
0x25ce   :  { %v4281_v42 = vpop.eup %4280 }
0x25cf   :  { %2616 = vrot.lane.b32.xlu0 %v4281_v42, %s4502_s1 }
0x25e2   :  { %v2592_v49 = vpop.f32.mrb[46].mxu0 }
0x25e3   :  { %v2593_v29 = vpop.f32.mrb[47].mxu0 }
0x25e4   :  { %v2597_v50 = vadd.f32 %v2593_v29, %v5060_v63 }
0x25e6   :  { %4282 = vtanh.f32 %v2597_v50  ;;  %v3696_v55 = vmul.f32 -1.442695, %v2597_v50 }
0x25e7   :  { %4284 = vpow2.f32 %v3695_v51 }
0x25f0   :  { %v4283_v7 = vpop.eup %4282 }
0x25f1   :  { %2618 = vrot.lane.b32.xlu1 %v4283_v7, %s4502_s1  ;;  %v4285_v52 = vpop.eup %4284 }
0x25f2   :  { %v2604_v53 = vadd.f32 1.0, %v4285_v52 }
0x25f4   :  { %4286 = vrcp.f32 %v2604_v53 }
0x25f5   :  { %4288 = vpow2.f32 %v3696_v55 }
0x25fe   :  { %v4287_v25 = vpop.eup %4286 }
0x25ff   :  { %v4289_v56 = vpop.eup %4288  ;;  %v2612_v39 = vmul.f32 %v4287_v25, %v2493_v30 }
0x2600   :  { %v2605_v17 = vadd.f32 1.0, %v4289_v56 }
0x2602   :  { %4290 = vrcp.f32 %v2605_v17 }
0x260c   :  { %v4291_v63 = vpop.eup %4290 }
0x260d   :  { %v2613_v4 = vmul.f32 %v4291_v63, %v2494_v38 }
0x2641   :  { %v2617_v35 = vpop.permute.xlu0 %2616 }
0x2642   :  { %v2622_v54 = vmul.f32 %v4287_v25, %v2617_v35 }
0x2644   :  { %2626 = vrot.lane.b32.xlu0 %v2622_v54, %s4503_s25 }
0x2663   :  { %v2619_v57 = vpop.permute.xlu1 %2618 }
0x2664   :  { %v2623_v59 = vmul.f32 %v4291_v63, %v2619_v57 }
0x2666   :  { %2628 = vrot.lane.b32.xlu1 %v2623_v59, %s4503_s25 }
0x26b6   :  { %v2627_v60 = vpop.permute.xlu0 %2626 }
0x26b7   :  { %v2632_v14 = vadd.f32 %v2627_v60, %v2612_v39 }
0x26b9   :  { %4292 = vtanh.f32 %v2632_v14 }
0x26c3   :  { %v4293_v62 = vpop.eup %4292 }
0x26c4   :  { %2638 = vrot.lane.b32.xlu0 %v4293_v62, %s4502_s1 }
0x26d8   :  { %v2629_v2 = vpop.permute.xlu1 %2628 }
0x26d9   :  { %v2633_v23 = vadd.f32 %v2629_v2, %v2613_v4 }
0x26db   :  { %4294 = vtanh.f32 %v2633_v23 }
0x26e5   :  { %v4295_v1 = vpop.eup %4294 }
0x26e6   :  { %2640 = vrot.lane.b32.xlu1 %v4295_v1, %s4502_s1 }
0x2736   :  { %v2639_v5 = vpop.permute.xlu0 %2638 }
0x2737   :  { %v2644_v8 = vmul.f32 %v4287_v25, %v2639_v5 }
0x2739   :  { %2647 = vrot.lane.b32.xlu0 %v2644_v8, %s4503_s25 }
0x2758   :  { %v2641_v32 = vpop.permute.xlu1 %2640 }
0x2759   :  { %v2645_v41 = vmul.f32 %v4291_v63, %v2641_v32 }
0x275b   :  { %2652 = vrot.lane.b32.xlu1 %v2645_v41, %s4503_s25 }
0x27ab   :  { %v2648_v26 = vpop.permute.xlu0 %2647 }
0x27ac   :  { %2650 = vst.msk [vmem:[#allocation4 + $0x28] sm:$0xff] %vm372_vm10, %v2648_v26  ;;  %3697 = vmatmul.mubr.msk.f32.vlgmr.msra.gmra.mrb[48].mxu0 %vm372_vm10, %v2648_v26 }
0x27ad   :  { %2729 = vmatprep.mubr.f32.mxu0 %v4501_v3  ;;  %3991 = vmatpush1.bf16.msra.mxu0 %v4996_v9 }
0x27ae   :  { %3993 = vmatprep.subr.bf16.mxu0 %v5000_v11 }
0x27b1   :  { %3995 = vmatpush1.bf16.msra.mxu0 %v5002_v13 }
0x27cd   :  { %v2653_v16 = vpop.permute.xlu1 %2652 }
0x27ce   :  { %2655 = vst.msk [vmem:[#allocation5 + $0x10] sm:$0xff] %vm372_vm10, %v2653_v16  ;;  %3698 = vmatmul.mubr.msk.f32.gmra.mrb[50].mxu0 %vm372_vm10, %v2653_v16  ;;  %v2954_v16 = vld [vmem:[%s5382_s9] sm:$0xff] }
0x27cf   :  { %2863 = vmatprep.mubr.f32.mxu0 %v4501_v3 }
0x287f   :  { %v2726_v31 = vpop.f32.mrb[48].mxu0 }
0x2880   :  { %v2735_v34 = vadd.f32 %v2726_v31, %v5075_v18  ;;  %v2728_v19 = vpop.f32.mrb[49].mxu0  ;;  %v2955_v31 = vld [vmem:[%s5382_s9 + $0x8] sm:$0xff] }
0x2881   :  { %v3996_v19 = vpack.c.bf16 %v2955_v31, %v2954_v16 }
0x2882   :  { %4296 = vtanh.f32 %v2735_v34  ;;  %v3699_v0 = vmul.f32 -1.442695, %v2735_v34  ;;  %v2956_v34 = vld [vmem:[%s5382_s9 + $0x10] sm:$0xff] }
0x2883   :  { %3997 = vmatprep.subr.bf16.mxu1 %v3996_v19 }
0x2884   :  { %3999 = vmatpush3.bf16.msra.mxu1 %v3996_v19 }
0x288c   :  { %v4297_v24 = vpop.eup %4296 }
0x288d   :  { %2755 = vrot.lane.b32.xlu0 %v4297_v24, %s4502_s1  ;;  %v2957_v24 = vld [vmem:[%s5382_s9 + $0x18] sm:$0xff] }
0x28a1   :  { %v2731_v9 = vpop.f32.mrb[50].mxu0 }
0x28a2   :  { %v2732_v20 = vpop.f32.mrb[51].mxu0  ;;  %v4000_v9 = vpack.c.bf16 %v2957_v24, %v2956_v34 }
0x28a3   :  { %v2736_v11 = vadd.f32 %v2732_v20, %v5056_v61 }
0x28a4   :  { %4001 = vmatprep.subr.bf16.mxu1 %v4000_v9 }
0x28a5   :  { %4298 = vtanh.f32 %v2736_v11  ;;  %v3700_v30 = vmul.f32 -1.442695, %v2736_v11  ;;  %4003 = vmatpush3.bf16.msra.mxu1 %v4000_v9 }
0x28a6   :  { %4300 = vpow2.f32 %v3699_v0  ;;  %v2951_v0 = vld [vmem:[%s5381_s8 + $0x8] sm:$0xff] }
0x28af   :  { %v4299_v13 = vpop.eup %4298 }
0x28b0   :  { %2757 = vrot.lane.b32.xlu1 %v4299_v13, %s4502_s1  ;;  %v4301_v21 = vpop.eup %4300  ;;  %v2950_v13 = vld [vmem:[%s5381_s8] sm:$0xff] }
0x28b1   :  { %v2743_v27 = vadd.f32 1.0, %v4301_v21  ;;  %v4004_v21 = vpack.c.bf16 %v2951_v0, %v2950_v13 }
0x28b3   :  { %4302 = vrcp.f32 %v2743_v27  ;;  %4005 = vmatprep.subr.bf16.mxu1 %v4004_v21 }
0x28b4   :  { %4304 = vpow2.f32 %v3700_v30  ;;  %v2952_v30 = vld [vmem:[%s5381_s8 + $0x10] sm:$0xff] }
0x28bd   :  { %v4303_v28 = vpop.eup %4302 }
0x28be   :  { %v4305_v44 = vpop.eup %4304  ;;  %v2751_v40 = vmul.f32 %v4303_v28, %v2632_v14 }
0x28bf   :  { %v2744_v33 = vadd.f32 1.0, %v4305_v44  ;;  %v2953_v44 = vld [vmem:[%s5381_s8 + $0x18] sm:$0xff] }
0x28c1   :  { %4306 = vrcp.f32 %v2744_v33 }
0x28cb   :  { %v4307_v61 = vpop.eup %4306 }
0x28cc   :  { %v2752_v6 = vmul.f32 %v4307_v61, %v2633_v23 }
0x28ff   :  { %v2756_v18 = vpop.permute.xlu0 %2755 }
0x2900   :  { %v2761_v37 = vmul.f32 %v4303_v28, %v2756_v18 }
0x2902   :  { %2765 = vrot.lane.b32.xlu0 %v2761_v37, %s4503_s25 }
0x2922   :  { %v2758_v36 = vpop.permute.xlu1 %2757 }
0x2923   :  { %v2762_v38 = vmul.f32 %v4307_v61, %v2758_v36 }
0x2925   :  { %2767 = vrot.lane.b32.xlu1 %v2762_v38, %s4503_s25  ;;  %v5256_v38 = vld [vmem:[#allocation5 + $0x10] sm:$0xff] }
0x2974   :  { %v2766_v12 = vpop.permute.xlu0 %2765 }
0x2975   :  { %v2771_v43 = vadd.f32 %v2766_v12, %v2751_v40  ;;  %v5260_v40 = vld [vmem:[#allocation5 + $0x18] sm:$0xff]  ;;  %v5264_v12 = vld [vmem:[#allocation5 + $0x20] sm:$0xff] }
0x2977   :  { %4308 = vtanh.f32 %v2771_v43 }
0x2981   :  { %v4309_v15 = vpop.eup %4308 }
0x2982   :  { %2777 = vrot.lane.b32.xlu0 %v4309_v15, %s4502_s1  ;;  %v5272_v15 = vld [vmem:[#allocation5 + $0x30] sm:$0xff] }
0x2997   :  { %v2768_v45 = vpop.permute.xlu1 %2767 }
0x2998   :  { %v2772_v46 = vadd.f32 %v2768_v45, %v2752_v6  ;;  %v5276_v6 = vld [vmem:[#allocation5 + $0x38] sm:$0xff]  ;;  %v5280_v45 = vld [vmem:[#allocation4] sm:$0xff] }
0x299a   :  { %4310 = vtanh.f32 %v2772_v46 }
0x29a4   :  { %v4311_v47 = vpop.eup %4310 }
0x29a5   :  { %2779 = vrot.lane.b32.xlu1 %v4311_v47, %s4502_s1  ;;  %v5288_v47 = vld [vmem:[#allocation4 + $0x10] sm:$0xff] }
0x29f4   :  { %v2778_v48 = vpop.permute.xlu0 %2777 }
0x29f5   :  { %v2783_v10 = vmul.f32 %v4303_v28, %v2778_v48  ;;  %v5292_v48 = vld [vmem:[#allocation4 + $0x18] sm:$0xff] }
0x29f7   :  { %2786 = vrot.lane.b32.xlu0 %v2783_v10, %s4503_s25  ;;  %v5296_v10 = vld [vmem:[#allocation4 + $0x20] sm:$0xff] }
0x2a17   :  { %v2780_v42 = vpop.permute.xlu1 %2779 }
0x2a18   :  { %v2784_v49 = vmul.f32 %v4307_v61, %v2780_v42  ;;  %v4008_v61 = vpack.c.bf16 %v2953_v44, %v2952_v30  ;;  %v5300_v42 = vld [vmem:[#allocation4 + $0x28] sm:$0xff] }
0x2a1a   :  { %2791 = vrot.lane.b32.xlu1 %v2784_v49, %s4503_s25 }
0x2a69   :  { %v2787_v29 = vpop.permute.xlu0 %2786 }
0x2a6a   :  { %2789 = vst.msk [vmem:[#allocation4 + $0x30] sm:$0xff] %vm372_vm10, %v2787_v29  ;;  %3701 = vmatmul.mubr.msk.f32.vlgmr.msra.gmra.mrb[52].mxu0 %vm372_vm10, %v2787_v29 }
0x2a6b   :  { %2868 = vmatprep.mubr.f32.mxu0 %v4501_v3 }
0x2a71   :  { %v5304_v49 = vld [vmem:[#allocation4 + $0x30] sm:$0xff] }
0x2a8c   :  { %v2792_v50 = vpop.permute.xlu1 %2791 }
0x2a8d   :  { %2794 = vst.msk [vmem:[#allocation5 + $0x8] sm:$0xff] %vm372_vm10, %v2792_v50  ;;  %3702 = vmatmul.mubr.msk.f32.gmra.mrb[54].mxu0 %vm372_vm10, %v2792_v50  ;;  %v3721_v50 = vld [vmem:[#allocation6] ss:$0 sm:$0xff] }
0x2a8e   :  { %3815 = vmatprep.mubr.msk.f32.mxu0 %vm4505_vm11, %v4501_v3 }
0x2a94   :  { %v5252_v36 = vld [vmem:[#allocation5 + $0x8] sm:$0xff] }
0x2b3d   :  { %v2865_v7 = vpop.f32.mrb[52].mxu0 }
0x2b3e   :  { %v2874_v51 = vadd.f32 %v2865_v7, %v5079_v22  ;;  %v2867_v52 = vpop.f32.mrb[53].mxu0 }
0x2b40   :  { %4312 = vtanh.f32 %v2874_v51  ;;  %v3703_v56 = vmul.f32 -1.442695, %v2874_v51 }
0x2b4a   :  { %v4313_v53 = vpop.eup %4312 }
0x2b4b   :  { %2894 = vrot.lane.b32.xlu1 %v4313_v53, %s4502_s1 }
0x2b60   :  { %v2870_v25 = vpop.f32.mrb[54].mxu0 }
0x2b61   :  { %v2871_v35 = vpop.f32.mrb[55].mxu0 }
0x2b62   :  { %v2875_v54 = vadd.f32 %v2871_v35, %v5052_v58 }
0x2b64   :  { %4314 = vtanh.f32 %v2875_v54  ;;  %v3704_v39 = vmul.f32 -1.442695, %v2875_v54 }
0x2b65   :  { %4316 = vpow2.f32 %v3703_v56 }
0x2b6e   :  { %v4315_v55 = vpop.eup %4314 }
0x2b6f   :  { %2896 = vrot.lane.b32.xlu0 %v4315_v55, %s4502_s1  ;;  %v4317_v17 = vpop.eup %4316 }
0x2b70   :  { %v2882_v63 = vadd.f32 1.0, %v4317_v17 }
0x2b72   :  { %4318 = vrcp.f32 %v2882_v63 }
0x2b73   :  { %4320 = vpow2.f32 %v3704_v39 }
0x2b7c   :  { %v4319_v57 = vpop.eup %4318 }
0x2b7d   :  { %v4321_v60 = vpop.eup %4320  ;;  %v2890_v2 = vmul.f32 %v4319_v57, %v2771_v43  ;;  %v5268_v43 = vld [vmem:[#allocation5 + $0x28] sm:$0xff] }
0x2b7e   :  { %v2883_v14 = vadd.f32 1.0, %v4321_v60 }
0x2b80   :  { %4322 = vrcp.f32 %v2883_v14 }
0x2b8a   :  { %v4323_v58 = vpop.eup %4322 }
0x2b8b   :  { %v2891_v8 = vmul.f32 %v4323_v58, %v2772_v46  ;;  %v5284_v46 = vld [vmem:[#allocation4 + $0x8] sm:$0xff] }
0x2bbd   :  { %v2895_v22 = vpop.permute.xlu1 %2894 }
0x2bbe   :  { %v2900_v59 = vmul.f32 %v4319_v57, %v2895_v22 }
0x2bc0   :  { %2904 = vrot.lane.b32.xlu1 %v2900_v59, %s4503_s25 }
0x2be1   :  { %v2897_v62 = vpop.permute.xlu0 %2896 }
0x2be2   :  { %v2901_v4 = vmul.f32 %v4323_v58, %v2897_v62 }
0x2be4   :  { %2906 = vrot.lane.b32.xlu0 %v2901_v4, %s4503_s25 }
0x2c32   :  { %v2905_v23 = vpop.permute.xlu1 %2904 }
0x2c33   :  { %v2910_v1 = vadd.f32 %v2905_v23, %v2890_v2 }
0x2c35   :  { %4324 = vtanh.f32 %v2910_v1 }
0x2c3f   :  { %v4325_v5 = vpop.eup %4324 }
0x2c40   :  { %2916 = vrot.lane.b32.xlu1 %v4325_v5, %s4502_s1 }
0x2c56   :  { %v2907_v32 = vpop.permute.xlu0 %2906 }
0x2c57   :  { %v2911_v41 = vadd.f32 %v2907_v32, %v2891_v8 }
0x2c59   :  { %4326 = vtanh.f32 %v2911_v41 }
0x2c63   :  { %v4327_v26 = vpop.eup %4326 }
0x2c64   :  { %2918 = vrot.lane.b32.xlu0 %v4327_v26, %s4502_s1 }
0x2cb2   :  { %v2917_v20 = vpop.permute.xlu1 %2916 }
0x2cb3   :  { %v2922_v11 = vmul.f32 %v4319_v57, %v2917_v20 }
0x2cb5   :  { %2925 = vrot.lane.b32.xlu1 %v2922_v11, %s4503_s25 }
0x2cd6   :  { %v2919_v27 = vpop.permute.xlu0 %2918 }
0x2cd7   :  { %v2923_v28 = vmul.f32 %v4323_v58, %v2919_v27 }
0x2cd9   :  { %2930 = vrot.lane.b32.xlu0 %v2923_v28, %s4503_s25 }
0x2d27   :  { %v2926_v18 = vpop.permute.xlu1 %2925 }
0x2d28   :  { %2928 = vst.msk [vmem:[#allocation4 + $0x38] sm:$0xff] %vm372_vm10, %v2926_v18 }
0x2d2f   :  { %v5308_v29 = vld [vmem:[#allocation4 + $0x38] sm:$0xff] }
0x2d4b   :  { %v2931_v37 = vpop.permute.xlu0 %2930 }
0x2d4c   :  { %2933 = vst.msk [vmem:[#allocation5] sm:$0xff] %vm372_vm10, %v2931_v37 }
0x2d53   :  { %v5248_v33 = vld [vmem:[#allocation5] sm:$0xff] }
0x2d54   :  { %3775 = vmatprep.mubr.msk.f32.mxu1 %vm372_vm10, %v5248_v33 }
0x2d55   :  { %3776 = vmatmul.mubr.msk.f32.vlgmr.msra.gmra.mrb[40].mxu1 %vm372_vm10, %v5252_v36 }
0x2d56   :  { %4007 = vmatpush3.bf16.msra.mxu1 %v4004_v21  ;;  %3778 = vmatprep.mubr.msk.f32.mxu1 %vm372_vm10, %v5256_v38 }
0x2d57   :  { %4009 = vmatprep.subr.bf16.mxu1 %v4008_v61 }
0x2d59   :  { %3779 = vmatmul.mubr.msk.f32.gmra.mrb[42].mxu1 %vm372_vm10, %v5260_v40 }
0x2d5a   :  { %3781 = vmatprep.mubr.msk.f32.mxu1 %vm372_vm10, %v5264_v12  ;;  %4011 = vmatpush3.bf16.msra.mxu1 %v4008_v61 }
0x2d5d   :  { %3782 = vmatmul.mubr.msk.f32.gmra.mrb[44].mxu1 %vm372_vm10, %v5268_v43 }
0x2d5e   :  { %3784 = vmatprep.mubr.msk.f32.mxu1 %vm372_vm10, %v5272_v15 }
0x2d61   :  { %3785 = vmatmul.mubr.msk.f32.gmra.mrb[46].mxu1 %vm372_vm10, %v5276_v6 }
0x2d62   :  { %3795 = vmatprep.mubr.msk.f32.mxu1 %vm372_vm10, %v5280_v45 }
0x2d65   :  { %3796 = vmatmul.mubr.msk.f32.vlgmr.msra.gmra.mrb[40].mxu1 %vm372_vm10, %v5284_v46 }
0x2d66   :  { %3798 = vmatprep.mubr.msk.f32.mxu1 %vm372_vm10, %v5288_v47 }
0x2d69   :  { %3799 = vmatmul.mubr.msk.f32.gmra.mrb[42].mxu1 %vm372_vm10, %v5292_v48 }
0x2d6a   :  { %3801 = vmatprep.mubr.msk.f32.mxu1 %vm372_vm10, %v5296_v10 }
0x2d6d   :  { %3802 = vmatmul.mubr.msk.f32.gmra.mrb[44].mxu1 %vm372_vm10, %v5300_v42 }
0x2d6e   :  { %3804 = vmatprep.mubr.msk.f32.mxu1 %vm372_vm10, %v5304_v49 }
0x2d71   :  { %3805 = vmatmul.mubr.msk.f32.gmra.mrb[46].mxu1 %vm372_vm10, %v5308_v29 }
0x2e38   :  { %v3797_v7 = vpop.f32.mrb[40].mxu1 }
0x2e39   :  { %v3224_v51 = vadd.f32 %v3797_v7, %v3721_v50  ;;  %v3177_v52 = vpop.f32.mrb[41].mxu1 }
0x2e3a   :  { %v3223_v53 = vadd.f32 %v3721_v50, %v3177_v52 }
0x2e3c   :  { %v3231_v25 = vmax.f32 %v3223_v53, %v3224_v51  ;;  %v3800_v35 = vpop.f32.mrb[42].mxu1 }
0x2e3d   :  { %v3187_v54 = vpop.f32.mrb[43].mxu1  ;;  %v3226_v56 = vadd.f32 %v3800_v35, %v3721_v50 }
0x2e3e   :  { %v3225_v55 = vadd.f32 %v3721_v50, %v3187_v54 }
0x2e40   :  { %v3232_v17 = vmax.f32 %v3231_v25, %v3225_v55  ;;  %v3803_v63 = vpop.f32.mrb[44].mxu1 }
0x2e41   :  { %v3197_v57 = vpop.f32.mrb[45].mxu1  ;;  %v3228_v39 = vadd.f32 %v3803_v63, %v3721_v50 }
0x2e42   :  { %v3227_v22 = vadd.f32 %v3721_v50, %v3197_v57  ;;  %v3233_v59 = vmax.f32 %v3232_v17, %v3226_v56 }
0x2e44   :  { %v3234_v60 = vmax.f32 %v3233_v59, %v3227_v22  ;;  %v3806_v14 = vpop.f32.mrb[46].mxu1 }
0x2e45   :  { %v3207_v58 = vpop.f32.mrb[47].mxu1  ;;  %v3230_v2 = vadd.f32 %v3806_v14, %v3721_v50  ;;  %v3352_v14 = vld [vmem:[#allocation16] sm:$0xff] }
0x2e46   :  { %v3229_v62 = vadd.f32 %v3721_v50, %v3207_v58  ;;  %v3235_v4 = vmax.f32 %v3234_v60, %v3228_v39  ;;  %v3353_v58 = vld [vmem:[#allocation16 + $0x8] sm:$0xff] }
0x2e48   :  { %v3236_v23 = vmax.f32 %v3235_v4, %v3229_v62  ;;  %v4504_v4 = vmov 0.0|0.0  }
0x2e49   :  { %4012 = vmatprep.subr.bf16.mxu0 %v4504_v4 }
0x2e4a   :  { %v3237_v1 = vmax.f32 %v3236_v23, %v3230_v2  ;;  %v3355_v23 = vld [vmem:[#allocation16 + $0x18] sm:$0xff] }
0x2e4c   :  { %v3238_v5 = vsub.f32 %v3223_v53, %v3237_v1  ;;  %v3239_v8 = vsub.f32 %v3224_v51, %v3237_v1  ;;  %v3240_v32 = vsub.f32 %v3225_v55, %v3237_v1  ;;  %v3241_v41 = vsub.f32 %v3226_v56, %v3237_v1 }
0x2e4d   :  { %v3242_v26 = vsub.f32 %v3227_v22, %v3237_v1  ;;  %v3243_v16 = vsub.f32 %v3228_v39, %v3237_v1  ;;  %v3244_v31 = vsub.f32 %v3229_v62, %v3237_v1  ;;  %v3245_v34 = vsub.f32 %v3230_v2, %v3237_v1  ;;  %v3354_v2 = vld [vmem:[#allocation16 + $0x10] sm:$0xff] }
0x2e4e   :  { %v3246_v19 = vmul.f32 1.442695, %v3238_v5  ;;  %v3248_v24 = vmul.f32 1.442695, %v3239_v8  ;;  %v3250_v9 = vmul.f32 1.442695, %v3240_v32  ;;  %v4013_v62 = vpack.c.bf16 %v3353_v58, %v3352_v14 }
0x2e4f   :  { %v3252_v20 = vmul.f32 1.442695, %v3241_v41  ;;  %v3254_v11 = vmul.f32 1.442695, %v3242_v26  ;;  %v3256_v13 = vmul.f32 1.442695, %v3243_v16  ;;  %v4016_v1 = vpack.c.bf16 %v3355_v23, %v3354_v2 }
0x2e50   :  { %4328 = vpow2.f32 %v3246_v19  ;;  %v3258_v0 = vmul.f32 1.442695, %v3244_v31  ;;  %v3260_v21 = vmul.f32 1.442695, %v3245_v34  ;;  %4014 = vmatpush3.bf16.msra.mxu0 %v4013_v62  ;;  %v3725_v58 = vld [vmem:[#allocation7] ss:$0 sm:$0xff] }
0x2e51   :  { %4330 = vpow2.f32 %v3248_v24  ;;  %4015 = vmatprep.subr.bf16.mxu0 %v4504_v4 }
0x2e52   :  { %4332 = vpow2.f32 %v3250_v9 }
0x2e53   :  { %4334 = vpow2.f32 %v3252_v20 }
0x2e54   :  { %4336 = vpow2.f32 %v3254_v11  ;;  %4017 = vmatpush3.bf16.msra.mxu0 %v4016_v1 }
0x2e55   :  { %4338 = vpow2.f32 %v3256_v13  ;;  %4018 = vmatprep.subr.bf16.mxu0 %v4504_v4 }
0x2e56   :  { %4340 = vpow2.f32 %v3258_v0 }
0x2e57   :  { %4342 = vpow2.f32 %v3260_v21 }
0x2e5a   :  { %v4329_v27 = vpop.eup %4328 }
0x2e5b   :  { %v4331_v28 = vpop.eup %4330 }
0x2e5c   :  { %v3262_v18 = vadd.f32 %v4331_v28, %v4329_v27  ;;  %v4333_v37 = vpop.eup %4332 }
0x2e5d   :  { %v4335_v44 = vpop.eup %4334 }
0x2e5e   :  { %v3263_v30 = vadd.f32 %v4333_v37, %v3262_v18  ;;  %v4337_v50 = vpop.eup %4336 }
0x2e5f   :  { %v4339_v51 = vpop.eup %4338 }
0x2e60   :  { %v3264_v61 = vadd.f32 %v4335_v44, %v3263_v30  ;;  %v4341_v53 = vpop.eup %4340 }
0x2e61   :  { %v4343_v35 = vpop.eup %4342 }
0x2e62   :  { %v3265_v7 = vadd.f32 %v4337_v50, %v3264_v61  ;;  %v3349_v61 = vld [vmem:[%s5384_s11 + $0x8] sm:$0xff] }
0x2e64   :  { %v3266_v52 = vadd.f32 %v4339_v51, %v3265_v7 }
0x2e66   :  { %v3267_v25 = vadd.f32 %v4341_v53, %v3266_v52  ;;  %v3350_v52 = vld [vmem:[%s5384_s11 + $0x10] sm:$0xff] }
0x2e68   :  { %v3268_v54 = vadd.f32 %v4343_v35, %v3267_v25 }
0x2e6a   :  { %4344 = vrcp.f32 %v3268_v54  ;;  %v3512_v54 = vld [vmem:[%s5387_s14 + $0x8] sm:$0xff] }
0x2e74   :  { %v4345_v55 = vpop.eup %4344 }
0x2e75   :  { %v3271_v56 = vmul.f32 %v4345_v55, %v4331_v28  ;;  %v3270_v17 = vmul.f32 %v4345_v55, %v4329_v27  ;;  %v3273_v63 = vmul.f32 %v4345_v55, %v4335_v44  ;;  %v3272_v57 = vmul.f32 %v4345_v55, %v4333_v37 }
0x2e76   :  { %v3275_v22 = vmul.f32 %v4345_v55, %v4339_v51  ;;  %v3274_v59 = vmul.f32 %v4345_v55, %v4337_v50  ;;  %v3277_v39 = vmul.f32 %v4345_v55, %v4343_v35  ;;  %v3276_v60 = vmul.f32 %v4345_v55, %v4341_v53  ;;  %v3351_v53 = vld [vmem:[%s5384_s11 + $0x18] sm:$0xff]  ;;  %v3511_v35 = vld [vmem:[%s5387_s14] sm:$0xff] }
0x2e77   :  { %3285 = vperm.xlu1 %4071, %v3271_v56   ;;  %3280 = vperm.xlu0 %4070, %v3270_v17   ;;  %v4025_v55 = vpack.c.bf16 %v3512_v54, %v3511_v35 }
0x2e7b   :  { %3295 = vperm.xlu1 %4071, %v3273_v63   ;;  %3290 = vperm.xlu0 %4070, %v3272_v57  }
0x2e7f   :  { %3305 = vperm.xlu1 %4071, %v3275_v22   ;;  %3300 = vperm.xlu0 %4070, %v3274_v59   ;;  %v3724_v22 = vld [vmem:[%s5386_s13] ss:$0 sm:$0xff] }
0x2e83   :  { %3315 = vperm.xlu1 %4071, %v3277_v39   ;;  %3310 = vperm.xlu0 %4070, %v3276_v60  }
0x2ef6   :  { %v3286_v5 = vpop.permute.xlu1 %3285  ;;  %v3281_v8 = vpop.permute.xlu0 %3280 }
0x2ef7   :  { %v3319_v32 = vmul.f32 %v3286_v5, %v5284_v46  ;;  %v3327_v41 = vmul.f32 %v3286_v5, %v5252_v36  ;;  %v3318_v26 = vmul.f32 %v3281_v8, %v5280_v45  ;;  %v3326_v16 = vmul.f32 %v3281_v8, %v5248_v33 }
0x2ef9   :  { %v3334_v19 = vadd.f32 %v3319_v32, %v3318_v26  ;;  %v3335_v24 = vadd.f32 %v3327_v41, %v3326_v16 }
0x2efa   :  { %v3296_v31 = vpop.permute.xlu1 %3295  ;;  %v3291_v34 = vpop.permute.xlu0 %3290 }
0x2efb   :  { %v3320_v9 = vmul.f32 %v3291_v34, %v5288_v47  ;;  %v3328_v20 = vmul.f32 %v3291_v34, %v5256_v38  ;;  %v3329_v11 = vmul.f32 %v3296_v31, %v5260_v40  ;;  %v3321_v46 = vmul.f32 %v3296_v31, %v5292_v48  ;;  %v3348_v48 = vld [vmem:[%s5384_s11] sm:$0xff] }
0x2efc   :  { %v4019_v50 = vpack.c.bf16 %v3349_v61, %v3348_v48 }
0x2efd   :  { %v3336_v13 = vadd.f32 %v3334_v19, %v3320_v9  ;;  %v3337_v0 = vadd.f32 %v3335_v24, %v3328_v20 }
0x2efe   :  { %v3306_v21 = vpop.permute.xlu1 %3305  ;;  %v3301_v36 = vpop.permute.xlu0 %3300 }
0x2eff   :  { %v3339_v27 = vadd.f32 %v3337_v0, %v3329_v11  ;;  %v3338_v45 = vadd.f32 %v3336_v13, %v3321_v46  ;;  %v3322_v33 = vmul.f32 %v3301_v36, %v5296_v10  ;;  %v3330_v28 = vmul.f32 %v3301_v36, %v5264_v12 }
0x2f00   :  { %v3331_v18 = vmul.f32 %v3306_v21, %v5268_v43  ;;  %v3323_v10 = vmul.f32 %v3306_v21, %v5300_v42  ;;  %v4022_v42 = vpack.c.bf16 %v3351_v53, %v3350_v52 }
0x2f01   :  { %v3341_v37 = vadd.f32 %v3339_v27, %v3330_v28  ;;  %v3340_v40 = vadd.f32 %v3338_v45, %v3322_v33 }
0x2f02   :  { %v3311_v47 = vpop.permute.xlu0 %3310  ;;  %v3316_v30 = vpop.permute.xlu1 %3315 }
0x2f03   :  { %v3332_v38 = vmul.f32 %v3311_v47, %v5272_v15  ;;  %v3343_v44 = vadd.f32 %v3341_v37, %v3331_v18  ;;  %v3333_v12 = vmul.f32 %v3316_v30, %v5276_v6  ;;  %v3342_v7 = vadd.f32 %v3340_v40, %v3323_v10 }
0x2f04   :  { %v3324_v51 = vmul.f32 %v3311_v47, %v5304_v49  ;;  %v3325_v49 = vmul.f32 %v3316_v30, %v5308_v29  ;;  %v3513_v29 = vld [vmem:[%s5387_s14 + $0x10] sm:$0xff] }
0x2f05   :  { %v3345_v43 = vadd.f32 %v3343_v44, %v3332_v38 }
0x2f06   :  { %v3344_v6 = vadd.f32 %v3342_v7, %v3324_v51 }
0x2f07   :  { %v3347_v15 = vadd.f32 %v3345_v43, %v3333_v12 }
0x2f08   :  { %v3346_v25 = vadd.f32 %v3344_v6, %v3325_v49 }
0x2f09   :  { %3816 = vmatmul.mubr.msk.f32.vlgmr.msra.gmra.mrb[56].mxu0 %vm372_vm10, %v3347_v15 }
0x2f0a   :  { %4020 = vmatpush3.bf16.msra.mxu0 %v4019_v50  ;;  %3826 = vmatprep.mubr.msk.f32.mxu0 %vm4505_vm11, %v4501_v3 }
0x2f0b   :  { %4021 = vmatprep.subr.bf16.mxu0 %v4504_v4 }
0x2f0e   :  { %4023 = vmatpush3.bf16.msra.mxu0 %v4022_v42 }
0x2f0f   :  { %4024 = vmatprep.subr.bf16.mxu0 %v4504_v4 }
0x2f11   :  { %3827 = vmatmul.mubr.msk.f32.vlgmr.msra.gmra.mrb[58].mxu0 %vm372_vm10, %v3346_v25 }
0x2f12   :  { %3837 = vmatprep.mubr.msk.f32.mxu0 %vm4505_vm11, %v4501_v3  ;;  %4026 = vmatpush3.bf16.msra.mxu0 %v4025_v55  ;;  %v3514_v3 = vld [vmem:[%s5387_s14 + $0x18] sm:$0xff] }
0x2f13   :  { %4027 = vmatprep.subr.bf16.mxu0 %v4504_v4  ;;  %v4028_v56 = vpack.c.bf16 %v3514_v3, %v3513_v29 }
0x2f16   :  { %4029 = vmatpush3.bf16.msra.mxu0 %v4028_v56 }
0x2fdc   :  { %v3425_v17 = vpop.f32.mrb[56].mxu0 }
0x2fdd   :  { %v3817_v63 = vpop.f32.mrb[57].mxu0 }
0x2fe4   :  { %v3498_v57 = vpop.f32.mrb[58].mxu0 }
0x2fe5   :  { %v3499_v59 = vadd.f32 %v3498_v57, %v3425_v17  ;;  %v3828_v39 = vpop.f32.mrb[59].mxu0 }
0x2fe7   :  { %v3509_v60 = vadd.f32 %v3724_v22, %v3499_v59 }
0x2fe9   :  { %v3510_v14 = vmax.f32 %v3509_v60, 0.0 }
0x2feb   :  { %3838 = vmatmul.mubr.msk.f32.vlgmr.msra.gmra.mrb[60].mxu0 %vm372_vm10, %v3510_v14 }
0x30be   :  { %v3591_v62 = vpop.f32.mrb[60].mxu0 }
0x30bf   :  { %v3592_v4 = vadd.f32 %v3725_v58, %v3591_v62  ;;  %v3839_v2 = vpop.f32.mrb[61].mxu0 }
0x30c1   :  { %v3727_v23 = vmul.f32 -1.442695, %v3592_v4 }
0x30c3   :  { %4346 = vpow2.f32 %v3727_v23 }
0x30cd   :  { %v4347_v1 = vpop.eup %4346 }
0x30ce   :  { %v3598_v5 = vadd.f32 1.0, %v4347_v1 }
0x30d0   :  { %4348 = vrcp.f32 %v3598_v5 }
0x30da   :  { %v4349_v8 = vpop.eup %4348 }
0x30db   :  { %3602 = vst.msk [vmem:[%s5388_s16] sm:$0xff] %vm3601_vm12, %v4349_v8 }
0x30dc   :  { %3607 = vsyncpa [#allocation9], 1 }
0x30dd   :  { %3608 = vsyncpa [#allocation11], 1 }
0x30de   :  { %3609 = vsyncpa [#allocation14], 1 }
0x30df   :  { %3610 = vsyncpa [#allocation17], 1 }

</bundles_post_ra>
